<compile_context>
chip_gen: v5e
topology: v5e:2x2
jax: 0.10.0
libtpu: 0.0.40
codegen_flags: <defaults>
</compile_context>

<pallas_src>
import jax
import jax.numpy as jnp
from jax.experimental import pallas as pl
from jax.experimental.pallas import tpu as pltpu

NUM_CLASSES = 50
FILTER = 3
BLOCKS = 3
LEAKY_SLOPE = 0.01   # nn.LeakyReLU() default
BN_EPS = 1e-5        # nn.BatchNorm2d default

_VMEM = pl.BlockSpec(memory_space=pltpu.MemorySpace.VMEM)


# --------------------------------------------------------------------------
# Kernel 1: fused conv(3x3, pad 1) + bias + BatchNorm + LeakyReLU + MaxPool2x2.
#   x_ref : (4, K, Mq) bf16  -- transposed im2col patches; leading axis is the
#                               2x2 pool position (a,b), K = 9*Cin,
#                               Mq = N*(H/2)*(W/2) rows in (n, i, j) order.
#   w_ref : (Cout, K)  bf16
#   b/g/bt: (Cout, 1)  f32
#   o_ref : (Cout, Mq) bf16  -- pooled activations, channel-major, lane-dense.
# --------------------------------------------------------------------------
def _block_kernel(x_ref, w_ref, b_ref, g_ref, bt_ref, o_ref):
    mq = x_ref.shape[2]
    inv_count = 1.0 / float(4 * mq)       # N*H*W conv outputs per channel

    # Conv: 4 MXU dots (one per pool position), f32 accumulation.
    ys = []
    s1 = None
    for q in range(4):
        y = jnp.dot(w_ref[...], x_ref[q], preferred_element_type=jnp.float32)
        y = y + b_ref[...]                                   # conv bias
        ys.append(y)
        s = jnp.sum(y, axis=1, keepdims=True)
        s1 = s if s1 is None else s1 + s

    # BatchNorm2d (training mode): biased batch stats over (N, H, W).
    # Two-pass (centered) variance avoids E[x^2]-E[x]^2 cancellation.
    mean = s1 * inv_count
    s2 = None
    for q in range(4):
        d = ys[q] - mean
        s = jnp.sum(d * d, axis=1, keepdims=True)
        s2 = s if s2 is None else s2 + s
    var = s2 * inv_count
    scale = g_ref[...] * jax.lax.rsqrt(var + BN_EPS)
    shift = bt_ref[...] - mean * scale

    # BN + LeakyReLU per pool position, then the 2x2 max-pool is a pure
    # elementwise max over the four position groups.
    out = None
    for q in range(4):
        z = ys[q] * scale + shift
        z = jnp.where(z >= 0.0, z, LEAKY_SLOPE * z)
        out = z if out is None else jnp.maximum(out, z)
    o_ref[...] = out.astype(o_ref.dtype)


# --------------------------------------------------------------------------
# Kernel 2: final linear layer (bf16 operands, f32 accumulate).
# --------------------------------------------------------------------------
def _linear_kernel(x_ref, w_ref, b_ref, o_ref):
    o_ref[...] = (
        jnp.dot(x_ref[...], w_ref[...], preferred_element_type=jnp.float32)
        + b_ref[...]
    )


# --------------------------------------------------------------------------
# XLA glue: tiny transposed im2col patch build (zero pad + 9 window slices).
#   act_cm: (Cin, N, H, W) bf16, channel-major.
#   result: (4, 9*Cin, N*(H/2)*(W/2)) bf16.
#     axis 0: pool position (a,b) = (y%2, x%2)
#     axis 1: K ordered (tap=(dy,dx), cin)  -- matches the folded conv weight
#     axis 2: M ordered (n, i, j)           -- matches the pooled output order
# --------------------------------------------------------------------------
def _build_patches(act_cm):
    cin, n, h, w = act_cm.shape
    h2, w2 = h // 2, w // 2
    xp = jnp.pad(act_cm, ((0, 0), (0, 0), (1, 1), (1, 1)))
    taps = [xp[:, :, dy:dy + h, dx:dx + w]
            for dy in range(FILTER) for dx in range(FILTER)]
    p = jnp.stack(taps, axis=0)                         # (9, Cin, N, H, W)
    p = p.reshape(FILTER * FILTER, cin, n, h2, 2, w2, 2)
    p = p.transpose(4, 6, 0, 1, 2, 3, 5)                # (2,2,9,Cin,N,H2,W2)
    return p.reshape(4, FILTER * FILTER * cin, n * h2 * w2)


def _conv_block(act_cm, w_t, b, gamma, beta):
    _, n, h, w = act_cm.shape
    cout = w_t.shape[0]
    h2, w2 = h // 2, w // 2
    patches = _build_patches(act_cm)
    pooled = pl.pallas_call(
        _block_kernel,
        out_shape=jax.ShapeDtypeStruct((cout, n * h2 * w2), jnp.bfloat16),
        in_specs=[_VMEM] * 5,
        out_specs=_VMEM,
    )(patches, w_t, b, gamma, beta)
    return pooled.reshape(cout, n, h2, w2)              # free metadata reshape


@jax.jit
def audio_magic_net_forward(x_nchw, params):
    # x_nchw: (N, 1, H, W) float32 -- PyTorch NCHW convention.
    act = jnp.transpose(x_nchw, (1, 0, 2, 3)).astype(jnp.bfloat16)  # (1,N,H,W)
    for (w_t, b, gamma, beta) in params["blocks"]:
        act = _conv_block(act, w_t, b, gamma, beta)
    # Channel-major (C, N, Hf, Wf) -> NHWC flatten (N, Hf*Wf*C); the NCHW
    # permutation PyTorch's .view() implies is pre-folded into fc_w_t.
    c, n, hf, wf = act.shape
    feats = jnp.transpose(act, (1, 2, 3, 0)).reshape(n, hf * wf * c)
    return pl.pallas_call(
        _linear_kernel,
        out_shape=jax.ShapeDtypeStruct((n, NUM_CLASSES), jnp.float32),
        in_specs=[_VMEM] * 3,
        out_specs=_VMEM,
    )(feats, params["fc_w_t"], params["fc_b"])


def init_params(key, blocks=BLOCKS, in_h=40, in_w=48):
    params = {"blocks": []}
    cin, cout = 1, 16
    for _ in range(blocks):
        key, k1, k2, k3, k4 = jax.random.split(key, 5)
        w = jax.random.normal(k1, (cout, cin, FILTER, FILTER), jnp.float32)
        w = w * (1.0 / jnp.sqrt(cin * FILTER * FILTER))
        b = 0.05 * jax.random.normal(k2, (cout,), jnp.float32)
        gamma = 1.0 + 0.05 * jax.random.normal(k3, (cout,), jnp.float32)
        beta = 0.05 * jax.random.normal(k4, (cout,), jnp.float32)
        # Fold OIHW -> (Cout, K) with K ordered (tap=(dy,dx), cin); bf16 MXU operand.
        w_t = jnp.transpose(w, (0, 2, 3, 1)).reshape(cout, FILTER * FILTER * cin)
        params["blocks"].append((w_t.astype(jnp.bfloat16),
                                 b.reshape(cout, 1),
                                 gamma.reshape(cout, 1),
                                 beta.reshape(cout, 1)))
        cin, cout = cout, cout * 2

    hf, wf, cf = in_h // 2 ** blocks, in_w // 2 ** blocks, 16 * 2 ** (blocks - 1)
    feat = hf * wf * cf
    assert feat == 1920, feat

    key, k1, k2 = jax.random.split(key, 3)
    fc_w = jax.random.normal(k1, (NUM_CLASSES, feat), jnp.float32) * (1.0 / jnp.sqrt(feat))
    # Fold PyTorch's NCHW flatten into the weight: reorder columns (c,h,w) -> (h,w,c)
    # so the NHWC-flattened features are consumed directly (no runtime transpose).
    fc_w_nhwc = (fc_w.reshape(NUM_CLASSES, cf, hf, wf)
                 .transpose(0, 2, 3, 1)
                 .reshape(NUM_CLASSES, feat))
    params["fc_w_t"] = jnp.transpose(fc_w_nhwc).astype(jnp.bfloat16)   # (1920, 50)
    params["fc_b"] = (0.05 * jax.random.normal(k2, (NUM_CLASSES,), jnp.float32)
                      ).reshape(1, NUM_CLASSES)
    return params


if __name__ == "__main__":
    key = jax.random.PRNGKey(0)
    kx, kp = jax.random.split(key)
    # (N=2, C=1, H=40, W=48): after 3 blocks -> (2, 5, 6, 64) -> 1920 features.
    x = jax.random.normal(kx, (2, 1, 40, 48), jnp.float32)
    params = init_params(kp, BLOCKS, in_h=40, in_w=48)
    logits = audio_magic_net_forward(x, params)
    jax.block_until_ready(logits)
    assert logits.shape == (2, NUM_CLASSES), logits.shape
    assert bool(jnp.all(jnp.isfinite(logits)))
    print("KERNEL_OK")
</pallas_src>

<mosaic_0001>
module attributes {stable_mosaic.version = 11 : i64} {
  func.func @_block_kernel(%arg0: memref<4x9x960xbf16, #tpu.memory_space<vmem>>, %arg1: memref<16x9xbf16, #tpu.memory_space<vmem>>, %arg2: memref<16x1xf32, #tpu.memory_space<vmem>>, %arg3: memref<16x1xf32, #tpu.memory_space<vmem>>, %arg4: memref<16x1xf32, #tpu.memory_space<vmem>>, %arg5: memref<16x960xbf16, #tpu.memory_space<vmem>>) attributes {dimension_semantics = [], scalar_prefetch = 0 : i64, scratch_operands = 0 : i64, tpu.core_type = #tpu.core_type<tc>} {
    %c0 = arith.constant 0 : index
    %c0_0 = arith.constant 0 : index
    %0 = vector.load %arg1[%c0, %c0_0] : memref<16x9xbf16, #tpu.memory_space<vmem>>, vector<16x9xbf16>
    %c0_1 = arith.constant 0 : index
    %c0_2 = arith.constant 0 : index
    %c0_3 = arith.constant 0 : index
    %1 = vector.load %arg0[%c0_1, %c0_2, %c0_3] : memref<4x9x960xbf16, #tpu.memory_space<vmem>>, vector<1x9x960xbf16>
    %2 = vector.shape_cast %1 : vector<1x9x960xbf16> to vector<9x960xbf16>
    %cst = arith.constant dense<0.000000e+00> : vector<16x960xf32>
    %3 = tpu.matmul %0, %2, %cst {dimension_numbers = #tpu.dot_dimension_numbers<[1], [0], [0], [1], [0, 0, 1, 1], [], []>} : vector<16x9xbf16>, vector<9x960xbf16>, vector<16x960xf32> -> vector<16x960xf32>
    %c0_4 = arith.constant 0 : index
    %c0_5 = arith.constant 0 : index
    %4 = vector.load %arg2[%c0_4, %c0_5] : memref<16x1xf32, #tpu.memory_space<vmem>>, vector<16x1xf32>
    %5 = vector.broadcast %4 : vector<16x1xf32> to vector<16x960xf32>
    %6 = arith.addf %3, %5 : vector<16x960xf32>
    %cst_6 = arith.constant dense<0.000000e+00> : vector<16xf32>
    %7 = vector.multi_reduction <add>, %6, %cst_6 [1] : vector<16x960xf32> to vector<16xf32>
    %8 = vector.shape_cast %7 : vector<16xf32> to vector<16x1xf32>
    %c0_7 = arith.constant 0 : index
    %c0_8 = arith.constant 0 : index
    %9 = vector.load %arg1[%c0_7, %c0_8] : memref<16x9xbf16, #tpu.memory_space<vmem>>, vector<16x9xbf16>
    %c1 = arith.constant 1 : index
    %c0_9 = arith.constant 0 : index
    %c0_10 = arith.constant 0 : index
    %10 = vector.load %arg0[%c1, %c0_9, %c0_10] : memref<4x9x960xbf16, #tpu.memory_space<vmem>>, vector<1x9x960xbf16>
    %11 = vector.shape_cast %10 : vector<1x9x960xbf16> to vector<9x960xbf16>
    %cst_11 = arith.constant dense<0.000000e+00> : vector<16x960xf32>
    %12 = tpu.matmul %9, %11, %cst_11 {dimension_numbers = #tpu.dot_dimension_numbers<[1], [0], [0], [1], [0, 0, 1, 1], [], []>} : vector<16x9xbf16>, vector<9x960xbf16>, vector<16x960xf32> -> vector<16x960xf32>
    %c0_12 = arith.constant 0 : index
    %c0_13 = arith.constant 0 : index
    %13 = vector.load %arg2[%c0_12, %c0_13] : memref<16x1xf32, #tpu.memory_space<vmem>>, vector<16x1xf32>
    %14 = vector.broadcast %13 : vector<16x1xf32> to vector<16x960xf32>
    %15 = arith.addf %12, %14 : vector<16x960xf32>
    %cst_14 = arith.constant dense<0.000000e+00> : vector<16xf32>
    %16 = vector.multi_reduction <add>, %15, %cst_14 [1] : vector<16x960xf32> to vector<16xf32>
    %17 = vector.shape_cast %16 : vector<16xf32> to vector<16x1xf32>
    %18 = arith.addf %8, %17 : vector<16x1xf32>
    %c0_15 = arith.constant 0 : index
    %c0_16 = arith.constant 0 : index
    %19 = vector.load %arg1[%c0_15, %c0_16] : memref<16x9xbf16, #tpu.memory_space<vmem>>, vector<16x9xbf16>
    %c2 = arith.constant 2 : index
    %c0_17 = arith.constant 0 : index
    %c0_18 = arith.constant 0 : index
    %20 = vector.load %arg0[%c2, %c0_17, %c0_18] : memref<4x9x960xbf16, #tpu.memory_space<vmem>>, vector<1x9x960xbf16>
    %21 = vector.shape_cast %20 : vector<1x9x960xbf16> to vector<9x960xbf16>
    %cst_19 = arith.constant dense<0.000000e+00> : vector<16x960xf32>
    %22 = tpu.matmul %19, %21, %cst_19 {dimension_numbers = #tpu.dot_dimension_numbers<[1], [0], [0], [1], [0, 0, 1, 1], [], []>} : vector<16x9xbf16>, vector<9x960xbf16>, vector<16x960xf32> -> vector<16x960xf32>
    %c0_20 = arith.constant 0 : index
    %c0_21 = arith.constant 0 : index
    %23 = vector.load %arg2[%c0_20, %c0_21] : memref<16x1xf32, #tpu.memory_space<vmem>>, vector<16x1xf32>
    %24 = vector.broadcast %23 : vector<16x1xf32> to vector<16x960xf32>
    %25 = arith.addf %22, %24 : vector<16x960xf32>
    %cst_22 = arith.constant dense<0.000000e+00> : vector<16xf32>
    %26 = vector.multi_reduction <add>, %25, %cst_22 [1] : vector<16x960xf32> to vector<16xf32>
    %27 = vector.shape_cast %26 : vector<16xf32> to vector<16x1xf32>
    %28 = arith.addf %18, %27 : vector<16x1xf32>
    %c0_23 = arith.constant 0 : index
    %c0_24 = arith.constant 0 : index
    %29 = vector.load %arg1[%c0_23, %c0_24] : memref<16x9xbf16, #tpu.memory_space<vmem>>, vector<16x9xbf16>
    %c3 = arith.constant 3 : index
    %c0_25 = arith.constant 0 : index
    %c0_26 = arith.constant 0 : index
    %30 = vector.load %arg0[%c3, %c0_25, %c0_26] : memref<4x9x960xbf16, #tpu.memory_space<vmem>>, vector<1x9x960xbf16>
    %31 = vector.shape_cast %30 : vector<1x9x960xbf16> to vector<9x960xbf16>
    %cst_27 = arith.constant dense<0.000000e+00> : vector<16x960xf32>
    %32 = tpu.matmul %29, %31, %cst_27 {dimension_numbers = #tpu.dot_dimension_numbers<[1], [0], [0], [1], [0, 0, 1, 1], [], []>} : vector<16x9xbf16>, vector<9x960xbf16>, vector<16x960xf32> -> vector<16x960xf32>
    %c0_28 = arith.constant 0 : index
    %c0_29 = arith.constant 0 : index
    %33 = vector.load %arg2[%c0_28, %c0_29] : memref<16x1xf32, #tpu.memory_space<vmem>>, vector<16x1xf32>
    %34 = vector.broadcast %33 : vector<16x1xf32> to vector<16x960xf32>
    %35 = arith.addf %32, %34 : vector<16x960xf32>
    %cst_30 = arith.constant dense<0.000000e+00> : vector<16xf32>
    %36 = vector.multi_reduction <add>, %35, %cst_30 [1] : vector<16x960xf32> to vector<16xf32>
    %37 = vector.shape_cast %36 : vector<16xf32> to vector<16x1xf32>
    %38 = arith.addf %28, %37 : vector<16x1xf32>
    %cst_31 = arith.constant 2.6041668E-4 : f32
    %39 = vector.broadcast %cst_31 : f32 to vector<16x1xf32>
    %40 = arith.mulf %38, %39 : vector<16x1xf32>
    %41 = vector.broadcast %40 : vector<16x1xf32> to vector<16x960xf32>
    %42 = arith.subf %6, %41 : vector<16x960xf32>
    %43 = arith.mulf %42, %42 : vector<16x960xf32>
    %cst_32 = arith.constant dense<0.000000e+00> : vector<16xf32>
    %44 = vector.multi_reduction <add>, %43, %cst_32 [1] : vector<16x960xf32> to vector<16xf32>
    %45 = vector.shape_cast %44 : vector<16xf32> to vector<16x1xf32>
    %46 = vector.broadcast %40 : vector<16x1xf32> to vector<16x960xf32>
    %47 = arith.subf %15, %46 : vector<16x960xf32>
    %48 = arith.mulf %47, %47 : vector<16x960xf32>
    %cst_33 = arith.constant dense<0.000000e+00> : vector<16xf32>
    %49 = vector.multi_reduction <add>, %48, %cst_33 [1] : vector<16x960xf32> to vector<16xf32>
    %50 = vector.shape_cast %49 : vector<16xf32> to vector<16x1xf32>
    %51 = arith.addf %45, %50 : vector<16x1xf32>
    %52 = vector.broadcast %40 : vector<16x1xf32> to vector<16x960xf32>
    %53 = arith.subf %25, %52 : vector<16x960xf32>
    %54 = arith.mulf %53, %53 : vector<16x960xf32>
    %cst_34 = arith.constant dense<0.000000e+00> : vector<16xf32>
    %55 = vector.multi_reduction <add>, %54, %cst_34 [1] : vector<16x960xf32> to vector<16xf32>
    %56 = vector.shape_cast %55 : vector<16xf32> to vector<16x1xf32>
    %57 = arith.addf %51, %56 : vector<16x1xf32>
    %58 = vector.broadcast %40 : vector<16x1xf32> to vector<16x960xf32>
    %59 = arith.subf %35, %58 : vector<16x960xf32>
    %60 = arith.mulf %59, %59 : vector<16x960xf32>
    %cst_35 = arith.constant dense<0.000000e+00> : vector<16xf32>
    %61 = vector.multi_reduction <add>, %60, %cst_35 [1] : vector<16x960xf32> to vector<16xf32>
    %62 = vector.shape_cast %61 : vector<16xf32> to vector<16x1xf32>
    %63 = arith.addf %57, %62 : vector<16x1xf32>
    %cst_36 = arith.constant 2.6041668E-4 : f32
    %64 = vector.broadcast %cst_36 : f32 to vector<16x1xf32>
    %65 = arith.mulf %63, %64 : vector<16x1xf32>
    %c0_37 = arith.constant 0 : index
    %c0_38 = arith.constant 0 : index
    %66 = vector.load %arg3[%c0_37, %c0_38] : memref<16x1xf32, #tpu.memory_space<vmem>>, vector<16x1xf32>
    %cst_39 = arith.constant 9.99999974E-6 : f32
    %67 = vector.broadcast %cst_39 : f32 to vector<16x1xf32>
    %68 = arith.addf %65, %67 : vector<16x1xf32>
    %69 = math.rsqrt %68 : vector<16x1xf32>
    %70 = arith.mulf %66, %69 : vector<16x1xf32>
    %c0_40 = arith.constant 0 : index
    %c0_41 = arith.constant 0 : index
    %71 = vector.load %arg4[%c0_40, %c0_41] : memref<16x1xf32, #tpu.memory_space<vmem>>, vector<16x1xf32>
    %72 = arith.mulf %40, %70 : vector<16x1xf32>
    %73 = arith.subf %71, %72 : vector<16x1xf32>
    %74 = vector.broadcast %70 : vector<16x1xf32> to vector<16x960xf32>
    %75 = arith.mulf %6, %74 : vector<16x960xf32>
    %76 = vector.broadcast %73 : vector<16x1xf32> to vector<16x960xf32>
    %77 = arith.addf %75, %76 : vector<16x960xf32>
    %cst_42 = arith.constant 0.000000e+00 : f32
    %78 = vector.broadcast %cst_42 : f32 to vector<16x960xf32>
    %79 = arith.cmpf oge, %77, %78 : vector<16x960xf32>
    %cst_43 = arith.constant 0.00999999977 : f32
    %80 = vector.broadcast %cst_43 : f32 to vector<16x960xf32>
    %81 = arith.mulf %80, %77 : vector<16x960xf32>
    %82 = arith.select %79, %77, %81 : vector<16x960xi1>, vector<16x960xf32>
    %83 = vector.broadcast %70 : vector<16x1xf32> to vector<16x960xf32>
    %84 = arith.mulf %15, %83 : vector<16x960xf32>
    %85 = vector.broadcast %73 : vector<16x1xf32> to vector<16x960xf32>
    %86 = arith.addf %84, %85 : vector<16x960xf32>
    %cst_44 = arith.constant 0.000000e+00 : f32
    %87 = vector.broadcast %cst_44 : f32 to vector<16x960xf32>
    %88 = arith.cmpf oge, %86, %87 : vector<16x960xf32>
    %cst_45 = arith.constant 0.00999999977 : f32
    %89 = vector.broadcast %cst_45 : f32 to vector<16x960xf32>
    %90 = arith.mulf %89, %86 : vector<16x960xf32>
    %91 = arith.select %88, %86, %90 : vector<16x960xi1>, vector<16x960xf32>
    %92 = arith.maximumf %82, %91 : vector<16x960xf32>
    %93 = vector.broadcast %70 : vector<16x1xf32> to vector<16x960xf32>
    %94 = arith.mulf %25, %93 : vector<16x960xf32>
    %95 = vector.broadcast %73 : vector<16x1xf32> to vector<16x960xf32>
    %96 = arith.addf %94, %95 : vector<16x960xf32>
    %cst_46 = arith.constant 0.000000e+00 : f32
    %97 = vector.broadcast %cst_46 : f32 to vector<16x960xf32>
    %98 = arith.cmpf oge, %96, %97 : vector<16x960xf32>
    %cst_47 = arith.constant 0.00999999977 : f32
    %99 = vector.broadcast %cst_47 : f32 to vector<16x960xf32>
    %100 = arith.mulf %99, %96 : vector<16x960xf32>
    %101 = arith.select %98, %96, %100 : vector<16x960xi1>, vector<16x960xf32>
    %102 = arith.maximumf %92, %101 : vector<16x960xf32>
    %103 = vector.broadcast %70 : vector<16x1xf32> to vector<16x960xf32>
    %104 = arith.mulf %35, %103 : vector<16x960xf32>
    %105 = vector.broadcast %73 : vector<16x1xf32> to vector<16x960xf32>
    %106 = arith.addf %104, %105 : vector<16x960xf32>
    %cst_48 = arith.constant 0.000000e+00 : f32
    %107 = vector.broadcast %cst_48 : f32 to vector<16x960xf32>
    %108 = arith.cmpf oge, %106, %107 : vector<16x960xf32>
    %cst_49 = arith.constant 0.00999999977 : f32
    %109 = vector.broadcast %cst_49 : f32 to vector<16x960xf32>
    %110 = arith.mulf %109, %106 : vector<16x960xf32>
    %111 = arith.select %108, %106, %110 : vector<16x960xi1>, vector<16x960xf32>
    %112 = arith.maximumf %102, %111 : vector<16x960xf32>
    %113 = arith.truncf %112 : vector<16x960xf32> to vector<16x960xbf16>
    %c0_50 = arith.constant 0 : index
    %c0_51 = arith.constant 0 : index
    %114 = vector.load %arg5[%c0_50, %c0_51] : memref<16x960xbf16, #tpu.memory_space<vmem>>, vector<16x960xbf16>
    tpu.vector_store %arg5[%c0_50, %c0_51], %113 {strides = array<i32>} : memref<16x960xbf16, #tpu.memory_space<vmem>>, vector<16x960xbf16>,
    return
  }
}

module attributes {stable_mosaic.version = 11 : i64} {
  func.func @_block_kernel(%arg0: memref<4x144x240xbf16, #tpu.memory_space<vmem>>, %arg1: memref<32x144xbf16, #tpu.memory_space<vmem>>, %arg2: memref<32x1xf32, #tpu.memory_space<vmem>>, %arg3: memref<32x1xf32, #tpu.memory_space<vmem>>, %arg4: memref<32x1xf32, #tpu.memory_space<vmem>>, %arg5: memref<32x240xbf16, #tpu.memory_space<vmem>>) attributes {dimension_semantics = [], scalar_prefetch = 0 : i64, scratch_operands = 0 : i64, tpu.core_type = #tpu.core_type<tc>} {
    %c0 = arith.constant 0 : index
    %c0_0 = arith.constant 0 : index
    %0 = vector.load %arg1[%c0, %c0_0] : memref<32x144xbf16, #tpu.memory_space<vmem>>, vector<32x144xbf16>
    %c0_1 = arith.constant 0 : index
    %c0_2 = arith.constant 0 : index
    %c0_3 = arith.constant 0 : index
    %1 = vector.load %arg0[%c0_1, %c0_2, %c0_3] : memref<4x144x240xbf16, #tpu.memory_space<vmem>>, vector<1x144x240xbf16>
    %2 = vector.shape_cast %1 : vector<1x144x240xbf16> to vector<144x240xbf16>
    %cst = arith.constant dense<0.000000e+00> : vector<32x240xf32>
    %3 = tpu.matmul %0, %2, %cst {dimension_numbers = #tpu.dot_dimension_numbers<[1], [0], [0], [1], [0, 0, 1, 1], [], []>} : vector<32x144xbf16>, vector<144x240xbf16>, vector<32x240xf32> -> vector<32x240xf32>
    %c0_4 = arith.constant 0 : index
    %c0_5 = arith.constant 0 : index
    %4 = vector.load %arg2[%c0_4, %c0_5] : memref<32x1xf32, #tpu.memory_space<vmem>>, vector<32x1xf32>
    %5 = vector.broadcast %4 : vector<32x1xf32> to vector<32x240xf32>
    %6 = arith.addf %3, %5 : vector<32x240xf32>
    %cst_6 = arith.constant dense<0.000000e+00> : vector<32xf32>
    %7 = vector.multi_reduction <add>, %6, %cst_6 [1] : vector<32x240xf32> to vector<32xf32>
    %8 = vector.shape_cast %7 : vector<32xf32> to vector<32x1xf32>
    %c0_7 = arith.constant 0 : index
    %c0_8 = arith.constant 0 : index
    %9 = vector.load %arg1[%c0_7, %c0_8] : memref<32x144xbf16, #tpu.memory_space<vmem>>, vector<32x144xbf16>
    %c1 = arith.constant 1 : index
    %c0_9 = arith.constant 0 : index
    %c0_10 = arith.constant 0 : index
    %10 = vector.load %arg0[%c1, %c0_9, %c0_10] : memref<4x144x240xbf16, #tpu.memory_space<vmem>>, vector<1x144x240xbf16>
    %11 = vector.shape_cast %10 : vector<1x144x240xbf16> to vector<144x240xbf16>
    %cst_11 = arith.constant dense<0.000000e+00> : vector<32x240xf32>
    %12 = tpu.matmul %9, %11, %cst_11 {dimension_numbers = #tpu.dot_dimension_numbers<[1], [0], [0], [1], [0, 0, 1, 1], [], []>} : vector<32x144xbf16>, vector<144x240xbf16>, vector<32x240xf32> -> vector<32x240xf32>
    %c0_12 = arith.constant 0 : index
    %c0_13 = arith.constant 0 : index
    %13 = vector.load %arg2[%c0_12, %c0_13] : memref<32x1xf32, #tpu.memory_space<vmem>>, vector<32x1xf32>
    %14 = vector.broadcast %13 : vector<32x1xf32> to vector<32x240xf32>
    %15 = arith.addf %12, %14 : vector<32x240xf32>
    %cst_14 = arith.constant dense<0.000000e+00> : vector<32xf32>
    %16 = vector.multi_reduction <add>, %15, %cst_14 [1] : vector<32x240xf32> to vector<32xf32>
    %17 = vector.shape_cast %16 : vector<32xf32> to vector<32x1xf32>
    %18 = arith.addf %8, %17 : vector<32x1xf32>
    %c0_15 = arith.constant 0 : index
    %c0_16 = arith.constant 0 : index
    %19 = vector.load %arg1[%c0_15, %c0_16] : memref<32x144xbf16, #tpu.memory_space<vmem>>, vector<32x144xbf16>
    %c2 = arith.constant 2 : index
    %c0_17 = arith.constant 0 : index
    %c0_18 = arith.constant 0 : index
    %20 = vector.load %arg0[%c2, %c0_17, %c0_18] : memref<4x144x240xbf16, #tpu.memory_space<vmem>>, vector<1x144x240xbf16>
    %21 = vector.shape_cast %20 : vector<1x144x240xbf16> to vector<144x240xbf16>
    %cst_19 = arith.constant dense<0.000000e+00> : vector<32x240xf32>
    %22 = tpu.matmul %19, %21, %cst_19 {dimension_numbers = #tpu.dot_dimension_numbers<[1], [0], [0], [1], [0, 0, 1, 1], [], []>} : vector<32x144xbf16>, vector<144x240xbf16>, vector<32x240xf32> -> vector<32x240xf32>
    %c0_20 = arith.constant 0 : index
    %c0_21 = arith.constant 0 : index
    %23 = vector.load %arg2[%c0_20, %c0_21] : memref<32x1xf32, #tpu.memory_space<vmem>>, vector<32x1xf32>
    %24 = vector.broadcast %23 : vector<32x1xf32> to vector<32x240xf32>
    %25 = arith.addf %22, %24 : vector<32x240xf32>
    %cst_22 = arith.constant dense<0.000000e+00> : vector<32xf32>
    %26 = vector.multi_reduction <add>, %25, %cst_22 [1] : vector<32x240xf32> to vector<32xf32>
    %27 = vector.shape_cast %26 : vector<32xf32> to vector<32x1xf32>
    %28 = arith.addf %18, %27 : vector<32x1xf32>
    %c0_23 = arith.constant 0 : index
    %c0_24 = arith.constant 0 : index
    %29 = vector.load %arg1[%c0_23, %c0_24] : memref<32x144xbf16, #tpu.memory_space<vmem>>, vector<32x144xbf16>
    %c3 = arith.constant 3 : index
    %c0_25 = arith.constant 0 : index
    %c0_26 = arith.constant 0 : index
    %30 = vector.load %arg0[%c3, %c0_25, %c0_26] : memref<4x144x240xbf16, #tpu.memory_space<vmem>>, vector<1x144x240xbf16>
    %31 = vector.shape_cast %30 : vector<1x144x240xbf16> to vector<144x240xbf16>
    %cst_27 = arith.constant dense<0.000000e+00> : vector<32x240xf32>
    %32 = tpu.matmul %29, %31, %cst_27 {dimension_numbers = #tpu.dot_dimension_numbers<[1], [0], [0], [1], [0, 0, 1, 1], [], []>} : vector<32x144xbf16>, vector<144x240xbf16>, vector<32x240xf32> -> vector<32x240xf32>
    %c0_28 = arith.constant 0 : index
    %c0_29 = arith.constant 0 : index
    %33 = vector.load %arg2[%c0_28, %c0_29] : memref<32x1xf32, #tpu.memory_space<vmem>>, vector<32x1xf32>
    %34 = vector.broadcast %33 : vector<32x1xf32> to vector<32x240xf32>
    %35 = arith.addf %32, %34 : vector<32x240xf32>
    %cst_30 = arith.constant dense<0.000000e+00> : vector<32xf32>
    %36 = vector.multi_reduction <add>, %35, %cst_30 [1] : vector<32x240xf32> to vector<32xf32>
    %37 = vector.shape_cast %36 : vector<32xf32> to vector<32x1xf32>
    %38 = arith.addf %28, %37 : vector<32x1xf32>
    %cst_31 = arith.constant 0.00104166672 : f32
    %39 = vector.broadcast %cst_31 : f32 to vector<32x1xf32>
    %40 = arith.mulf %38, %39 : vector<32x1xf32>
    %41 = vector.broadcast %40 : vector<32x1xf32> to vector<32x240xf32>
    %42 = arith.subf %6, %41 : vector<32x240xf32>
    %43 = arith.mulf %42, %42 : vector<32x240xf32>
    %cst_32 = arith.constant dense<0.000000e+00> : vector<32xf32>
    %44 = vector.multi_reduction <add>, %43, %cst_32 [1] : vector<32x240xf32> to vector<32xf32>
    %45 = vector.shape_cast %44 : vector<32xf32> to vector<32x1xf32>
    %46 = vector.broadcast %40 : vector<32x1xf32> to vector<32x240xf32>
    %47 = arith.subf %15, %46 : vector<32x240xf32>
    %48 = arith.mulf %47, %47 : vector<32x240xf32>
    %cst_33 = arith.constant dense<0.000000e+00> : vector<32xf32>
    %49 = vector.multi_reduction <add>, %48, %cst_33 [1] : vector<32x240xf32> to vector<32xf32>
    %50 = vector.shape_cast %49 : vector<32xf32> to vector<32x1xf32>
    %51 = arith.addf %45, %50 : vector<32x1xf32>
    %52 = vector.broadcast %40 : vector<32x1xf32> to vector<32x240xf32>
    %53 = arith.subf %25, %52 : vector<32x240xf32>
    %54 = arith.mulf %53, %53 : vector<32x240xf32>
    %cst_34 = arith.constant dense<0.000000e+00> : vector<32xf32>
    %55 = vector.multi_reduction <add>, %54, %cst_34 [1] : vector<32x240xf32> to vector<32xf32>
    %56 = vector.shape_cast %55 : vector<32xf32> to vector<32x1xf32>
    %57 = arith.addf %51, %56 : vector<32x1xf32>
    %58 = vector.broadcast %40 : vector<32x1xf32> to vector<32x240xf32>
    %59 = arith.subf %35, %58 : vector<32x240xf32>
    %60 = arith.mulf %59, %59 : vector<32x240xf32>
    %cst_35 = arith.constant dense<0.000000e+00> : vector<32xf32>
    %61 = vector.multi_reduction <add>, %60, %cst_35 [1] : vector<32x240xf32> to vector<32xf32>
    %62 = vector.shape_cast %61 : vector<32xf32> to vector<32x1xf32>
    %63 = arith.addf %57, %62 : vector<32x1xf32>
    %cst_36 = arith.constant 0.00104166672 : f32
    %64 = vector.broadcast %cst_36 : f32 to vector<32x1xf32>
    %65 = arith.mulf %63, %64 : vector<32x1xf32>
    %c0_37 = arith.constant 0 : index
    %c0_38 = arith.constant 0 : index
    %66 = vector.load %arg3[%c0_37, %c0_38] : memref<32x1xf32, #tpu.memory_space<vmem>>, vector<32x1xf32>
    %cst_39 = arith.constant 9.99999974E-6 : f32
    %67 = vector.broadcast %cst_39 : f32 to vector<32x1xf32>
    %68 = arith.addf %65, %67 : vector<32x1xf32>
    %69 = math.rsqrt %68 : vector<32x1xf32>
    %70 = arith.mulf %66, %69 : vector<32x1xf32>
    %c0_40 = arith.constant 0 : index
    %c0_41 = arith.constant 0 : index
    %71 = vector.load %arg4[%c0_40, %c0_41] : memref<32x1xf32, #tpu.memory_space<vmem>>, vector<32x1xf32>
    %72 = arith.mulf %40, %70 : vector<32x1xf32>
    %73 = arith.subf %71, %72 : vector<32x1xf32>
    %74 = vector.broadcast %70 : vector<32x1xf32> to vector<32x240xf32>
    %75 = arith.mulf %6, %74 : vector<32x240xf32>
    %76 = vector.broadcast %73 : vector<32x1xf32> to vector<32x240xf32>
    %77 = arith.addf %75, %76 : vector<32x240xf32>
    %cst_42 = arith.constant 0.000000e+00 : f32
    %78 = vector.broadcast %cst_42 : f32 to vector<32x240xf32>
    %79 = arith.cmpf oge, %77, %78 : vector<32x240xf32>
    %cst_43 = arith.constant 0.00999999977 : f32
    %80 = vector.broadcast %cst_43 : f32 to vector<32x240xf32>
    %81 = arith.mulf %80, %77 : vector<32x240xf32>
    %82 = arith.select %79, %77, %81 : vector<32x240xi1>, vector<32x240xf32>
    %83 = vector.broadcast %70 : vector<32x1xf32> to vector<32x240xf32>
    %84 = arith.mulf %15, %83 : vector<32x240xf32>
    %85 = vector.broadcast %73 : vector<32x1xf32> to vector<32x240xf32>
    %86 = arith.addf %84, %85 : vector<32x240xf32>
    %cst_44 = arith.constant 0.000000e+00 : f32
    %87 = vector.broadcast %cst_44 : f32 to vector<32x240xf32>
    %88 = arith.cmpf oge, %86, %87 : vector<32x240xf32>
    %cst_45 = arith.constant 0.00999999977 : f32
    %89 = vector.broadcast %cst_45 : f32 to vector<32x240xf32>
    %90 = arith.mulf %89, %86 : vector<32x240xf32>
    %91 = arith.select %88, %86, %90 : vector<32x240xi1>, vector<32x240xf32>
    %92 = arith.maximumf %82, %91 : vector<32x240xf32>
    %93 = vector.broadcast %70 : vector<32x1xf32> to vector<32x240xf32>
    %94 = arith.mulf %25, %93 : vector<32x240xf32>
    %95 = vector.broadcast %73 : vector<32x1xf32> to vector<32x240xf32>
    %96 = arith.addf %94, %95 : vector<32x240xf32>
    %cst_46 = arith.constant 0.000000e+00 : f32
    %97 = vector.broadcast %cst_46 : f32 to vector<32x240xf32>
    %98 = arith.cmpf oge, %96, %97 : vector<32x240xf32>
    %cst_47 = arith.constant 0.00999999977 : f32
    %99 = vector.broadcast %cst_47 : f32 to vector<32x240xf32>
    %100 = arith.mulf %99, %96 : vector<32x240xf32>
    %101 = arith.select %98, %96, %100 : vector<32x240xi1>, vector<32x240xf32>
    %102 = arith.maximumf %92, %101 : vector<32x240xf32>
    %103 = vector.broadcast %70 : vector<32x1xf32> to vector<32x240xf32>
    %104 = arith.mulf %35, %103 : vector<32x240xf32>
    %105 = vector.broadcast %73 : vector<32x1xf32> to vector<32x240xf32>
    %106 = arith.addf %104, %105 : vector<32x240xf32>
    %cst_48 = arith.constant 0.000000e+00 : f32
    %107 = vector.broadcast %cst_48 : f32 to vector<32x240xf32>
    %108 = arith.cmpf oge, %106, %107 : vector<32x240xf32>
    %cst_49 = arith.constant 0.00999999977 : f32
    %109 = vector.broadcast %cst_49 : f32 to vector<32x240xf32>
    %110 = arith.mulf %109, %106 : vector<32x240xf32>
    %111 = arith.select %108, %106, %110 : vector<32x240xi1>, vector<32x240xf32>
    %112 = arith.maximumf %102, %111 : vector<32x240xf32>
    %113 = arith.truncf %112 : vector<32x240xf32> to vector<32x240xbf16>
    %c0_50 = arith.constant 0 : index
    %c0_51 = arith.constant 0 : index
    %114 = vector.load %arg5[%c0_50, %c0_51] : memref<32x240xbf16, #tpu.memory_space<vmem>>, vector<32x240xbf16>
    tpu.vector_store %arg5[%c0_50, %c0_51], %113 {strides = array<i32>} : memref<32x240xbf16, #tpu.memory_space<vmem>>, vector<32x240xbf16>,
    return
  }
}

module attributes {stable_mosaic.version = 11 : i64} {
  func.func @_block_kernel(%arg0: memref<4x288x60xbf16, #tpu.memory_space<vmem>>, %arg1: memref<64x288xbf16, #tpu.memory_space<vmem>>, %arg2: memref<64x1xf32, #tpu.memory_space<vmem>>, %arg3: memref<64x1xf32, #tpu.memory_space<vmem>>, %arg4: memref<64x1xf32, #tpu.memory_space<vmem>>, %arg5: memref<64x60xbf16, #tpu.memory_space<vmem>>) attributes {dimension_semantics = [], scalar_prefetch = 0 : i64, scratch_operands = 0 : i64, tpu.core_type = #tpu.core_type<tc>} {
    %c0 = arith.constant 0 : index
    %c0_0 = arith.constant 0 : index
    %0 = vector.load %arg1[%c0, %c0_0] : memref<64x288xbf16, #tpu.memory_space<vmem>>, vector<64x288xbf16>
    %c0_1 = arith.constant 0 : index
    %c0_2 = arith.constant 0 : index
    %c0_3 = arith.constant 0 : index
    %1 = vector.load %arg0[%c0_1, %c0_2, %c0_3] : memref<4x288x60xbf16, #tpu.memory_space<vmem>>, vector<1x288x60xbf16>
    %2 = vector.shape_cast %1 : vector<1x288x60xbf16> to vector<288x60xbf16>
    %cst = arith.constant dense<0.000000e+00> : vector<64x60xf32>
    %3 = tpu.matmul %0, %2, %cst {dimension_numbers = #tpu.dot_dimension_numbers<[1], [0], [0], [1], [0, 0, 1, 1], [], []>} : vector<64x288xbf16>, vector<288x60xbf16>, vector<64x60xf32> -> vector<64x60xf32>
    %c0_4 = arith.constant 0 : index
    %c0_5 = arith.constant 0 : index
    %4 = vector.load %arg2[%c0_4, %c0_5] : memref<64x1xf32, #tpu.memory_space<vmem>>, vector<64x1xf32>
    %5 = vector.broadcast %4 : vector<64x1xf32> to vector<64x60xf32>
    %6 = arith.addf %3, %5 : vector<64x60xf32>
    %cst_6 = arith.constant dense<0.000000e+00> : vector<64xf32>
    %7 = vector.multi_reduction <add>, %6, %cst_6 [1] : vector<64x60xf32> to vector<64xf32>
    %8 = vector.shape_cast %7 : vector<64xf32> to vector<64x1xf32>
    %c0_7 = arith.constant 0 : index
    %c0_8 = arith.constant 0 : index
    %9 = vector.load %arg1[%c0_7, %c0_8] : memref<64x288xbf16, #tpu.memory_space<vmem>>, vector<64x288xbf16>
    %c1 = arith.constant 1 : index
    %c0_9 = arith.constant 0 : index
    %c0_10 = arith.constant 0 : index
    %10 = vector.load %arg0[%c1, %c0_9, %c0_10] : memref<4x288x60xbf16, #tpu.memory_space<vmem>>, vector<1x288x60xbf16>
    %11 = vector.shape_cast %10 : vector<1x288x60xbf16> to vector<288x60xbf16>
    %cst_11 = arith.constant dense<0.000000e+00> : vector<64x60xf32>
    %12 = tpu.matmul %9, %11, %cst_11 {dimension_numbers = #tpu.dot_dimension_numbers<[1], [0], [0], [1], [0, 0, 1, 1], [], []>} : vector<64x288xbf16>, vector<288x60xbf16>, vector<64x60xf32> -> vector<64x60xf32>
    %c0_12 = arith.constant 0 : index
    %c0_13 = arith.constant 0 : index
    %13 = vector.load %arg2[%c0_12, %c0_13] : memref<64x1xf32, #tpu.memory_space<vmem>>, vector<64x1xf32>
    %14 = vector.broadcast %13 : vector<64x1xf32> to vector<64x60xf32>
    %15 = arith.addf %12, %14 : vector<64x60xf32>
    %cst_14 = arith.constant dense<0.000000e+00> : vector<64xf32>
    %16 = vector.multi_reduction <add>, %15, %cst_14 [1] : vector<64x60xf32> to vector<64xf32>
    %17 = vector.shape_cast %16 : vector<64xf32> to vector<64x1xf32>
    %18 = arith.addf %8, %17 : vector<64x1xf32>
    %c0_15 = arith.constant 0 : index
    %c0_16 = arith.constant 0 : index
    %19 = vector.load %arg1[%c0_15, %c0_16] : memref<64x288xbf16, #tpu.memory_space<vmem>>, vector<64x288xbf16>
    %c2 = arith.constant 2 : index
    %c0_17 = arith.constant 0 : index
    %c0_18 = arith.constant 0 : index
    %20 = vector.load %arg0[%c2, %c0_17, %c0_18] : memref<4x288x60xbf16, #tpu.memory_space<vmem>>, vector<1x288x60xbf16>
    %21 = vector.shape_cast %20 : vector<1x288x60xbf16> to vector<288x60xbf16>
    %cst_19 = arith.constant dense<0.000000e+00> : vector<64x60xf32>
    %22 = tpu.matmul %19, %21, %cst_19 {dimension_numbers = #tpu.dot_dimension_numbers<[1], [0], [0], [1], [0, 0, 1, 1], [], []>} : vector<64x288xbf16>, vector<288x60xbf16>, vector<64x60xf32> -> vector<64x60xf32>
    %c0_20 = arith.constant 0 : index
    %c0_21 = arith.constant 0 : index
    %23 = vector.load %arg2[%c0_20, %c0_21] : memref<64x1xf32, #tpu.memory_space<vmem>>, vector<64x1xf32>
    %24 = vector.broadcast %23 : vector<64x1xf32> to vector<64x60xf32>
    %25 = arith.addf %22, %24 : vector<64x60xf32>
    %cst_22 = arith.constant dense<0.000000e+00> : vector<64xf32>
    %26 = vector.multi_reduction <add>, %25, %cst_22 [1] : vector<64x60xf32> to vector<64xf32>
    %27 = vector.shape_cast %26 : vector<64xf32> to vector<64x1xf32>
    %28 = arith.addf %18, %27 : vector<64x1xf32>
    %c0_23 = arith.constant 0 : index
    %c0_24 = arith.constant 0 : index
    %29 = vector.load %arg1[%c0_23, %c0_24] : memref<64x288xbf16, #tpu.memory_space<vmem>>, vector<64x288xbf16>
    %c3 = arith.constant 3 : index
    %c0_25 = arith.constant 0 : index
    %c0_26 = arith.constant 0 : index
    %30 = vector.load %arg0[%c3, %c0_25, %c0_26] : memref<4x288x60xbf16, #tpu.memory_space<vmem>>, vector<1x288x60xbf16>
    %31 = vector.shape_cast %30 : vector<1x288x60xbf16> to vector<288x60xbf16>
    %cst_27 = arith.constant dense<0.000000e+00> : vector<64x60xf32>
    %32 = tpu.matmul %29, %31, %cst_27 {dimension_numbers = #tpu.dot_dimension_numbers<[1], [0], [0], [1], [0, 0, 1, 1], [], []>} : vector<64x288xbf16>, vector<288x60xbf16>, vector<64x60xf32> -> vector<64x60xf32>
    %c0_28 = arith.constant 0 : index
    %c0_29 = arith.constant 0 : index
    %33 = vector.load %arg2[%c0_28, %c0_29] : memref<64x1xf32, #tpu.memory_space<vmem>>, vector<64x1xf32>
    %34 = vector.broadcast %33 : vector<64x1xf32> to vector<64x60xf32>
    %35 = arith.addf %32, %34 : vector<64x60xf32>
    %cst_30 = arith.constant dense<0.000000e+00> : vector<64xf32>
    %36 = vector.multi_reduction <add>, %35, %cst_30 [1] : vector<64x60xf32> to vector<64xf32>
    %37 = vector.shape_cast %36 : vector<64xf32> to vector<64x1xf32>
    %38 = arith.addf %28, %37 : vector<64x1xf32>
    %cst_31 = arith.constant 0.00416666688 : f32
    %39 = vector.broadcast %cst_31 : f32 to vector<64x1xf32>
    %40 = arith.mulf %38, %39 : vector<64x1xf32>
    %41 = vector.broadcast %40 : vector<64x1xf32> to vector<64x60xf32>
    %42 = arith.subf %6, %41 : vector<64x60xf32>
    %43 = arith.mulf %42, %42 : vector<64x60xf32>
    %cst_32 = arith.constant dense<0.000000e+00> : vector<64xf32>
    %44 = vector.multi_reduction <add>, %43, %cst_32 [1] : vector<64x60xf32> to vector<64xf32>
    %45 = vector.shape_cast %44 : vector<64xf32> to vector<64x1xf32>
    %46 = vector.broadcast %40 : vector<64x1xf32> to vector<64x60xf32>
    %47 = arith.subf %15, %46 : vector<64x60xf32>
    %48 = arith.mulf %47, %47 : vector<64x60xf32>
    %cst_33 = arith.constant dense<0.000000e+00> : vector<64xf32>
    %49 = vector.multi_reduction <add>, %48, %cst_33 [1] : vector<64x60xf32> to vector<64xf32>
    %50 = vector.shape_cast %49 : vector<64xf32> to vector<64x1xf32>
    %51 = arith.addf %45, %50 : vector<64x1xf32>
    %52 = vector.broadcast %40 : vector<64x1xf32> to vector<64x60xf32>
    %53 = arith.subf %25, %52 : vector<64x60xf32>
    %54 = arith.mulf %53, %53 : vector<64x60xf32>
    %cst_34 = arith.constant dense<0.000000e+00> : vector<64xf32>
    %55 = vector.multi_reduction <add>, %54, %cst_34 [1] : vector<64x60xf32> to vector<64xf32>
    %56 = vector.shape_cast %55 : vector<64xf32> to vector<64x1xf32>
    %57 = arith.addf %51, %56 : vector<64x1xf32>
    %58 = vector.broadcast %40 : vector<64x1xf32> to vector<64x60xf32>
    %59 = arith.subf %35, %58 : vector<64x60xf32>
    %60 = arith.mulf %59, %59 : vector<64x60xf32>
    %cst_35 = arith.constant dense<0.000000e+00> : vector<64xf32>
    %61 = vector.multi_reduction <add>, %60, %cst_35 [1] : vector<64x60xf32> to vector<64xf32>
    %62 = vector.shape_cast %61 : vector<64xf32> to vector<64x1xf32>
    %63 = arith.addf %57, %62 : vector<64x1xf32>
    %cst_36 = arith.constant 0.00416666688 : f32
    %64 = vector.broadcast %cst_36 : f32 to vector<64x1xf32>
    %65 = arith.mulf %63, %64 : vector<64x1xf32>
    %c0_37 = arith.constant 0 : index
    %c0_38 = arith.constant 0 : index
    %66 = vector.load %arg3[%c0_37, %c0_38] : memref<64x1xf32, #tpu.memory_space<vmem>>, vector<64x1xf32>
    %cst_39 = arith.constant 9.99999974E-6 : f32
    %67 = vector.broadcast %cst_39 : f32 to vector<64x1xf32>
    %68 = arith.addf %65, %67 : vector<64x1xf32>
    %69 = math.rsqrt %68 : vector<64x1xf32>
    %70 = arith.mulf %66, %69 : vector<64x1xf32>
    %c0_40 = arith.constant 0 : index
    %c0_41 = arith.constant 0 : index
    %71 = vector.load %arg4[%c0_40, %c0_41] : memref<64x1xf32, #tpu.memory_space<vmem>>, vector<64x1xf32>
    %72 = arith.mulf %40, %70 : vector<64x1xf32>
    %73 = arith.subf %71, %72 : vector<64x1xf32>
    %74 = vector.broadcast %70 : vector<64x1xf32> to vector<64x60xf32>
    %75 = arith.mulf %6, %74 : vector<64x60xf32>
    %76 = vector.broadcast %73 : vector<64x1xf32> to vector<64x60xf32>
    %77 = arith.addf %75, %76 : vector<64x60xf32>
    %cst_42 = arith.constant 0.000000e+00 : f32
    %78 = vector.broadcast %cst_42 : f32 to vector<64x60xf32>
    %79 = arith.cmpf oge, %77, %78 : vector<64x60xf32>
    %cst_43 = arith.constant 0.00999999977 : f32
    %80 = vector.broadcast %cst_43 : f32 to vector<64x60xf32>
    %81 = arith.mulf %80, %77 : vector<64x60xf32>
    %82 = arith.select %79, %77, %81 : vector<64x60xi1>, vector<64x60xf32>
    %83 = vector.broadcast %70 : vector<64x1xf32> to vector<64x60xf32>
    %84 = arith.mulf %15, %83 : vector<64x60xf32>
    %85 = vector.broadcast %73 : vector<64x1xf32> to vector<64x60xf32>
    %86 = arith.addf %84, %85 : vector<64x60xf32>
    %cst_44 = arith.constant 0.000000e+00 : f32
    %87 = vector.broadcast %cst_44 : f32 to vector<64x60xf32>
    %88 = arith.cmpf oge, %86, %87 : vector<64x60xf32>
    %cst_45 = arith.constant 0.00999999977 : f32
    %89 = vector.broadcast %cst_45 : f32 to vector<64x60xf32>
    %90 = arith.mulf %89, %86 : vector<64x60xf32>
    %91 = arith.select %88, %86, %90 : vector<64x60xi1>, vector<64x60xf32>
    %92 = arith.maximumf %82, %91 : vector<64x60xf32>
    %93 = vector.broadcast %70 : vector<64x1xf32> to vector<64x60xf32>
    %94 = arith.mulf %25, %93 : vector<64x60xf32>
    %95 = vector.broadcast %73 : vector<64x1xf32> to vector<64x60xf32>
    %96 = arith.addf %94, %95 : vector<64x60xf32>
    %cst_46 = arith.constant 0.000000e+00 : f32
    %97 = vector.broadcast %cst_46 : f32 to vector<64x60xf32>
    %98 = arith.cmpf oge, %96, %97 : vector<64x60xf32>
    %cst_47 = arith.constant 0.00999999977 : f32
    %99 = vector.broadcast %cst_47 : f32 to vector<64x60xf32>
    %100 = arith.mulf %99, %96 : vector<64x60xf32>
    %101 = arith.select %98, %96, %100 : vector<64x60xi1>, vector<64x60xf32>
    %102 = arith.maximumf %92, %101 : vector<64x60xf32>
    %103 = vector.broadcast %70 : vector<64x1xf32> to vector<64x60xf32>
    %104 = arith.mulf %35, %103 : vector<64x60xf32>
    %105 = vector.broadcast %73 : vector<64x1xf32> to vector<64x60xf32>
    %106 = arith.addf %104, %105 : vector<64x60xf32>
    %cst_48 = arith.constant 0.000000e+00 : f32
    %107 = vector.broadcast %cst_48 : f32 to vector<64x60xf32>
    %108 = arith.cmpf oge, %106, %107 : vector<64x60xf32>
    %cst_49 = arith.constant 0.00999999977 : f32
    %109 = vector.broadcast %cst_49 : f32 to vector<64x60xf32>
    %110 = arith.mulf %109, %106 : vector<64x60xf32>
    %111 = arith.select %108, %106, %110 : vector<64x60xi1>, vector<64x60xf32>
    %112 = arith.maximumf %102, %111 : vector<64x60xf32>
    %113 = arith.truncf %112 : vector<64x60xf32> to vector<64x60xbf16>
    %c0_50 = arith.constant 0 : index
    %c0_51 = arith.constant 0 : index
    %114 = vector.load %arg5[%c0_50, %c0_51] : memref<64x60xbf16, #tpu.memory_space<vmem>>, vector<64x60xbf16>
    tpu.vector_store %arg5[%c0_50, %c0_51], %113 {strides = array<i32>} : memref<64x60xbf16, #tpu.memory_space<vmem>>, vector<64x60xbf16>,
    return
  }
}

module attributes {stable_mosaic.version = 11 : i64} {
  func.func @_linear_kernel(%arg0: memref<2x1920xbf16, #tpu.memory_space<vmem>>, %arg1: memref<1920x50xbf16, #tpu.memory_space<vmem>>, %arg2: memref<1x50xf32, #tpu.memory_space<vmem>>, %arg3: memref<2x50xf32, #tpu.memory_space<vmem>>) attributes {dimension_semantics = [], scalar_prefetch = 0 : i64, scratch_operands = 0 : i64, tpu.core_type = #tpu.core_type<tc>} {
    %c0 = arith.constant 0 : index
    %c0_0 = arith.constant 0 : index
    %0 = vector.load %arg0[%c0, %c0_0] : memref<2x1920xbf16, #tpu.memory_space<vmem>>, vector<2x1920xbf16>
    %c0_1 = arith.constant 0 : index
    %c0_2 = arith.constant 0 : index
    %1 = vector.load %arg1[%c0_1, %c0_2] : memref<1920x50xbf16, #tpu.memory_space<vmem>>, vector<1920x50xbf16>
    %cst = arith.constant dense<0.000000e+00> : vector<2x50xf32>
    %2 = tpu.matmul %0, %1, %cst {dimension_numbers = #tpu.dot_dimension_numbers<[1], [0], [0], [1], [0, 0, 1, 1], [], []>} : vector<2x1920xbf16>, vector<1920x50xbf16>, vector<2x50xf32> -> vector<2x50xf32>
    %c0_3 = arith.constant 0 : index
    %c0_4 = arith.constant 0 : index
    %3 = vector.load %arg2[%c0_3, %c0_4] : memref<1x50xf32, #tpu.memory_space<vmem>>, vector<1x50xf32>
    %4 = vector.broadcast %3 : vector<1x50xf32> to vector<2x50xf32>
    %5 = arith.addf %2, %4 : vector<2x50xf32>
    %c0_5 = arith.constant 0 : index
    %c0_6 = arith.constant 0 : index
    %6 = vector.load %arg3[%c0_5, %c0_6] : memref<2x50xf32, #tpu.memory_space<vmem>>, vector<2x50xf32>
    tpu.vector_store %arg3[%c0_5, %c0_6], %5 {strides = array<i32>} : memref<2x50xf32, #tpu.memory_space<vmem>>, vector<2x50xf32>,
    return
  }
}

</mosaic_0001>

<bundles_post_ra>
// kernel: audio_magic_net_forward.4
= control target key start
LH: loop header
LB: loop body
LE: loop exit
PB: predicated region body
PF: predicated region fallthrough
CT: control target
= control target key end

     0   :  { %vm84_vm0 = vcmask 1043456   ;;  %vm85_vm1 = vcmask 1044480   ;;  %v1732_v2 = vmov 65535   ;;  %vm80_vm2 = vcmask 72704   ;;  %s2961_s0 = inlined_call_operand.vmem [shape: bf16[4,9,960], index: 0, kind: input, shape index: {}]   ;;  %s2962_s1 = inlined_call_operand.vmem [shape: bf16[16,9], index: 1, kind: input, shape index: {}]   ;;  %s2963_s2 = inlined_call_operand.vmem [shape: f32[16,1], index: 2, kind: input, shape index: {}]   ;;  %s2964_s3 = inlined_call_operand.vmem [shape: f32[16,1], index: 3, kind: input, shape index: {}]   ;;  %s2965_s4 = inlined_call_operand.vmem [shape: f32[16,1], index: 4, kind: input, shape index: {}]   ;;  %s2966_s5 = inlined_call_operand.vmem [shape: bf16[16,960], index: 5, kind: output, shape index: {}]  }
   0x1   :  { %v1508_v0 = vld [vmem:[%s2961_s0] sm:$0xf]  ;;  %v86_v3 = vsel %vm84_vm0, 4294967295, %v1732_v2  ;;  %v1691_v6 = vld [vmem:[%s2961_s0 + $0x4] sm:$0xf]  ;;  %v1733_v52 = vmov 0  }
   0x2   :  { %v1695_v1 = vld [vmem:[%s2961_s0 + $0x1c] sm:$0x10]  ;;  %v1771_v5 = vsel %vm85_vm1, %v86_v3, 0  ;;  %v1510_v7 = vld [vmem:[%s2961_s0 + $0x20] sm:$0x10]  ;;  %1725 = vset.pattern.permute.xlu0 %v1733_v52  ;;  %1726 = vset.pattern.permute.xlu2 %v1733_v52  ;;  %v32_v63 = vld [vmem:[%s2963_s2 + $0x8] sm:$0xff] }
   0x3   :  { %v1509_v4 = vor.u32 %v1695_v1, %v1508_v0  ;;  %v1513_v8 = vor.u32 %v1691_v6, %v1510_v7  ;;  %v1516_v9 = vld [vmem:[%s2961_s0 + $0x8] sm:$0xf]  ;;  %v1692_v11 = vld [vmem:[%s2961_s0 + $0xc] sm:$0xf]  ;;  %v1791_v12 = vld [vmem:[%s2962_s1] sm:$0xff]  ;;  %1727 = vset.pattern.permute.xlu1 %v1733_v52  ;;  %vm230_vm3 = vcmask 523264  }
   0x4   :  { %v1696_v10 = vld [vmem:[%s2961_s0 + $0x24] sm:$0x10]  ;;  %v1518_v15 = vld [vmem:[%s2961_s0 + $0x28] sm:$0x10]  ;;  %v1532_v16 = vld [vmem:[%s2961_s0 + $0x18] sm:$0xf] }
   0x5   :  { %v89_v13 = vand.u32 %v1509_v4, %v1771_v5  ;;  %v1517_v14 = vor.u32 %v1696_v10, %v1516_v9  ;;  %v1698_v17 = vld [vmem:[%s2961_s0 + $0x34] sm:$0x10]  ;;  %v92_v18 = vand.u32 %v1513_v8, %v1771_v5  ;;  %v1521_v19 = vor.u32 %v1692_v11, %v1518_v15  ;;  %v1694_v21 = vld [vmem:[%s2961_s0 + $0x1c] sm:$0xf]  ;;  %v1524_v23 = vld [vmem:[%s2961_s0 + $0x10] sm:$0xf] }
   0x6   :  { %v1533_v20 = vor.u32 %v1698_v17, %v1532_v16  ;;  %v1534_v22 = vld [vmem:[%s2961_s0 + $0x38] sm:$0x10]  ;;  %v1697_v26 = vld [vmem:[%s2961_s0 + $0x2c] sm:$0x10]  ;;  %v1693_v27 = vld [vmem:[%s2961_s0 + $0x14] sm:$0xf] }
   0x7   :  { %119 = vmatpush.bf16.msra.mxu0 %v89_v13  ;;  %v95_v24 = vand.u32 %v1517_v14, %v1771_v5  ;;  %v1537_v25 = vor.u32 %v1694_v21, %v1534_v22  ;;  %v1526_v28 = vld [vmem:[%s2961_s0 + $0x30] sm:$0x10]  ;;  %133 = vmatpush.bf16.msra.mxu1 %v92_v18  ;;  %v98_v29 = vand.u32 %v1521_v19, %v1771_v5  ;;  %v1564_v33 = vld [vmem:[%s2961_s0 + $0x48] sm:$0xf]  ;;  %v1700_v37 = vld [vmem:[%s2961_s0 + $0x4c] sm:$0xf] }
   0x8   :  { %v107_v30 = vand.u32 %v1533_v20, %v1771_v5  ;;  %v1525_v31 = vor.u32 %v1697_v26, %v1524_v23  ;;  %v1529_v32 = vor.u32 %v1693_v27, %v1526_v28  ;;  %v1704_v34 = vld [vmem:[%s2961_s0 + $0x64] sm:$0x10]  ;;  %v1566_v38 = vld [vmem:[%s2961_s0 + $0x68] sm:$0x10]  ;;  %v1556_v42 = vld [vmem:[%s2961_s0 + $0x40] sm:$0xf] }
   0x9   :  { %147 = vmatpush.bf16.msra.mxu2 %v95_v24  ;;  %v110_v35 = vand.u32 %v1537_v25, %v1771_v5  ;;  %v1565_v36 = vor.u32 %v1704_v34, %v1564_v33  ;;  %161 = vmatpush.bf16.msra.mxu3 %v98_v29  ;;  %v1569_v41 = vor.u32 %v1700_v37, %v1566_v38  ;;  %v1703_v43 = vld [vmem:[%s2961_s0 + $0x5c] sm:$0x10]  ;;  %v1699_v44 = vld [vmem:[%s2961_s0 + $0x44] sm:$0xf]  ;;  %v1572_v54 = vld [vmem:[%s2961_s0 + $0x50] sm:$0xf] }
   0xa   :  { %1538 = vmatmul.msk.bf16.vlgmr.msra.gmra.mxu0 %vm80_vm2, %v1791_v12  ;;  %v101_v39 = vand.u32 %v1525_v31, %v1771_v5  ;;  %v104_v40 = vand.u32 %v1529_v32, %v1771_v5  ;;  %1539 = vmatmul.msk.bf16.vlgmr.msra.gmra.mxu1 %vm80_vm2, %v1791_v12  ;;  %v1557_v46 = vor.u32 %v1703_v43, %v1556_v42  ;;  %v1558_v47 = vld [vmem:[%s2961_s0 + $0x60] sm:$0x10]  ;;  %v1705_v55 = vld [vmem:[%s2961_s0 + $0x6c] sm:$0x10]  ;;  %v1701_v56 = vld [vmem:[%s2961_s0 + $0x54] sm:$0xf] }
   0xb   :  { %v293_v45 = vand.u32 %v1565_v36, %v1771_v5  ;;  %v31_v48 = vld [vmem:[%s2963_s2] sm:$0xff]  ;;  %v296_v49 = vand.u32 %v1569_v41, %v1771_v5  ;;  %v1561_v50 = vor.u32 %v1699_v44, %v1558_v47  ;;  %v1574_v57 = vld [vmem:[%s2961_s0 + $0x70] sm:$0x10]  ;;  %v1580_v58 = vld [vmem:[%s2961_s0 + $0x58] sm:$0xf]  ;;  %v1573_v62 = vor.u32 %v1705_v55, %v1572_v54 }
   0xc   :  { %1540 = vmatmul.msk.bf16.vlgmr.msra.gmra.mxu2 %vm80_vm2, %v1791_v12  ;;  %1541 = vmatmul.msk.bf16.vlgmr.msra.gmra.mxu3 %vm80_vm2, %v1791_v12  ;;  %v287_v51 = vand.u32 %v1557_v46, %v1771_v5  ;;  %v1706_v59 = vld [vmem:[%s2961_s0 + $0x74] sm:$0x10]  ;;  %v1702_v60 = vld [vmem:[%s2961_s0 + $0x5c] sm:$0xf]  ;;  %v1577_v0 = vor.u32 %v1701_v56, %v1574_v57  ;;  %v1604_v8 = vld [vmem:[%s2961_s0 + $0x80] sm:$0xf] }
   0xd   :  { %203 = vmatpush.bf16.msrb.mxu2 %v107_v30  ;;  %217 = vmatpush.bf16.msrb.mxu3 %v110_v35  ;;  %v290_v53 = vand.u32 %v1561_v50, %v1771_v5  ;;  %v1582_v61 = vld [vmem:[%s2961_s0 + $0x78] sm:$0x10]  ;;  %v1581_v1 = vor.u32 %v1706_v59, %v1580_v58  ;;  %v299_v3 = vand.u32 %v1573_v62, %v1771_v5  ;;  %v1711_v9 = vld [vmem:[%s2961_s0 + $0x9c] sm:$0x10]  ;;  %v1707_v10 = vld [vmem:[%s2961_s0 + $0x84] sm:$0xf] }
   0xe   :  { %175 = vmatpush.bf16.msrb.mxu0 %v101_v39  ;;  %189 = vmatpush.bf16.msrb.mxu1 %v104_v40  ;;  %v1585_v2 = vor.u32 %v1702_v60, %v1582_v61  ;;  %v302_v4 = vand.u32 %v1577_v0, %v1771_v5  ;;  %v1606_v11 = vld [vmem:[%s2961_s0 + $0xa0] sm:$0x10]  ;;  %v1612_v13 = vld [vmem:[%s2961_s0 + $0x88] sm:$0xf]  ;;  %v1708_v15 = vld [vmem:[%s2961_s0 + $0x8c] sm:$0xf]  ;;  %v1605_v17 = vor.u32 %v1711_v9, %v1604_v8 }
   0xf   :  { %35 = vperm.xlu0 %1725, %v31_v48   ;;  %v305_v6 = vand.u32 %v1581_v1, %v1771_v5  ;;  %v1712_v14 = vld [vmem:[%s2961_s0 + $0xa4] sm:$0x10]  ;;  %v1614_v16 = vld [vmem:[%s2961_s0 + $0xa8] sm:$0x10]  ;;  %v1609_v18 = vor.u32 %v1707_v10, %v1606_v11  ;;  %v1620_v25 = vld [vmem:[%s2961_s0 + $0x90] sm:$0xf] }
  0x10   :  { %v308_v7 = vand.u32 %v1585_v2, %v1771_v5  ;;  %v1613_v19 = vor.u32 %v1712_v14, %v1612_v13  ;;  %v1617_v20 = vor.u32 %v1708_v15, %v1614_v16  ;;  %v486_v21 = vand.u32 %v1605_v17, %v1771_v5  ;;  %v1713_v26 = vld [vmem:[%s2961_s0 + $0xac] sm:$0x10]  ;;  %v1709_v27 = vld [vmem:[%s2961_s0 + $0x94] sm:$0xf]  ;;  %v1628_v29 = vld [vmem:[%s2961_s0 + $0x98] sm:$0xf] }
  0x11   :  { %345 = vmatpush.bf16.msra.mxu2 %v293_v45  ;;  %359 = vmatpush.bf16.msra.mxu3 %v296_v49  ;;  %v489_v22 = vand.u32 %v1609_v18, %v1771_v5  ;;  %v1622_v28 = vld [vmem:[%s2961_s0 + $0xb0] sm:$0x10]  ;;  %v1714_v30 = vld [vmem:[%s2961_s0 + $0xb4] sm:$0x10]  ;;  %v1710_v31 = vld [vmem:[%s2961_s0 + $0x9c] sm:$0xf]  ;;  %v1621_v33 = vor.u32 %v1713_v26, %v1620_v25 }
  0x12   :  { %317 = vmatpush.bf16.msra.mxu0 %v287_v51  ;;  %331 = vmatpush.bf16.msra.mxu1 %v290_v53  ;;  %v492_v23 = vand.u32 %v1613_v19, %v1771_v5  ;;  %v495_v24 = vand.u32 %v1617_v20, %v1771_v5  ;;  %v1630_v32 = vld [vmem:[%s2961_s0 + $0xb8] sm:$0x10]  ;;  %v1625_v34 = vor.u32 %v1709_v27, %v1622_v28  ;;  %v1652_v41 = vld [vmem:[%s2961_s0 + $0xc0] sm:$0xf]  ;;  %v1715_v43 = vld [vmem:[%s2961_s0 + $0xc4] sm:$0xf] }
  0x13   :  { %v1629_v35 = vor.u32 %v1714_v30, %v1628_v29  ;;  %v1633_v36 = vor.u32 %v1710_v31, %v1630_v32  ;;  %v498_v37 = vand.u32 %v1621_v33, %v1771_v5  ;;  %v1719_v42 = vld [vmem:[%s2961_s0 + $0xdc] sm:$0x10]  ;;  %v1654_v44 = vld [vmem:[%s2961_s0 + $0xe0] sm:$0x10]  ;;  %v1660_v45 = vld [vmem:[%s2961_s0 + $0xc8] sm:$0xf] }
  0x14   :  { %v501_v38 = vand.u32 %v1625_v34, %v1771_v5  ;;  %v1720_v46 = vld [vmem:[%s2961_s0 + $0xe4] sm:$0x10]  ;;  %v1716_v47 = vld [vmem:[%s2961_s0 + $0xcc] sm:$0xf]  ;;  %v1653_v49 = vor.u32 %v1719_v42, %v1652_v41  ;;  %v1657_v50 = vor.u32 %v1715_v43, %v1654_v44  ;;  %v1668_v57 = vld [vmem:[%s2961_s0 + $0xd0] sm:$0xf] }
  0x15   :  { %v504_v39 = vand.u32 %v1629_v35, %v1771_v5  ;;  %v507_v40 = vand.u32 %v1633_v36, %v1771_v5  ;;  %v1662_v48 = vld [vmem:[%s2961_s0 + $0xe8] sm:$0x10]  ;;  %v1661_v51 = vor.u32 %v1720_v46, %v1660_v45  ;;  %v1721_v58 = vld [vmem:[%s2961_s0 + $0xec] sm:$0x10]  ;;  %v1717_v59 = vld [vmem:[%s2961_s0 + $0xd4] sm:$0xf] }
  0x16   :  { %v1665_v52 = vor.u32 %v1716_v47, %v1662_v48  ;;  %v685_v53 = vand.u32 %v1653_v49, %v1771_v5  ;;  %v688_v54 = vand.u32 %v1657_v50, %v1771_v5  ;;  %v1670_v60 = vld [vmem:[%s2961_s0 + $0xf0] sm:$0x10]  ;;  %v1676_v61 = vld [vmem:[%s2961_s0 + $0xd8] sm:$0xf]  ;;  %v1678_v0 = vld [vmem:[%s2961_s0 + $0xf8] sm:$0x10]  ;;  %v1669_v1 = vor.u32 %v1721_v58, %v1668_v57 }
  0x17   :  { %40 = vperm.xlu0 %1725, %v32_v63   ;;  %v691_v55 = vand.u32 %v1661_v51, %v1771_v5  ;;  %v1722_v62 = vld [vmem:[%s2961_s0 + $0xf4] sm:$0x10]  ;;  %v1718_v63 = vld [vmem:[%s2961_s0 + $0xdc] sm:$0xf]  ;;  %v1673_v2 = vor.u32 %v1717_v59, %v1670_v60 }
  0x18   :  { %v694_v56 = vand.u32 %v1665_v52, %v1771_v5 }
  0x1a   :  { %1542 = vmatmul.msk.bf16.vlgmr.msrb.gmra.mxu0 %vm80_vm2, %v1791_v12  ;;  %1543 = vmatmul.msk.bf16.vlgmr.msrb.gmra.mxu1 %vm80_vm2, %v1791_v12 }
  0x1b   :  { %373 = vmatpush.bf16.msrb.mxu0 %v299_v3  ;;  %387 = vmatpush.bf16.msrb.mxu1 %v302_v4  ;;  %v1677_v3 = vor.u32 %v1722_v62, %v1676_v61  ;;  %v1681_v4 = vor.u32 %v1718_v63, %v1678_v0 }
  0x1c   :  { %1544 = vmatmul.msk.bf16.vlgmr.msrb.gmra.mxu2 %vm80_vm2, %v1791_v12  ;;  %1545 = vmatmul.msk.bf16.vlgmr.msrb.gmra.mxu3 %vm80_vm2, %v1791_v12 }
  0x1d   :  { %401 = vmatpush.bf16.msrb.mxu2 %v305_v6  ;;  %415 = vmatpush.bf16.msrb.mxu3 %v308_v7  ;;  %v697_v6 = vand.u32 %v1669_v1, %v1771_v5  ;;  %v700_v7 = vand.u32 %v1673_v2, %v1771_v5  ;;  %v703_v8 = vand.u32 %v1677_v3, %v1771_v5 }
  0x1e   :  { %v706_v9 = vand.u32 %v1681_v4, %v1771_v5 }
  0x2a   :  { %1586 = vmatmul.msk.bf16.vlgmr.msra.gmra.mxu0 %vm80_vm2, %v1791_v12  ;;  %1587 = vmatmul.msk.bf16.vlgmr.msra.gmra.mxu1 %vm80_vm2, %v1791_v12 }
  0x2b   :  { %516 = vmatpush.bf16.msra.mxu0 %v486_v21  ;;  %530 = vmatpush.bf16.msra.mxu1 %v489_v22 }
  0x2c   :  { %1588 = vmatmul.msk.bf16.vlgmr.msra.gmra.mxu2 %vm80_vm2, %v1791_v12  ;;  %1589 = vmatmul.msk.bf16.vlgmr.msra.gmra.mxu3 %vm80_vm2, %v1791_v12 }
  0x2d   :  { %544 = vmatpush.bf16.msra.mxu2 %v492_v23  ;;  %558 = vmatpush.bf16.msra.mxu3 %v495_v24 }
  0x3a   :  { %1590 = vmatmul.msk.bf16.vlgmr.msrb.gmra.mxu0 %vm80_vm2, %v1791_v12  ;;  %1591 = vmatmul.msk.bf16.vlgmr.msrb.gmra.mxu1 %vm80_vm2, %v1791_v12 }
  0x3b   :  { %572 = vmatpush.bf16.msrb.mxu0 %v498_v37  ;;  %586 = vmatpush.bf16.msrb.mxu1 %v501_v38 }
  0x3c   :  { %1592 = vmatmul.msk.bf16.vlgmr.msrb.gmra.mxu2 %vm80_vm2, %v1791_v12  ;;  %1593 = vmatmul.msk.bf16.vlgmr.msrb.gmra.mxu3 %vm80_vm2, %v1791_v12 }
  0x3d   :  { %600 = vmatpush.bf16.msrb.mxu2 %v504_v39  ;;  %614 = vmatpush.bf16.msrb.mxu3 %v507_v40 }
  0x4a   :  { %1634 = vmatmul.msk.bf16.vlgmr.msra.gmra.mxu0 %vm80_vm2, %v1791_v12  ;;  %1635 = vmatmul.msk.bf16.vlgmr.msra.gmra.mxu1 %vm80_vm2, %v1791_v12 }
  0x4b   :  { %715 = vmatpush.bf16.msra.mxu0 %v685_v53  ;;  %729 = vmatpush.bf16.msra.mxu1 %v688_v54 }
  0x4c   :  { %1636 = vmatmul.msk.bf16.vlgmr.msra.gmra.mxu2 %vm80_vm2, %v1791_v12  ;;  %1637 = vmatmul.msk.bf16.vlgmr.msra.gmra.mxu3 %vm80_vm2, %v1791_v12 }
  0x4d   :  { %743 = vmatpush.bf16.msra.mxu2 %v691_v55  ;;  %757 = vmatpush.bf16.msra.mxu3 %v694_v56 }
  0x5a   :  { %1638 = vmatmul.msk.bf16.vlgmr.msrb.gmra.mxu0 %vm80_vm2, %v1791_v12  ;;  %1639 = vmatmul.msk.bf16.vlgmr.msrb.gmra.mxu1 %vm80_vm2, %v1791_v12 }
  0x5b   :  { %771 = vmatpush.bf16.msrb.mxu0 %v697_v6  ;;  %785 = vmatpush.bf16.msrb.mxu1 %v700_v7 }
  0x5c   :  { %1640 = vmatmul.msk.bf16.vlgmr.msrb.gmra.mxu2 %vm80_vm2, %v1791_v12  ;;  %1641 = vmatmul.msk.bf16.vlgmr.msrb.gmra.mxu3 %vm80_vm2, %v1791_v12 }
  0x5d   :  { %799 = vmatpush.bf16.msrb.mxu2 %v703_v8  ;;  %813 = vmatpush.bf16.msrb.mxu3 %v706_v9 }
  0x6a   :  { %1682 = vmatmul.msk.bf16.vlgmr.msra.gmra.mxu0 %vm80_vm2, %v1791_v12  ;;  %1683 = vmatmul.msk.bf16.vlgmr.msra.gmra.mxu1 %vm80_vm2, %v1791_v12 }
  0x6c   :  { %1684 = vmatmul.msk.bf16.vlgmr.msra.gmra.mxu2 %vm80_vm2, %v1791_v12  ;;  %1685 = vmatmul.msk.bf16.vlgmr.msra.gmra.mxu3 %vm80_vm2, %v1791_v12 }
  0x7a   :  { %1686 = vmatmul.msk.bf16.vlgmr.msrb.gmra.mxu0 %vm80_vm2, %v1791_v12  ;;  %1687 = vmatmul.msk.bf16.vlgmr.msrb.gmra.mxu1 %vm80_vm2, %v1791_v12 }
  0x7c   :  { %1688 = vmatmul.msk.bf16.vlgmr.msrb.gmra.mxu2 %vm80_vm2, %v1791_v12  ;;  %1689 = vmatmul.msk.bf16.vlgmr.msrb.gmra.mxu3 %vm80_vm2, %v1791_v12 }
  0x81   :  { %v2066_v11 = vpop.permute.xlu0 %35 }
  0x87   :  { %v121_v5 = vpop.f32.mrf.mxu0  ;;  %v135_v10 = vpop.f32.mrf.mxu1 }
  0x88   :  { %v2069_v15 = vadd.f32 %v121_v5, %v2066_v11  ;;  %v2072_v16 = vadd.f32 %v135_v10, %v2066_v11 }
  0x89   :  { %v2079_v20 = vpop.permute.xlu0 %40 }
  0x8a   :  { %3050 = vst [vmem:[#allocation2_spill] sm:$0xff] %v2069_v15  ;;  %v224_v12 = vadd.f32 %v2072_v16, %v2069_v15 }
  0x8b   :  { %3051 = vst [vmem:[#allocation3_spill] sm:$0xff] %v2072_v16 }
  0x8f   :  { %v149_v13 = vpop.f32.mrf.mxu2  ;;  %v123_v14 = vpop.f32.mrf.mxu0 }
  0x90   :  { %v163_v17 = vpop.f32.mrf.mxu3  ;;  %v137_v18 = vpop.f32.mrf.mxu1  ;;  %v2075_v19 = vadd.f32 %v149_v13, %v2066_v11  ;;  %v2086_v25 = vadd.f32 %v123_v14, %v2079_v20 }
  0x91   :  { %v2083_v22 = vadd.f32 %v163_v17, %v2066_v11  ;;  %v2089_v26 = vadd.f32 %v137_v18, %v2079_v20 }
  0x92   :  { %3052 = vst [vmem:[#allocation4_spill] sm:$0xff] %v2075_v19  ;;  %v225_v21 = vadd.f32 %v224_v12, %v2075_v19 }
  0x93   :  { %3053 = vst [vmem:[#allocation5_spill] sm:$0xff] %v2083_v22  ;;  %v235_v32 = vadd.f32 %v2089_v26, %v2086_v25 }
  0x94   :  { %3054 = vst [vmem:[#allocation6_spill] sm:$0xff] %v2086_v25  ;;  %v226_v30 = vadd.f32 %v225_v21, %v2083_v22 }
  0x95   :  { %3055 = vst [vmem:[#allocation7_spill] sm:$0xff] %v2089_v26 }
  0x97   :  { %v151_v23 = vpop.f32.mrf.mxu2  ;;  %v177_v24 = vpop.f32.mrf.mxu0 }
  0x98   :  { %v165_v27 = vpop.f32.mrf.mxu3  ;;  %v2092_v28 = vadd.f32 %v177_v24, %v2066_v11  ;;  %v191_v29 = vpop.f32.mrf.mxu1  ;;  %v2096_v31 = vadd.f32 %v151_v23, %v2079_v20 }
  0x99   :  { %v2102_v34 = vadd.f32 %v191_v29, %v2066_v11  ;;  %v2106_v38 = vadd.f32 %v165_v27, %v2079_v20 }
  0x9a   :  { %3056 = vst [vmem:[#allocation8_spill] sm:$0xff] %v2092_v28  ;;  %v227_v33 = vadd.f32 %v226_v30, %v2092_v28  ;;  %v236_v35 = vadd.f32 %v235_v32, %v2096_v31 }
  0x9b   :  { %3057 = vst [vmem:[#allocation9_spill] sm:$0xff] %v2096_v31 }
  0x9c   :  { %3058 = vst [vmem:[#allocation10_spill] sm:$0xff] %v2102_v34  ;;  %v228_v43 = vadd.f32 %v227_v33, %v2102_v34  ;;  %v237_v45 = vadd.f32 %v236_v35, %v2106_v38 }
  0x9d   :  { %3059 = vst [vmem:[#allocation11_spill] sm:$0xff] %v2106_v38 }
  0x9f   :  { %v205_v36 = vpop.f32.mrf.mxu2  ;;  %v179_v37 = vpop.f32.mrf.mxu0 }
  0xa0   :  { %v2109_v39 = vadd.f32 %v205_v36, %v2066_v11  ;;  %v219_v40 = vpop.f32.mrf.mxu3  ;;  %v2112_v41 = vadd.f32 %v179_v37, %v2079_v20  ;;  %v193_v42 = vpop.f32.mrf.mxu1 }
  0xa1   :  { %v2116_v44 = vadd.f32 %v219_v40, %v2066_v11  ;;  %v2124_v50 = vadd.f32 %v193_v42, %v2079_v20 }
  0xa2   :  { %3060 = vst [vmem:[#allocation12_spill] sm:$0xff] %v2109_v39  ;;  %v229_v46 = vadd.f32 %v228_v43, %v2109_v39  ;;  %v238_v48 = vadd.f32 %v237_v45, %v2112_v41 }
  0xa3   :  { %3061 = vst [vmem:[#allocation13_spill] sm:$0xff] %v2112_v41  ;;  %v231_v47 = vsel %vm230_vm3, %v2116_v44, 0.0 }
  0xa4   :  { %3062 = vst [vmem:[#allocation14_spill] sm:$0xff] %v2116_v44  ;;  %v232_v49 = vadd.f32 %v231_v47, %v229_v46  ;;  %v239_v53 = vadd.f32 %v238_v48, %v2124_v50 }
  0xa5   :  { %3063 = vst [vmem:[#allocation15_spill] sm:$0xff] %v2124_v50 }
  0xa6   :  { %233 = vadd.xlane.f32.xlu1 %v232_v49 }
  0xa7   :  { %v207_v51 = vpop.f32.mrf.mxu2  ;;  %v319_v52 = vpop.f32.mrf.mxu0 }
  0xa8   :  { %v2128_v54 = vadd.f32 %v207_v51, %v2079_v20  ;;  %v221_v55 = vpop.f32.mrf.mxu3  ;;  %v333_v56 = vpop.f32.mrf.mxu1  ;;  %v2137_v63 = vadd.f32 %v319_v52, %v2066_v11 }
  0xa9   :  { %v2131_v57 = vadd.f32 %v221_v55, %v2079_v20  ;;  %v2140_v0 = vadd.f32 %v333_v56, %v2066_v11 }
  0xaa   :  { %3064 = vst [vmem:[#allocation16_spill] sm:$0xff] %v2128_v54  ;;  %v240_v58 = vadd.f32 %v239_v53, %v2128_v54 }
  0xab   :  { %3065 = vst [vmem:[#allocation17_spill] sm:$0xff] %v2131_v57  ;;  %v241_v59 = vsel %vm230_vm3, %v2131_v57, 0.0  ;;  %v422_v4 = vadd.f32 %v2140_v0, %v2137_v63 }
  0xac   :  { %v242_v60 = vadd.f32 %v241_v59, %v240_v58  ;;  %3066 = vst [vmem:[#allocation18_spill] sm:$0xff] %v2137_v63 }
  0xad   :  { %3067 = vst [vmem:[#allocation19_spill] sm:$0xff] %v2140_v0 }
  0xae   :  { %243 = vadd.xlane.f32.xlu1 %v242_v60 }
  0xaf   :  { %v347_v61 = vpop.f32.mrf.mxu2  ;;  %v321_v62 = vpop.f32.mrf.mxu0 }
  0xb0   :  { %v361_v1 = vpop.f32.mrf.mxu3  ;;  %v335_v2 = vpop.f32.mrf.mxu1  ;;  %v2143_v3 = vadd.f32 %v347_v61, %v2066_v11  ;;  %v2152_v5 = vadd.f32 %v321_v62, %v2079_v20 }
  0xb1   :  { %v2149_v7 = vadd.f32 %v361_v1, %v2066_v11  ;;  %v2155_v10 = vadd.f32 %v335_v2, %v2079_v20 }
  0xb2   :  { %3068 = vst [vmem:[#allocation20_spill] sm:$0xff] %v2143_v3  ;;  %v423_v6 = vadd.f32 %v422_v4, %v2143_v3 }
  0xb3   :  { %3069 = vst [vmem:[#allocation21_spill] sm:$0xff] %v2149_v7  ;;  %v432_v21 = vadd.f32 %v2155_v10, %v2152_v5 }
  0xb4   :  { %3070 = vst [vmem:[#allocation22_spill] sm:$0xff] %v2152_v5  ;;  %v424_v18 = vadd.f32 %v423_v6, %v2149_v7 }
  0xb5   :  { %3071 = vst [vmem:[#allocation23_spill] sm:$0xff] %v2155_v10 }
  0xb7   :  { %v349_v8 = vpop.f32.mrf.mxu2  ;;  %v375_v9 = vpop.f32.mrf.mxu0 }
  0xb8   :  { %v363_v13 = vpop.f32.mrf.mxu3  ;;  %v2158_v14 = vadd.f32 %v375_v9, %v2066_v11  ;;  %v389_v17 = vpop.f32.mrf.mxu1  ;;  %v2162_v12 = vadd.f32 %v349_v8, %v2079_v20 }
  0xb9   :  { %v2168_v24 = vadd.f32 %v389_v17, %v2066_v11  ;;  %v2172_v32 = vadd.f32 %v363_v13, %v2079_v20 }
  0xba   :  { %3072 = vst [vmem:[#allocation24_spill] sm:$0xff] %v2158_v14  ;;  %v425_v23 = vadd.f32 %v424_v18, %v2158_v14  ;;  %v433_v27 = vadd.f32 %v432_v21, %v2162_v12 }
  0xbb   :  { %3073 = vst [vmem:[#allocation25_spill] sm:$0xff] %v2162_v12 }
  0xbc   :  { %3074 = vst [vmem:[#allocation26_spill] sm:$0xff] %v2168_v24  ;;  %v426_v40 = vadd.f32 %v425_v23, %v2168_v24  ;;  %v434_v43 = vadd.f32 %v433_v27, %v2172_v32 }
  0xbd   :  { %3075 = vst [vmem:[#allocation27_spill] sm:$0xff] %v2172_v32 }
  0xbf   :  { %v403_v29 = vpop.f32.mrf.mxu2  ;;  %v377_v30 = vpop.f32.mrf.mxu0 }
  0xc0   :  { %v2175_v33 = vadd.f32 %v403_v29, %v2066_v11  ;;  %v417_v35 = vpop.f32.mrf.mxu3  ;;  %v2178_v36 = vadd.f32 %v377_v30, %v2079_v20  ;;  %v391_v37 = vpop.f32.mrf.mxu1 }
  0xc1   :  { %v2182_v42 = vadd.f32 %v417_v35, %v2066_v11  ;;  %v2190_v49 = vadd.f32 %v391_v37, %v2079_v20 }
  0xc2   :  { %3076 = vst [vmem:[#allocation28_spill] sm:$0xff] %v2175_v33  ;;  %v427_v45 = vadd.f32 %v426_v40, %v2175_v33  ;;  %v435_v47 = vadd.f32 %v434_v43, %v2178_v36 }
  0xc3   :  { %3077 = vst [vmem:[#allocation29_spill] sm:$0xff] %v2178_v36  ;;  %v428_v46 = vsel %vm230_vm3, %v2182_v42, 0.0 }
  0xc4   :  { %3078 = vst [vmem:[#allocation30_spill] sm:$0xff] %v2182_v42  ;;  %v429_v48 = vadd.f32 %v428_v46, %v427_v45  ;;  %v436_v53 = vadd.f32 %v435_v47, %v2190_v49 }
  0xc5   :  { %3079 = vst [vmem:[#allocation31_spill] sm:$0xff] %v2190_v49 }
  0xc6   :  { %430 = vadd.xlane.f32.xlu2 %v429_v48 }
  0xc7   :  { %v405_v51 = vpop.f32.mrf.mxu2  ;;  %v518_v52 = vpop.f32.mrf.mxu0 }
  0xc8   :  { %v2194_v55 = vadd.f32 %v405_v51, %v2079_v20  ;;  %v419_v56 = vpop.f32.mrf.mxu3  ;;  %v532_v58 = vpop.f32.mrf.mxu1  ;;  %v2203_v4 = vadd.f32 %v518_v52, %v2066_v11 }
  0xc9   :  { %v2197_v59 = vadd.f32 %v419_v56, %v2079_v20  ;;  %v2206_v6 = vadd.f32 %v532_v58, %v2066_v11 }
  0xca   :  { %3080 = vst [vmem:[#allocation32_spill] sm:$0xff] %v2194_v55  ;;  %v437_v60 = vadd.f32 %v436_v53, %v2194_v55 }
  0xcb   :  { %3081 = vst [vmem:[#allocation33_spill] sm:$0xff] %v2197_v59  ;;  %v438_v61 = vsel %vm230_vm3, %v2197_v59, 0.0  ;;  %v621_v17 = vadd.f32 %v2206_v6, %v2203_v4 }
  0xcc   :  { %v439_v62 = vadd.f32 %v438_v61, %v437_v60  ;;  %3082 = vst [vmem:[#allocation34_spill] sm:$0xff] %v2203_v4 }
  0xcd   :  { %3083 = vst [vmem:[#allocation35_spill] sm:$0xff] %v2206_v6 }
  0xce   :  { %440 = vadd.xlane.f32.xlu2 %v439_v62 }
  0xcf   :  { %v546_v1 = vpop.f32.mrf.mxu2  ;;  %v520_v2 = vpop.f32.mrf.mxu0 }
  0xd0   :  { %v560_v8 = vpop.f32.mrf.mxu3  ;;  %v534_v9 = vpop.f32.mrf.mxu1  ;;  %v2209_v13 = vadd.f32 %v546_v1, %v2066_v11  ;;  %v2218_v29 = vadd.f32 %v520_v2, %v2079_v20 }
  0xd1   :  { %v2215_v21 = vadd.f32 %v560_v8, %v2066_v11  ;;  %v2221_v30 = vadd.f32 %v534_v9, %v2079_v20 }
  0xd2   :  { %3084 = vst [vmem:[#allocation36_spill] sm:$0xff] %v2209_v13  ;;  %v622_v18 = vadd.f32 %v621_v17, %v2209_v13 }
  0xd3   :  { %3085 = vst [vmem:[#allocation37_spill] sm:$0xff] %v2215_v21  ;;  %v631_v46 = vadd.f32 %v2221_v30, %v2218_v29 }
  0xd4   :  { %3086 = vst [vmem:[#allocation38_spill] sm:$0xff] %v2218_v29  ;;  %v623_v43 = vadd.f32 %v622_v18, %v2215_v21 }
  0xd5   :  { %3087 = vst [vmem:[#allocation39_spill] sm:$0xff] %v2221_v30 }
  0xd7   :  { %v548_v23 = vpop.f32.mrf.mxu2  ;;  %v574_v27 = vpop.f32.mrf.mxu0 }
  0xd8   :  { %v562_v35 = vpop.f32.mrf.mxu3  ;;  %v2224_v37 = vadd.f32 %v574_v27, %v2066_v11  ;;  %v588_v40 = vpop.f32.mrf.mxu1  ;;  %v2228_v45 = vadd.f32 %v548_v23, %v2079_v20 }
  0xd9   :  { %v2234_v48 = vadd.f32 %v588_v40, %v2066_v11  ;;  %v2238_v56 = vadd.f32 %v562_v35, %v2079_v20 }
  0xda   :  { %3088 = vst [vmem:[#allocation40_spill] sm:$0xff] %v2224_v37  ;;  %v624_v47 = vadd.f32 %v623_v43, %v2224_v37  ;;  %v632_v51 = vadd.f32 %v631_v46, %v2228_v45 }
  0xdb   :  { %3089 = vst [vmem:[#allocation41_spill] sm:$0xff] %v2228_v45 }
  0xdc   :  { %3090 = vst [vmem:[#allocation42_spill] sm:$0xff] %v2234_v48  ;;  %v625_v58 = vadd.f32 %v624_v47, %v2234_v48  ;;  %v633_v8 = vadd.f32 %v632_v51, %v2238_v56 }
  0xdd   :  { %3091 = vst [vmem:[#allocation43_spill] sm:$0xff] %v2238_v56 }
  0xdf   :  { %v602_v52 = vpop.f32.mrf.mxu2  ;;  %v576_v53 = vpop.f32.mrf.mxu0 }
  0xe0   :  { %v2242_v60 = vadd.f32 %v602_v52, %v2066_v11  ;;  %v616_v61 = vpop.f32.mrf.mxu3  ;;  %v2245_v62 = vadd.f32 %v576_v53, %v2079_v20  ;;  %v590_v1 = vpop.f32.mrf.mxu1 }
  0xe1   :  { %v2248_v2 = vadd.f32 %v616_v61, %v2066_v11  ;;  %v2256_v27 = vadd.f32 %v590_v1, %v2079_v20 }
  0xe2   :  { %3092 = vst [vmem:[#allocation44_spill] sm:$0xff] %v2242_v60  ;;  %v626_v9 = vadd.f32 %v625_v58, %v2242_v60  ;;  %v634_v18 = vadd.f32 %v633_v8, %v2245_v62 }
  0xe3   :  { %3093 = vst [vmem:[#allocation45_spill] sm:$0xff] %v2245_v62  ;;  %v627_v17 = vsel %vm230_vm3, %v2248_v2, 0.0 }
  0xe4   :  { %3094 = vst [vmem:[#allocation46_spill] sm:$0xff] %v2248_v2  ;;  %v628_v23 = vadd.f32 %v627_v17, %v626_v9  ;;  %v635_v43 = vadd.f32 %v634_v18, %v2256_v27 }
  0xe5   :  { %3095 = vst [vmem:[#allocation47_spill] sm:$0xff] %v2256_v27 }
  0xe6   :  { %629 = vadd.xlane.f32.xlu0 %v628_v23 }
  0xe7   :  { %v604_v35 = vpop.f32.mrf.mxu2  ;;  %v717_v40 = vpop.f32.mrf.mxu0 }
  0xe8   :  { %v2260_v46 = vadd.f32 %v604_v35, %v2079_v20  ;;  %v618_v47 = vpop.f32.mrf.mxu3  ;;  %v731_v51 = vpop.f32.mrf.mxu1  ;;  %v2269_v9 = vadd.f32 %v717_v40, %v2066_v11 }
  0xe9   :  { %v2263_v52 = vadd.f32 %v618_v47, %v2079_v20  ;;  %v2272_v17 = vadd.f32 %v731_v51, %v2066_v11 }
  0xea   :  { %3096 = vst [vmem:[#allocation48_spill] sm:$0xff] %v2260_v46  ;;  %v636_v53 = vadd.f32 %v635_v43, %v2260_v46 }
  0xeb   :  { %3097 = vst [vmem:[#allocation49_spill] sm:$0xff] %v2263_v52  ;;  %v637_v58 = vsel %vm230_vm3, %v2263_v52, 0.0  ;;  %v820_v43 = vadd.f32 %v2272_v17, %v2269_v9 }
  0xec   :  { %v638_v61 = vadd.f32 %v637_v58, %v636_v53  ;;  %3098 = vst [vmem:[#allocation50_spill] sm:$0xff] %v2269_v9 }
  0xed   :  { %3099 = vst [vmem:[#allocation51_spill] sm:$0xff] %v2272_v17 }
  0xee   :  { %639 = vadd.xlane.f32.xlu1 %v638_v61 }
  0xef   :  { %v745_v1 = vpop.f32.mrf.mxu2  ;;  %v719_v8 = vpop.f32.mrf.mxu0 }
  0xf0   :  { %v759_v18 = vpop.f32.mrf.mxu3  ;;  %v733_v23 = vpop.f32.mrf.mxu1  ;;  %v2275_v35 = vadd.f32 %v745_v1, %v2066_v11  ;;  %v2284_v40 = vadd.f32 %v719_v8, %v2079_v20 }
  0xf1   :  { %v2281_v61 = vadd.f32 %v759_v18, %v2066_v11  ;;  %v2287_v51 = vadd.f32 %v733_v23, %v2079_v20 }
  0xf2   :  { %3100 = vst [vmem:[#allocation52_spill] sm:$0xff] %v2275_v35  ;;  %v821_v47 = vadd.f32 %v820_v43, %v2275_v35 }
  0xf3   :  { %3101 = vst [vmem:[#allocation53_spill] sm:$0xff] %v2281_v61  ;;  %v830_v18 = vadd.f32 %v2287_v51, %v2284_v40 }
  0xf4   :  { %3102 = vst [vmem:[#allocation54_spill] sm:$0xff] %v2284_v40  ;;  %v822_v27 = vadd.f32 %v821_v47, %v2281_v61 }
  0xf5   :  { %3103 = vst [vmem:[#allocation55_spill] sm:$0xff] %v2287_v51 }
  0xf7   :  { %v747_v53 = vpop.f32.mrf.mxu2  ;;  %v773_v58 = vpop.f32.mrf.mxu0 }
  0xf8   :  { %v761_v52 = vpop.f32.mrf.mxu3  ;;  %v2290_v1 = vadd.f32 %v773_v58, %v2066_v11  ;;  %v787_v46 = vpop.f32.mrf.mxu1  ;;  %v2294_v43 = vadd.f32 %v747_v53, %v2079_v20 }
  0xf9   :  { %v2301_v23 = vadd.f32 %v787_v46, %v2066_v11  ;;  %v2304_v58 = vadd.f32 %v761_v52, %v2079_v20 }
  0xfa   :  { %3104 = vst [vmem:[#allocation56_spill] sm:$0xff] %v2290_v1  ;;  %v823_v59 = vadd.f32 %v822_v27, %v2290_v1  ;;  %v831_v8 = vadd.f32 %v830_v18, %v2294_v43 }
  0xfb   :  { %3105 = vst [vmem:[#allocation57_spill] sm:$0xff] %v2294_v43 }
  0xfc   :  { %3106 = vst [vmem:[#allocation58_spill] sm:$0xff] %v2301_v23  ;;  %v824_v47 = vadd.f32 %v823_v59, %v2301_v23  ;;  %v832_v46 = vadd.f32 %v831_v8, %v2304_v58 }
  0xfd   :  { %3107 = vst [vmem:[#allocation59_spill] sm:$0xff] %v2304_v58 }
  0xff   :  { %v801_v2 = vpop.f32.mrf.mxu2  ;;  %v775_v57 = vpop.f32.mrf.mxu0 }
 0x100   :  { %v2308_v53 = vadd.f32 %v801_v2, %v2066_v11  ;;  %v815_v42 = vpop.f32.mrf.mxu3  ;;  %v2311_v51 = vadd.f32 %v775_v57, %v2079_v20  ;;  %v789_v43 = vpop.f32.mrf.mxu1 }
 0x101   :  { %v2314_v27 = vadd.f32 %v815_v42, %v2066_v11  ;;  %v2322_v2 = vadd.f32 %v789_v43, %v2079_v20 }
 0x102   :  { %3108 = vst [vmem:[#allocation60_spill] sm:$0xff] %v2308_v53  ;;  %v825_v18 = vadd.f32 %v824_v47, %v2308_v53  ;;  %v833_v59 = vadd.f32 %v832_v46, %v2311_v51 }
 0x103   :  { %3109 = vst [vmem:[#allocation61_spill] sm:$0xff] %v2311_v51  ;;  %v826_v52 = vsel %vm230_vm3, %v2314_v27, 0.0 }
 0x104   :  { %3110 = vst [vmem:[#allocation62_spill] sm:$0xff] %v2314_v27  ;;  %v827_v40 = vadd.f32 %v826_v52, %v825_v18  ;;  %v834_v44 = vadd.f32 %v833_v59, %v2322_v2 }
 0x105   :  { %3111 = vst [vmem:[#allocation63_spill] sm:$0xff] %v2322_v2 }
 0x106   :  { %828 = vadd.xlane.f32.xlu2 %v827_v40 }
 0x107   :  { %v803_v57 = vpop.f32.mrf.mxu2 }
 0x108   :  { %v2326_v11 = vadd.f32 %v803_v57, %v2079_v20  ;;  %v817_v42 = vpop.f32.mrf.mxu3 }
 0x109   :  { %v2329_v8 = vadd.f32 %v817_v42, %v2079_v20 }
 0x10a   :  { %3112 = vst [vmem:[#allocation64_spill] sm:$0xff] %v2326_v11  ;;  %v835_v47 = vadd.f32 %v834_v44, %v2326_v11 }
 0x10b   :  { %3113 = vst [vmem:[#allocation65_spill] sm:$0xff] %v2329_v8  ;;  %v836_v46 = vsel %vm230_vm3, %v2329_v8, 0.0 }
 0x10c   :  { %v837_v18 = vadd.f32 %v836_v46, %v835_v47 }
 0x10e   :  { %838 = vadd.xlane.f32.xlu1 %v837_v18 }
 0x119   :  { %v234_v52 = vpop.xlane.xlu1 %233 }
 0x121   :  { %v244_v27 = vpop.xlane.xlu1 %243 }
 0x139   :  { %v431_v43 = vpop.xlane.xlu2 %430 }
 0x13a   :  { %v442_v59 = vadd.f32 %v431_v43, %v234_v52 }
 0x141   :  { %v441_v40 = vpop.xlane.xlu2 %440 }
 0x142   :  { %v443_v20 = vadd.f32 %v441_v40, %v244_v27 }
 0x159   :  { %v630_v51 = vpop.xlane.xlu0 %629 }
 0x15a   :  { %v641_v57 = vadd.f32 %v630_v51, %v442_v59 }
 0x161   :  { %v640_v53 = vpop.xlane.xlu1 %639 }
 0x162   :  { %v642_v42 = vadd.f32 %v640_v53, %v443_v20 }
 0x179   :  { %v829_v2 = vpop.xlane.xlu2 %828 }
 0x17a   :  { %v840_v58 = vadd.f32 %v829_v2, %v641_v57 }
 0x17c   :  { %v2334_v62 = vmul.f32 0.00026041668, %v840_v58 }
 0x17e   :  { %v844_v44 = vsub.f32 %v2069_v15, %v2334_v62  ;;  %v845_v47 = vsub.f32 %v2072_v16, %v2334_v62  ;;  %v846_v46 = vsub.f32 %v2075_v19, %v2334_v62  ;;  %v847_v18 = vsub.f32 %v2083_v22, %v2334_v62 }
 0x17f   :  { %v848_v51 = vsub.f32 %v2092_v28, %v2334_v62  ;;  %v849_v58 = vsub.f32 %v2102_v34, %v2334_v62  ;;  %v2350_v53 = vsub.f32 %v2109_v39, %v2334_v62  ;;  %v896_v27 = vsub.f32 %v2137_v63, %v2334_v62 }
 0x180   :  { %v897_v2 = vsub.f32 %v2140_v0, %v2334_v62  ;;  %v898_v43 = vsub.f32 %v2143_v3, %v2334_v62  ;;  %v899_v52 = vsub.f32 %v2149_v7, %v2334_v62  ;;  %v900_v40 = vsub.f32 %v2158_v14, %v2334_v62 }
 0x181   :  { %v839_v8 = vpop.xlane.xlu1 %838  ;;  %v901_v57 = vsub.f32 %v2168_v24, %v2334_v62  ;;  %v2366_v20 = vsub.f32 %v2175_v33, %v2334_v62  ;;  %v950_v0 = vsub.f32 %v2203_v4, %v2334_v62  ;;  %v951_v3 = vsub.f32 %v2206_v6, %v2334_v62 }
 0x182   :  { %v841_v59 = vadd.f32 %v839_v8, %v642_v42  ;;  %v952_v7 = vsub.f32 %v2209_v13, %v2334_v62  ;;  %v953_v14 = vsub.f32 %v2215_v21, %v2334_v62  ;;  %v954_v8 = vsub.f32 %v2224_v37, %v2334_v62 }
 0x183   :  { %v955_v42 = vsub.f32 %v2234_v48, %v2334_v62  ;;  %v2382_v33 = vsub.f32 %v2242_v60, %v2334_v62  ;;  %v1004_v4 = vsub.f32 %v2269_v9, %v2334_v62  ;;  %v1005_v6 = vsub.f32 %v2272_v17, %v2334_v62 }
 0x184   :  { %v1006_v13 = vsub.f32 %v2275_v35, %v2334_v62  ;;  %v1007_v21 = vsub.f32 %v2281_v61, %v2334_v62  ;;  %v2394_v37 = vsub.f32 %v2290_v1, %v2334_v62  ;;  %v2398_v60 = vsub.f32 %v2301_v23, %v2334_v62 }
 0x185   :  { %v2400_v48 = vmul.f32 0.00026041668, %v841_v59  ;;  %v860_v9 = vmul.f32 %v844_v44, %v844_v44  ;;  %v861_v24 = vmul.f32 %v845_v47, %v845_v47  ;;  %v862_v63 = vmul.f32 %v846_v46, %v846_v46 }
 0x186   :  { %3114 = vst [vmem:[#allocation66_spill] sm:$0xff] %v2398_v60  ;;  %v863_v17 = vmul.f32 %v847_v18, %v847_v18  ;;  %v864_v39 = vmul.f32 %v848_v51, %v848_v51  ;;  %v865_v34 = vmul.f32 %v849_v58, %v849_v58  ;;  %v912_v35 = vmul.f32 %v896_v27, %v896_v27 }
 0x187   :  { %v913_v28 = vmul.f32 %v897_v2, %v897_v2  ;;  %v914_v22 = vmul.f32 %v898_v43, %v898_v43  ;;  %v915_v61 = vmul.f32 %v899_v52, %v899_v52  ;;  %v2402_v19 = vmul.f32 %v900_v40, %v900_v40 }
 0x188   :  { %v2404_v1 = vmul.f32 %v901_v57, %v901_v57  ;;  %v852_v23 = vsub.f32 %v2086_v25, %v2400_v48  ;;  %v853_v59 = vsub.f32 %v2089_v26, %v2400_v48  ;;  %v966_v44 = vmul.f32 %v950_v0, %v950_v0 }
 0x189   :  { %v967_v47 = vmul.f32 %v951_v3, %v951_v3  ;;  %v854_v46 = vsub.f32 %v2096_v31, %v2400_v48  ;;  %v855_v18 = vsub.f32 %v2106_v38, %v2400_v48  ;;  %v856_v51 = vsub.f32 %v2112_v41, %v2400_v48  ;;  %v3118_v38 = vld [vmem:[#allocation54_spill] sm:$0xff]  ;;  %v3119_v31 = vld [vmem:[#allocation55_spill] sm:$0xff] }
 0x18a   :  { %v857_v58 = vsub.f32 %v2124_v50, %v2400_v48  ;;  %v2420_v27 = vsub.f32 %v2128_v54, %v2400_v48  ;;  %v904_v0 = vsub.f32 %v2152_v5, %v2400_v48  ;;  %v905_v3 = vsub.f32 %v2155_v10, %v2400_v48 }
 0x18b   :  { %v906_v2 = vsub.f32 %v2162_v12, %v2400_v48  ;;  %v907_v43 = vsub.f32 %v2172_v32, %v2400_v48  ;;  %v908_v52 = vsub.f32 %v2178_v36, %v2400_v48  ;;  %v2434_v40 = vsub.f32 %v2190_v49, %v2400_v48  ;;  %v3116_v49 = vld [vmem:[#allocation45_spill] sm:$0xff] }
 0x18c   :  { %v876_v57 = vadd.f32 %v861_v24, %v860_v9  ;;  %v2438_v5 = vsub.f32 %v2194_v55, %v2400_v48  ;;  %v958_v10 = vsub.f32 %v2218_v29, %v2400_v48  ;;  %v959_v12 = vsub.f32 %v2221_v30, %v2400_v48  ;;  %v3117_v29 = vld [vmem:[#allocation14_spill] sm:$0xff] }
 0x18d   :  { %v960_v32 = vsub.f32 %v2228_v45, %v2400_v48  ;;  %v2448_v36 = vsub.f32 %v2238_v56, %v2400_v48  ;;  %v2452_v24 = vsub.f32 %v3116_v49, %v2400_v48  ;;  %v968_v9 = vmul.f32 %v952_v7, %v952_v7 }
 0x18e   :  { %3115 = vst [vmem:[#allocation67_spill] sm:$0xff] %v2438_v5  ;;  %v877_v55 = vadd.f32 %v876_v57, %v862_v63  ;;  %v969_v54 = vmul.f32 %v953_v14, %v953_v14  ;;  %v970_v50 = vmul.f32 %v954_v8, %v954_v8  ;;  %v2454_v41 = vmul.f32 %v955_v42, %v955_v42  ;;  %v3120_v63 = vld [vmem:[#allocation57_spill] sm:$0xff] }
 0x18f   :  { %v851_v30 = vsub.f32 %v3117_v29, %v2334_v62  ;;  %v1012_v45 = vsub.f32 %v3118_v38, %v2400_v48  ;;  %v1013_v56 = vsub.f32 %v3119_v31, %v2400_v48  ;;  %v868_v25 = vmul.f32 %v852_v23, %v852_v23 }
 0x190   :  { %v878_v26 = vadd.f32 %v877_v55, %v863_v17  ;;  %v869_v16 = vmul.f32 %v853_v59, %v853_v59  ;;  %v920_v49 = vmul.f32 %v904_v0, %v904_v0  ;;  %v921_v15 = vmul.f32 %v905_v3, %v905_v3 }
 0x191   :  { %v928_v7 = vadd.f32 %v913_v28, %v912_v35  ;;  %v2464_v14 = vsub.f32 %v3120_v63, %v2400_v48  ;;  %v1020_v8 = vmul.f32 %v1004_v4, %v1004_v4  ;;  %v982_v57 = vadd.f32 %v967_v47, %v966_v44 }
 0x192   :  { %v879_v42 = vadd.f32 %v878_v26, %v864_v39  ;;  %v1021_v29 = vmul.f32 %v1005_v6, %v1005_v6  ;;  %v1022_v11 = vmul.f32 %v1006_v13, %v1006_v13  ;;  %v1023_v60 = vmul.f32 %v1007_v21, %v1007_v21  ;;  %v3121_v6 = vld [vmem:[#allocation30_spill] sm:$0xff] }
 0x193   :  { %v867_v38 = vmul.f32 %v851_v30, %v851_v30  ;;  %v866_v31 = vmul.f32 %v2350_v53, %v2350_v53  ;;  %v870_v17 = vmul.f32 %v854_v46, %v854_v46  ;;  %v871_v23 = vmul.f32 %v855_v18, %v855_v18 }
 0x194   :  { %v880_v55 = vadd.f32 %v879_v42, %v865_v34  ;;  %v929_v59 = vadd.f32 %v928_v7, %v914_v22  ;;  %v886_v0 = vadd.f32 %v869_v16, %v868_v25  ;;  %v938_v28 = vadd.f32 %v921_v15, %v920_v49  ;;  %v3122_v15 = vld [vmem:[#allocation17_spill] sm:$0xff] }
 0x195   :  { %v983_v35 = vadd.f32 %v982_v57, %v968_v9  ;;  %v922_v63 = vmul.f32 %v906_v2, %v906_v2  ;;  %v974_v5 = vmul.f32 %v958_v10, %v958_v10  ;;  %v975_v4 = vmul.f32 %v959_v12, %v959_v12 }
 0x196   :  { %v881_v3 = vadd.f32 %v880_v55, %v866_v31  ;;  %v882_v26 = vsel %vm230_vm3, %v867_v38, 0.0  ;;  %v872_v39 = vmul.f32 %v856_v51, %v856_v51  ;;  %v903_v13 = vsub.f32 %v3121_v6, %v2334_v62 }
 0x197   :  { %v930_v21 = vadd.f32 %v929_v59, %v915_v61  ;;  %v1036_v53 = vadd.f32 %v1021_v29, %v1020_v8  ;;  %v887_v34 = vadd.f32 %v886_v0, %v870_v17  ;;  %v939_v44 = vadd.f32 %v938_v28, %v922_v63 }
 0x198   :  { %v883_v30 = vadd.f32 %v882_v26, %v881_v3  ;;  %v873_v47 = vmul.f32 %v857_v58, %v857_v58  ;;  %v859_v22 = vsub.f32 %v3122_v15, %v2400_v48  ;;  %v984_v25 = vadd.f32 %v983_v35, %v969_v54 }
 0x199   :  { %v931_v16 = vadd.f32 %v930_v21, %v2402_v19  ;;  %v923_v31 = vmul.f32 %v907_v43, %v907_v43  ;;  %v924_v10 = vmul.f32 %v908_v52, %v908_v52  ;;  %v992_v38 = vadd.f32 %v975_v4, %v974_v5  ;;  %v3128_v21 = vld [vmem:[#allocation60_spill] sm:$0xff] }
 0x19a   :  { %884 = vadd.xlane.f32.xlu2 %v883_v30  ;;  %v888_v12 = vadd.f32 %v887_v34, %v871_v23  ;;  %v976_v49 = vmul.f32 %v960_v32, %v960_v32  ;;  %v918_v61 = vmul.f32 %v2366_v20, %v2366_v20  ;;  %v919_v46 = vmul.f32 %v903_v13, %v903_v13  ;;  %v3129_v34 = vld [vmem:[#allocation66_spill] sm:$0xff] }
 0x19b   :  { %v932_v29 = vadd.f32 %v931_v16, %v2404_v1  ;;  %v1037_v18 = vadd.f32 %v1036_v53, %v1022_v11  ;;  %v985_v58 = vadd.f32 %v984_v25, %v970_v50  ;;  %v940_v19 = vadd.f32 %v939_v44, %v923_v31  ;;  %v3123_v50 = vld [vmem:[#allocation46_spill] sm:$0xff] }
 0x19c   :  { %v889_v51 = vadd.f32 %v888_v12, %v872_v39  ;;  %v1028_v2 = vmul.f32 %v1012_v45, %v1012_v45  ;;  %v1029_v9 = vmul.f32 %v1013_v56, %v1013_v56  ;;  %v875_v54 = vmul.f32 %v859_v22, %v859_v22  ;;  %v3127_v39 = vld [vmem:[#allocation67_spill] sm:$0xff]  ;;  %v3130_v22 = vld [vmem:[#allocation48_spill] sm:$0xff] }
 0x19d   :  { %v933_v7 = vadd.f32 %v932_v29, %v918_v61  ;;  %v874_v43 = vmul.f32 %v2420_v27, %v2420_v27  ;;  %v993_v52 = vadd.f32 %v992_v38, %v976_v49  ;;  %v941_v32 = vadd.f32 %v940_v19, %v924_v10  ;;  %v3132_v38 = vld [vmem:[#allocation62_spill] sm:$0xff] }
 0x19e   :  { %v890_v5 = vadd.f32 %v889_v51, %v873_v47  ;;  %v925_v20 = vmul.f32 %v2434_v40, %v2434_v40  ;;  %v977_v1 = vmul.f32 %v2448_v36, %v2448_v36  ;;  %v934_v11 = vsel %vm230_vm3, %v919_v46, 0.0  ;;  %v3124_v40 = vld [vmem:[#allocation33_spill] sm:$0xff] }
 0x19f   :  { %v957_v45 = vsub.f32 %v3123_v50, %v2334_v62  ;;  %v935_v56 = vadd.f32 %v934_v11, %v933_v7  ;;  %v1038_v8 = vadd.f32 %v1037_v18, %v1023_v60  ;;  %v986_v42 = vadd.f32 %v985_v58, %v2454_v41  ;;  %v3125_v60 = vld [vmem:[#allocation47_spill] sm:$0xff]  ;;  %v3133_v51 = vld [vmem:[#allocation49_spill] sm:$0xff] }
 0x1a0   :  { %v891_v63 = vadd.f32 %v890_v5, %v874_v43  ;;  %v1024_v27 = vmul.f32 %v2394_v37, %v2394_v37  ;;  %v1046_v57 = vadd.f32 %v1029_v9, %v1028_v2  ;;  %v892_v55 = vsel %vm230_vm3, %v875_v54, 0.0  ;;  %v3126_v41 = vld [vmem:[#allocation59_spill] sm:$0xff] }
 0x1a1   :  { %v911_v17 = vsub.f32 %v3124_v40, %v2400_v48  ;;  %v972_v23 = vmul.f32 %v2382_v33, %v2382_v33  ;;  %v994_v59 = vadd.f32 %v993_v52, %v977_v1  ;;  %v942_v0 = vadd.f32 %v941_v32, %v925_v20  ;;  %v3134_v43 = vld [vmem:[#allocation63_spill] sm:$0xff] }
 0x1a2   :  { %936 = vadd.xlane.f32.xlu2 %v935_v56  ;;  %v893_v36 = vadd.f32 %v892_v55, %v891_v63  ;;  %v963_v28 = vsub.f32 %v3125_v60, %v2400_v48  ;;  %v1015_v35 = vsub.f32 %v3126_v41, %v2400_v48  ;;  %v978_v37 = vmul.f32 %v2452_v24, %v2452_v24  ;;  %v3135_v63 = vld [vmem:[#allocation64_spill] sm:$0xff]  ;;  %v3136_v55 = vld [vmem:[#allocation65_spill] sm:$0xff] }
 0x1a3   :  { %v973_v3 = vmul.f32 %v957_v45, %v957_v45  ;;  %v1030_v4 = vmul.f32 %v2464_v14, %v2464_v14  ;;  %v987_v26 = vadd.f32 %v986_v42, %v972_v23  ;;  %v926_v33 = vmul.f32 %v3127_v39, %v3127_v39  ;;  %v3131_v14 = vld [vmem:[#allocation61_spill] sm:$0xff] }
 0x1a4   :  { %894 = vadd.xlane.f32.xlu1 %v893_v36  ;;  %v1039_v13 = vadd.f32 %v1038_v8, %v1024_v27  ;;  %v1010_v30 = vsub.f32 %v3128_v21, %v2334_v62  ;;  %v927_v53 = vmul.f32 %v911_v17, %v911_v17  ;;  %v1025_v44 = vmul.f32 %v3129_v34, %v3129_v34 }
 0x1a5   :  { %v1047_v47 = vadd.f32 %v1046_v57, %v1030_v4  ;;  %v943_v16 = vadd.f32 %v942_v0, %v926_v33  ;;  %v995_v24 = vadd.f32 %v994_v59, %v978_v37  ;;  %v964_v25 = vsub.f32 %v3130_v22, %v2400_v48 }
 0x1a6   :  { %v1016_v31 = vsub.f32 %v3131_v14, %v2400_v48  ;;  %v988_v10 = vsel %vm230_vm3, %v973_v3, 0.0  ;;  %v1011_v12 = vsub.f32 %v3132_v38, %v2334_v62  ;;  %v979_v49 = vmul.f32 %v963_v28, %v963_v28 }
 0x1a7   :  { %v1031_v61 = vmul.f32 %v1015_v35, %v1015_v35  ;;  %v989_v46 = vadd.f32 %v988_v10, %v987_v26  ;;  %v1040_v29 = vadd.f32 %v1039_v13, %v1025_v44  ;;  %v944_v18 = vsel %vm230_vm3, %v927_v53, 0.0 }
 0x1a8   :  { %v965_v58 = vsub.f32 %v3133_v51, %v2400_v48  ;;  %v945_v2 = vadd.f32 %v944_v18, %v943_v16  ;;  %v1026_v9 = vmul.f32 %v1010_v30, %v1010_v30  ;;  %v996_v7 = vadd.f32 %v995_v24, %v979_v49 }
 0x1a9   :  { %v1048_v19 = vadd.f32 %v1047_v47, %v1031_v61  ;;  %v1027_v54 = vmul.f32 %v1011_v12, %v1011_v12  ;;  %v1017_v5 = vsub.f32 %v3134_v43, %v2400_v48  ;;  %v1032_v52 = vmul.f32 %v1016_v31, %v1016_v31 }
 0x1aa   :  { %990 = vadd.xlane.f32.xlu2 %v989_v46  ;;  %v1041_v32 = vadd.f32 %v1040_v29, %v1026_v9  ;;  %v980_v20 = vmul.f32 %v964_v25, %v964_v25  ;;  %v981_v1 = vmul.f32 %v965_v58, %v965_v58  ;;  %v1018_v8 = vsub.f32 %v3135_v63, %v2400_v48 }
 0x1ab   :  { %v1049_v45 = vadd.f32 %v1048_v19, %v1032_v52  ;;  %v1042_v56 = vsel %vm230_vm3, %v1027_v54, 0.0  ;;  %v1033_v42 = vmul.f32 %v1017_v5, %v1017_v5  ;;  %v1019_v17 = vsub.f32 %v3136_v55, %v2400_v48  ;;  %v1060_v19 = vld [vmem:[%s2964_s3] sm:$0xff] }
 0x1ac   :  { %946 = vadd.xlane.f32.xlu1 %v945_v2  ;;  %v997_v11 = vadd.f32 %v996_v7, %v980_v20  ;;  %v1043_v27 = vadd.f32 %v1042_v56, %v1041_v32  ;;  %v998_v57 = vsel %vm230_vm3, %v981_v1, 0.0  ;;  %v1034_v59 = vmul.f32 %v1018_v8, %v1018_v8  ;;  %v1086_v32 = vld [vmem:[%s2965_s4] sm:$0xff]  ;;  %v1061_v56 = vld [vmem:[%s2964_s3 + $0x8] sm:$0xff] }
 0x1ad   :  { %v1050_v23 = vadd.f32 %v1049_v45, %v1033_v42  ;;  %v1035_v0 = vmul.f32 %v1019_v17, %v1019_v17 }
 0x1ae   :  { %v999_v36 = vadd.f32 %v998_v57, %v997_v11 }
 0x1af   :  { %v1051_v28 = vadd.f32 %v1050_v23, %v1034_v59  ;;  %v1052_v35 = vsel %vm230_vm3, %v1035_v0, 0.0  ;;  %v3137_v23 = vld [vmem:[#allocation2_spill] sm:$0xff]  ;;  %v3138_v0 = vld [vmem:[#allocation3_spill] sm:$0xff] }
 0x1b1   :  { %v1053_v37 = vadd.f32 %v1052_v35, %v1051_v28  ;;  %v3139_v35 = vld [vmem:[#allocation4_spill] sm:$0xff] }
 0x1b2   :  { %1044 = vadd.xlane.f32.xlu2 %v1043_v27 }
 0x1b4   :  { %1000 = vadd.xlane.f32.xlu1 %v999_v36 }
 0x1bc   :  { %1054 = vadd.xlane.f32.xlu1 %v1053_v37 }
 0x20d   :  { %v885_v3 = vpop.xlane.xlu2 %884 }
 0x215   :  { %v937_v4 = vpop.xlane.xlu2 %936 }
 0x216   :  { %v948_v13 = vadd.f32 %v937_v4, %v885_v3  ;;  %v3140_v3 = vld [vmem:[#allocation5_spill] sm:$0xff] }
 0x217   :  { %v895_v26 = vpop.xlane.xlu1 %894 }
 0x21d   :  { %v991_v39 = vpop.xlane.xlu2 %990 }
 0x21e   :  { %v1002_v30 = vadd.f32 %v991_v39, %v948_v13 }
 0x21f   :  { %v947_v33 = vpop.xlane.xlu1 %946 }
 0x220   :  { %v949_v24 = vadd.f32 %v947_v33, %v895_v26  ;;  %v3141_v26 = vld [vmem:[#allocation8_spill] sm:$0xff]  ;;  %v3142_v33 = vld [vmem:[#allocation10_spill] sm:$0xff] }
 0x225   :  { %v1045_v53 = vpop.xlane.xlu2 %1044 }
 0x226   :  { %v1056_v34 = vadd.f32 %v1045_v53, %v1002_v30  ;;  %v3144_v53 = vld [vmem:[#allocation14_spill] sm:$0xff] }
 0x227   :  { %v1001_v44 = vpop.xlane.xlu1 %1000 }
 0x228   :  { %v1058_v47 = vmul.f32 0.00026041668, %v1056_v34  ;;  %v1003_v25 = vadd.f32 %v1001_v44, %v949_v24  ;;  %v3145_v44 = vld [vmem:[#allocation18_spill] sm:$0xff] }
 0x22a   :  { %v1062_v16 = vadd.f32 1e-05, %v1058_v47 }
 0x22c   :  { %1728 = vrsqrt.f32 %v1062_v16  ;;  %vm1070_vm5 = vweird.f32 %v1062_v16 }
 0x22f   :  { %v1055_v31 = vpop.xlane.xlu1 %1054 }
 0x230   :  { %v1057_v10 = vadd.f32 %v1055_v31, %v1003_v25  ;;  %v3147_v25 = vld [vmem:[#allocation20_spill] sm:$0xff] }
 0x232   :  { %v1729_v12 = vpop.eup %1728  ;;  %v1059_v49 = vmul.f32 0.00026041668, %v1057_v10  ;;  %v3148_v10 = vld [vmem:[#allocation21_spill] sm:$0xff] }
 0x233   :  { %v1065_v61 = vmul.f32 %v1729_v12, %v1062_v16  ;;  %vm1071_vm4 = vweird.f32 %v1729_v12  ;;  %v3146_v16 = vld [vmem:[#allocation19_spill] sm:$0xff] }
 0x234   :  { %v1063_v46 = vadd.f32 1e-05, %v1059_v49  ;;  %vm1072_vm6 = vmor %vm1070_vm5, %vm1071_vm4  ;;  %v3149_v49 = vld [vmem:[#allocation24_spill] sm:$0xff] }
 0x235   :  { %v1066_v29 = vmul.f32 %v1729_v12, %v1065_v61 }
 0x236   :  { %1730 = vrsqrt.f32 %v1063_v46  ;;  %vm1080_vm8 = vweird.f32 %v1063_v46 }
 0x237   :  { %v1067_v18 = vmul.f32 0.5, %v1066_v29 }
 0x239   :  { %v1068_v58 = vsub.f32 1.5, %v1067_v18  ;;  %v3151_v18 = vld [vmem:[#allocation28_spill] sm:$0xff] }
 0x23b   :  { %v1069_v2 = vmul.f32 %v1729_v12, %v1068_v58 }
 0x23c   :  { %v1731_v9 = vpop.eup %1730 }
 0x23d   :  { %v1075_v7 = vmul.f32 %v1731_v9, %v1063_v46  ;;  %v1073_v54 = vsel %vm1072_vm6, %v1729_v12, %v1069_v2  ;;  %vm1081_vm7 = vweird.f32 %v1731_v9  ;;  %v3150_v46 = vld [vmem:[#allocation26_spill] sm:$0xff] }
 0x23e   :  { %v1084_v5 = vmul.f32 %v1073_v54, %v1060_v19  ;;  %vm1082_vm9 = vmor %vm1080_vm8, %vm1081_vm7  ;;  %v3152_v2 = vld [vmem:[#allocation34_spill] sm:$0xff] }
 0x23f   :  { %v1076_v52 = vmul.f32 %v1731_v9, %v1075_v7  ;;  %v3153_v7 = vld [vmem:[#allocation35_spill] sm:$0xff] }
 0x240   :  { %1094 = vperm.xlu2 %1726, %v1084_v5   ;;  %v1088_v20 = vmul.f32 %v1084_v5, %v2334_v62  ;;  %v1087_v62 = vld [vmem:[%s2965_s4 + $0x8] sm:$0xff]  ;;  %v3154_v5 = vld [vmem:[#allocation36_spill] sm:$0xff] }
 0x241   :  { %v1077_v1 = vmul.f32 0.5, %v1076_v52 }
 0x242   :  { %v1090_v11 = vsub.f32 %v1086_v32, %v1088_v20  ;;  %v3155_v32 = vld [vmem:[#allocation37_spill] sm:$0xff] }
 0x243   :  { %v1078_v45 = vsub.f32 1.5, %v1077_v1  ;;  %v3156_v1 = vld [vmem:[#allocation40_spill] sm:$0xff] }
 0x244   :  { %1120 = vperm.xlu1 %1727, %v1090_v11  }
 0x245   :  { %v1079_v8 = vmul.f32 %v1731_v9, %v1078_v45  ;;  %v3157_v45 = vld [vmem:[#allocation42_spill] sm:$0xff] }
 0x247   :  { %v1083_v42 = vsel %vm1082_vm9, %v1731_v9, %v1079_v8  ;;  %v3158_v8 = vld [vmem:[#allocation44_spill] sm:$0xff] }
 0x248   :  { %v1085_v27 = vmul.f32 %v1083_v42, %v1061_v56 }
 0x24a   :  { %1099 = vperm.xlu0 %1725, %v1085_v27   ;;  %v1089_v57 = vmul.f32 %v1085_v27, %v2400_v48  ;;  %v3143_v48 = vld [vmem:[#allocation12_spill] sm:$0xff]  ;;  %v3159_v27 = vld [vmem:[#allocation50_spill] sm:$0xff] }
 0x24c   :  { %v1091_v17 = vsub.f32 %v1087_v62, %v1089_v57  ;;  %v3160_v62 = vld [vmem:[#allocation51_spill] sm:$0xff] }
 0x252   :  { %1125 = vperm.xlu0 %1725, %v1091_v17  }
 0x29a   :  { %v1095_v36 = vpop.permute.xlu2 %1094 }
 0x29b   :  { %v1102_v59 = vmul.f32 %v1095_v36, %v3137_v23  ;;  %v1103_v28 = vmul.f32 %v1095_v36, %v3138_v0  ;;  %v1104_v37 = vmul.f32 %v1095_v36, %v3139_v35  ;;  %v1105_v4 = vmul.f32 %v1095_v36, %v3140_v3  ;;  %v3161_v23 = vld [vmem:[#allocation52_spill] sm:$0xff]  ;;  %v3162_v35 = vld [vmem:[#allocation53_spill] sm:$0xff] }
 0x29c   :  { %v1106_v39 = vmul.f32 %v1095_v36, %v3141_v26  ;;  %v1107_v13 = vmul.f32 %v1095_v36, %v3142_v33  ;;  %v1108_v30 = vmul.f32 %v1095_v36, %v3143_v48  ;;  %v1109_v34 = vmul.f32 %v1095_v36, %v3144_v53  ;;  %v3163_v26 = vld [vmem:[#allocation56_spill] sm:$0xff]  ;;  %v3164_v48 = vld [vmem:[#allocation58_spill] sm:$0xff] }
 0x29d   :  { %v1192_v47 = vmul.f32 %v1095_v36, %v3145_v44  ;;  %v1193_v24 = vmul.f32 %v1095_v36, %v3146_v16  ;;  %v1194_v31 = vmul.f32 %v1095_v36, %v3147_v25  ;;  %v1195_v12 = vmul.f32 %v1095_v36, %v3148_v10 }
 0x29e   :  { %v1196_v61 = vmul.f32 %v1095_v36, %v3149_v49  ;;  %v1197_v29 = vmul.f32 %v1095_v36, %v3150_v46  ;;  %v1198_v58 = vmul.f32 %v1095_v36, %v3151_v18  ;;  %v1199_v19 = vmul.f32 %v1095_v36, %v3121_v6 }
 0x29f   :  { %v2558_v9 = vmul.f32 %v1095_v36, %v3152_v2  ;;  %v2561_v54 = vmul.f32 %v1095_v36, %v3153_v7  ;;  %v2564_v52 = vmul.f32 %v1095_v36, %v3154_v5  ;;  %v2567_v20 = vmul.f32 %v1095_v36, %v3155_v32 }
 0x2a0   :  { %v2570_v11 = vmul.f32 %v1095_v36, %v3156_v1  ;;  %v2573_v56 = vmul.f32 %v1095_v36, %v3157_v45  ;;  %v2576_v6 = vmul.f32 %v1095_v36, %v3158_v8  ;;  %v2579_v42 = vmul.f32 %v1095_v36, %v3123_v50 }
 0x2a1   :  { %v2582_v57 = vmul.f32 %v1095_v36, %v3159_v27  ;;  %v2585_v17 = vmul.f32 %v1095_v36, %v3160_v62  ;;  %v2588_v0 = vmul.f32 %v1095_v36, %v3161_v23  ;;  %v2591_v3 = vmul.f32 %v1095_v36, %v3162_v35 }
 0x2a2   :  { %v2594_v33 = vmul.f32 %v1095_v36, %v3163_v26  ;;  %v2597_v53 = vmul.f32 %v1095_v36, %v3164_v48 }
 0x2b6   :  { %v2599_v50 = vpop.permute.xlu1 %1120 }
 0x2b7   :  { %v1128_v44 = vadd.f32 %v2599_v50, %v1102_v59  ;;  %v1129_v16 = vadd.f32 %v2599_v50, %v1103_v28  ;;  %v1130_v25 = vadd.f32 %v2599_v50, %v1104_v37  ;;  %v1131_v10 = vadd.f32 %v2599_v50, %v1105_v4 }
 0x2b8   :  { %v1132_v49 = vadd.f32 %v2599_v50, %v1106_v39  ;;  %v1133_v46 = vadd.f32 %v2599_v50, %v1107_v13  ;;  %v1134_v18 = vadd.f32 %v2599_v50, %v1108_v30  ;;  %v1135_v2 = vadd.f32 %v2599_v50, %v1109_v34 }
 0x2b9   :  { %vm1144_vm10 = vcmp.ge.f32.partialorder %v1128_v44, 0.0  ;;  %vm1145_vm11 = vcmp.ge.f32.partialorder %v1129_v16, 0.0  ;;  %vm1146_vm12 = vcmp.ge.f32.partialorder %v1130_v25, 0.0  ;;  %vm1147_vm13 = vcmp.ge.f32.partialorder %v1131_v10, 0.0 }
 0x2ba   :  { %vm1148_vm14 = vcmp.ge.f32.partialorder %v1132_v49, 0.0  ;;  %vm1149_vm15 = vcmp.ge.f32.partialorder %v1133_v46, 0.0  ;;  %vm1150_vm1 = vcmp.ge.f32.partialorder %v1134_v18, 0.0  ;;  %vm1151_vm2 = vcmp.ge.f32.partialorder %v1135_v2, 0.0 }
 0x2bb   :  { %v2610_v59 = vmul.f32 %v1095_v36, %v3128_v21  ;;  %v1160_v28 = vmul.f32 0.01, %v1128_v44  ;;  %v1161_v37 = vmul.f32 0.01, %v1129_v16  ;;  %v1162_v4 = vmul.f32 0.01, %v1130_v25 }
 0x2bc   :  { %v2613_v39 = vmul.f32 %v1095_v36, %v3132_v38  ;;  %v1163_v13 = vmul.f32 0.01, %v1131_v10  ;;  %v1164_v30 = vmul.f32 0.01, %v1132_v49  ;;  %v1165_v34 = vmul.f32 0.01, %v1133_v46 }
 0x2bd   :  { %v1166_v7 = vmul.f32 0.01, %v1134_v18  ;;  %v1167_v5 = vmul.f32 0.01, %v1135_v2  ;;  %v1208_v32 = vadd.f32 %v1192_v47, %v2599_v50  ;;  %v1209_v1 = vadd.f32 %v1193_v24, %v2599_v50 }
 0x2be   :  { %v2618_v45 = vsel %vm1144_vm10, %v1128_v44, %v1160_v28  ;;  %v2621_v21 = vsel %vm1145_vm11, %v1129_v16, %v1161_v37  ;;  %v2624_v8 = vsel %vm1146_vm12, %v1130_v25, %v1162_v4  ;;  %v2627_v38 = vsel %vm1147_vm13, %v1131_v10, %v1163_v13 }
 0x2bf   :  { %v2630_v36 = vsel %vm1148_vm14, %v1132_v49, %v1164_v30  ;;  %v2633_v27 = vsel %vm1149_vm15, %v1133_v46, %v1165_v34  ;;  %v1210_v47 = vadd.f32 %v1194_v31, %v2599_v50  ;;  %v1211_v24 = vadd.f32 %v1195_v12, %v2599_v50 }
 0x2c0   :  { %v1212_v62 = vadd.f32 %v1196_v61, %v2599_v50  ;;  %v1213_v23 = vadd.f32 %v1197_v29, %v2599_v50  ;;  %v1214_v35 = vadd.f32 %v1198_v58, %v2599_v50  ;;  %v1215_v26 = vadd.f32 %v1199_v19, %v2599_v50 }
 0x2c1   :  { %vm1224_vm3 = vcmp.ge.f32.partialorder %v1208_v32, 0.0  ;;  %vm1225_vm4 = vcmp.ge.f32.partialorder %v1209_v1, 0.0  ;;  %vm1226_vm5 = vcmp.ge.f32.partialorder %v1210_v47, 0.0  ;;  %vm1227_vm6 = vcmp.ge.f32.partialorder %v1211_v24, 0.0 }
 0x2c2   :  { %vm1228_vm7 = vcmp.ge.f32.partialorder %v1212_v62, 0.0  ;;  %vm1229_vm8 = vcmp.ge.f32.partialorder %v1213_v23, 0.0  ;;  %vm1230_vm9 = vcmp.ge.f32.partialorder %v1214_v35, 0.0  ;;  %vm1231_vm10 = vcmp.ge.f32.partialorder %v1215_v26, 0.0 }
 0x2c3   :  { %v2642_v31 = vsel %vm1150_vm1, %v1134_v18, %v1166_v7  ;;  %v1240_v12 = vmul.f32 0.01, %v1208_v32  ;;  %v1241_v48 = vmul.f32 0.01, %v1209_v1  ;;  %v1242_v61 = vmul.f32 0.01, %v1210_v47 }
 0x2c4   :  { %v2645_v29 = vsel %vm1151_vm2, %v1135_v2, %v1167_v5  ;;  %v1243_v58 = vmul.f32 0.01, %v1211_v24  ;;  %v1244_v44 = vmul.f32 0.01, %v1212_v62  ;;  %v1245_v19 = vmul.f32 0.01, %v1213_v23 }
 0x2c5   :  { %v1246_v16 = vmul.f32 0.01, %v1214_v35  ;;  %v1247_v25 = vmul.f32 0.01, %v1215_v26  ;;  %v1256_v10 = vsel %vm1224_vm3, %v1208_v32, %v1240_v12  ;;  %v1257_v49 = vsel %vm1225_vm4, %v1209_v1, %v1241_v48 }
 0x2c6   :  { %v1258_v46 = vsel %vm1226_vm5, %v1210_v47, %v1242_v61  ;;  %v1259_v18 = vsel %vm1227_vm6, %v1211_v24, %v1243_v58  ;;  %v1260_v28 = vsel %vm1228_vm7, %v1212_v62, %v1244_v44  ;;  %v1261_v37 = vsel %vm1229_vm8, %v1213_v23, %v1245_v19 }
 0x2c7   :  { %v2654_v2 = vsel %vm1230_vm9, %v1214_v35, %v1246_v16  ;;  %v2657_v4 = vsel %vm1231_vm10, %v1215_v26, %v1247_v25  ;;  %v1304_v13 = vadd.f32 %v2558_v9, %v2599_v50  ;;  %v1305_v30 = vadd.f32 %v2561_v54, %v2599_v50 }
 0x2c8   :  { %v1272_v34 = vmax.f32 %v2618_v45, %v1256_v10  ;;  %v1273_v7 = vmax.f32 %v2621_v21, %v1257_v49  ;;  %v1274_v5 = vmax.f32 %v2624_v8, %v1258_v46  ;;  %v1275_v32 = vmax.f32 %v2627_v38, %v1259_v18 }
 0x2c9   :  { %v1276_v1 = vmax.f32 %v2630_v36, %v1260_v28  ;;  %v1277_v47 = vmax.f32 %v2633_v27, %v1261_v37  ;;  %v1306_v24 = vadd.f32 %v2564_v52, %v2599_v50  ;;  %v1307_v9 = vadd.f32 %v2567_v20, %v2599_v50 }
 0x2ca   :  { %v1308_v54 = vadd.f32 %v2570_v11, %v2599_v50  ;;  %v1309_v45 = vadd.f32 %v2573_v56, %v2599_v50  ;;  %v1310_v21 = vadd.f32 %v2576_v6, %v2599_v50  ;;  %v1311_v8 = vadd.f32 %v2579_v42, %v2599_v50 }
 0x2cb   :  { %vm1320_vm11 = vcmp.ge.f32.partialorder %v1304_v13, 0.0  ;;  %vm1321_vm12 = vcmp.ge.f32.partialorder %v1305_v30, 0.0  ;;  %vm1322_vm13 = vcmp.ge.f32.partialorder %v1306_v24, 0.0  ;;  %vm1323_vm14 = vcmp.ge.f32.partialorder %v1307_v9, 0.0 }
 0x2cc   :  { %vm1324_vm15 = vcmp.ge.f32.partialorder %v1308_v54, 0.0  ;;  %vm1325_vm1 = vcmp.ge.f32.partialorder %v1309_v45, 0.0  ;;  %vm1326_vm2 = vcmp.ge.f32.partialorder %v1310_v21, 0.0  ;;  %vm1327_vm3 = vcmp.ge.f32.partialorder %v1311_v8, 0.0 }
 0x2cd   :  { %v1278_v52 = vmax.f32 %v2642_v31, %v2654_v2  ;;  %v1336_v20 = vmul.f32 0.01, %v1304_v13  ;;  %v1337_v11 = vmul.f32 0.01, %v1305_v30  ;;  %v1338_v56 = vmul.f32 0.01, %v1306_v24 }
 0x2ce   :  { %v1279_v6 = vmax.f32 %v2645_v29, %v2657_v4  ;;  %v1339_v38 = vmul.f32 0.01, %v1307_v9  ;;  %v1340_v36 = vmul.f32 0.01, %v1308_v54  ;;  %v1341_v42 = vmul.f32 0.01, %v1309_v45 }
 0x2cf   :  { %v1342_v27 = vmul.f32 0.01, %v1310_v21  ;;  %v1343_v62 = vmul.f32 0.01, %v1311_v8  ;;  %v1400_v23 = vadd.f32 %v2582_v57, %v2599_v50  ;;  %v1401_v35 = vadd.f32 %v2585_v17, %v2599_v50 }
 0x2d0   :  { %v1352_v26 = vsel %vm1320_vm11, %v1304_v13, %v1336_v20  ;;  %v1353_v31 = vsel %vm1321_vm12, %v1305_v30, %v1337_v11  ;;  %v1354_v12 = vsel %vm1322_vm13, %v1306_v24, %v1338_v56  ;;  %v1355_v48 = vsel %vm1323_vm14, %v1307_v9, %v1339_v38 }
 0x2d1   :  { %v1356_v61 = vsel %vm1324_vm15, %v1308_v54, %v1340_v36  ;;  %v1357_v29 = vsel %vm1325_vm1, %v1309_v45, %v1341_v42  ;;  %v1358_v58 = vsel %vm1326_vm2, %v1310_v21, %v1342_v27  ;;  %v1359_v44 = vsel %vm1327_vm3, %v1311_v8, %v1343_v62  ;;  %v3165_v36 = vld [vmem:[#allocation6_spill] sm:$0xff] }
 0x2d2   :  { %v1368_v57 = vmax.f32 %v1272_v34, %v1352_v26  ;;  %v1369_v19 = vmax.f32 %v1273_v7, %v1353_v31  ;;  %v1370_v16 = vmax.f32 %v1274_v5, %v1354_v12  ;;  %v1371_v17 = vmax.f32 %v1275_v32, %v1355_v48  ;;  %v2711_v5 = vpop.permute.xlu0 %1099  ;;  %v3167_v26 = vld [vmem:[#allocation9_spill] sm:$0xff] }
 0x2d3   :  { %v1372_v25 = vmax.f32 %v1276_v1, %v1356_v61  ;;  %v1373_v10 = vmax.f32 %v1277_v47, %v1357_v29  ;;  %v1402_v49 = vadd.f32 %v2588_v0, %v2599_v50  ;;  %v1403_v46 = vadd.f32 %v2591_v3, %v2599_v50  ;;  %v3170_v61 = vld [vmem:[#allocation11_spill] sm:$0xff] }
 0x2d4   :  { %vm1491_vm4 = vcmask 523268   ;;  %v1404_v18 = vadd.f32 %v2594_v33, %v2599_v50  ;;  %v1405_v28 = vadd.f32 %v2597_v53, %v2599_v50  ;;  %v1406_v37 = vadd.f32 %v2610_v59, %v2599_v50 }
 0x2d5   :  { %v1407_v2 = vadd.f32 %v2613_v39, %v2599_v50  ;;  %vm1416_vm5 = vcmp.ge.f32.partialorder %v1400_v23, 0.0  ;;  %vm1417_vm6 = vcmp.ge.f32.partialorder %v1401_v35, 0.0  ;;  %vm1418_vm7 = vcmp.ge.f32.partialorder %v1402_v49, 0.0  ;;  %vm2727_vm13 = vmor %vm1491_vm4, %vm84_vm0 }
 0x2d6   :  { %vm1419_vm8 = vcmp.ge.f32.partialorder %v1403_v46, 0.0  ;;  %vm1420_vm9 = vcmp.ge.f32.partialorder %v1404_v18, 0.0  ;;  %vm1421_vm10 = vcmp.ge.f32.partialorder %v1405_v28, 0.0  ;;  %vm1422_vm11 = vcmp.ge.f32.partialorder %v1406_v37, 0.0 }
 0x2d7   :  { %vm1423_vm12 = vcmp.ge.f32.partialorder %v1407_v2, 0.0  ;;  %v1374_v0 = vmax.f32 %v1278_v52, %v1358_v58  ;;  %v1432_v3 = vmul.f32 0.01, %v1400_v23  ;;  %v1433_v33 = vmul.f32 0.01, %v1401_v35  ;;  %v3171_v58 = vld [vmem:[#allocation13_spill] sm:$0xff] }
 0x2d8   :  { %v1434_v4 = vmul.f32 0.01, %v1402_v49  ;;  %v1375_v13 = vmax.f32 %v1279_v6, %v1359_v44  ;;  %v1435_v53 = vmul.f32 0.01, %v1403_v46  ;;  %v1436_v30 = vmul.f32 0.01, %v1404_v18 }
 0x2d9   :  { %v1437_v34 = vmul.f32 0.01, %v1405_v28  ;;  %v1438_v59 = vmul.f32 0.01, %v1406_v37  ;;  %v1439_v7 = vmul.f32 0.01, %v1407_v2  ;;  %v1448_v50 = vsel %vm1416_vm5, %v1400_v23, %v1432_v3 }
 0x2da   :  { %v1449_v39 = vsel %vm1417_vm6, %v1401_v35, %v1433_v33  ;;  %v1450_v32 = vsel %vm1418_vm7, %v1402_v49, %v1434_v4  ;;  %v1451_v1 = vsel %vm1419_vm8, %v1403_v46, %v1435_v53  ;;  %v1452_v47 = vsel %vm1420_vm9, %v1404_v18, %v1436_v30  ;;  %v3166_v23 = vld [vmem:[#allocation7_spill] sm:$0xff]  ;;  %v3178_v3 = vld [vmem:[#allocation29_spill] sm:$0xff] }
 0x2db   :  { %v1453_v24 = vsel %vm1421_vm10, %v1405_v28, %v1437_v34  ;;  %v1454_v9 = vsel %vm1422_vm11, %v1406_v37, %v1438_v59  ;;  %v1455_v54 = vsel %vm1423_vm12, %v1407_v2, %v1439_v7  ;;  %v1464_v45 = vmax.f32 %v1368_v57, %v1448_v50  ;;  %v3172_v57 = vld [vmem:[#allocation15_spill] sm:$0xff]  ;;  %v3176_v28 = vld [vmem:[#allocation25_spill] sm:$0xff]  ;;  %v3181_v34 = vld [vmem:[#allocation38_spill] sm:$0xff] }
 0x2dc   :  { %v1465_v21 = vmax.f32 %v1369_v19, %v1449_v39  ;;  %v1466_v8 = vmax.f32 %v1370_v16, %v1450_v32  ;;  %v1467_v52 = vmax.f32 %v1371_v17, %v1451_v1  ;;  %v1468_v20 = vmax.f32 %v1372_v25, %v1452_v47  ;;  %v3173_v16 = vld [vmem:[#allocation16_spill] sm:$0xff]  ;;  %v3175_v46 = vld [vmem:[#allocation23_spill] sm:$0xff]  ;;  %v3183_v39 = vld [vmem:[#allocation41_spill] sm:$0xff] }
 0x2dd   :  { %v1469_v11 = vmax.f32 %v1373_v10, %v1453_v24  ;;  %v1470_v56 = vmax.f32 %v1374_v0, %v1454_v9  ;;  %v1471_v6 = vmax.f32 %v1375_v13, %v1455_v54  ;;  %v1110_v42 = vmul.f32 %v2711_v5, %v3165_v36  ;;  %v3174_v10 = vld [vmem:[#allocation22_spill] sm:$0xff]  ;;  %v3177_v2 = vld [vmem:[#allocation27_spill] sm:$0xff]  ;;  %v3180_v13 = vld [vmem:[#allocation32_spill] sm:$0xff]  ;;  %v2795_v54 = vpop.permute.xlu0 %1125 }
 0x2de   :  { %v1480_v38 = vpack.c.bf16 %v1465_v21, %v1464_v45  ;;  %v1481_v27 = vpack.c.bf16 %v1467_v52, %v1466_v8  ;;  %v1111_v35 = vmul.f32 %v2711_v5, %v3166_v23  ;;  %v1112_v31 = vmul.f32 %v2711_v5, %v3167_v26  ;;  %v3182_v7 = vld [vmem:[#allocation39_spill] sm:$0xff]  ;;  %v3185_v24 = vld [vmem:[#allocation45_spill] sm:$0xff]  ;;  %v3186_v8 = vld [vmem:[#allocation54_spill] sm:$0xff] }
 0x2df   :  { %v1482_v62 = vpack.c.bf16 %v1469_v11, %v1468_v20  ;;  %v1483_v48 = vpack.c.bf16 %v1471_v6, %v1470_v56  ;;  %v1113_v29 = vmul.f32 %v2711_v5, %v3170_v61  ;;  %v1114_v44 = vmul.f32 %v2711_v5, %v3171_v58  ;;  %v3184_v1 = vld [vmem:[#allocation43_spill] sm:$0xff] }
 0x2e0   :  { %1488 = vst [vmem:[%s2966_s5] sm:$0xff] %v1480_v38  ;;  %v1115_v19 = vmul.f32 %v2711_v5, %v3172_v57  ;;  %v1116_v17 = vmul.f32 %v2711_v5, %v3173_v16  ;;  %v1117_v25 = vmul.f32 %v2711_v5, %v3122_v15  ;;  %v1200_v49 = vmul.f32 %v2711_v5, %v3174_v10  ;;  %v3179_v15 = vld [vmem:[#allocation31_spill] sm:$0xff] }
 0x2e1   :  { %1489 = vst [vmem:[%s2966_s5 + $0x8] sm:$0xff] %v1481_v27  ;;  %v1201_v18 = vmul.f32 %v2711_v5, %v3175_v46  ;;  %v1202_v37 = vmul.f32 %v2711_v5, %v3176_v28  ;;  %v1203_v0 = vmul.f32 %v2711_v5, %v3177_v2  ;;  %v1204_v33 = vmul.f32 %v2711_v5, %v3178_v3  ;;  %v3187_v20 = vld [vmem:[#allocation55_spill] sm:$0xff] }
 0x2e2   :  { %1490 = vst [vmem:[%s2966_s5 + $0x10] sm:$0xff] %v1482_v62  ;;  %v1205_v4 = vmul.f32 %v2711_v5, %v3179_v15  ;;  %v1206_v53 = vmul.f32 %v2711_v5, %v3180_v13  ;;  %v1207_v30 = vmul.f32 %v2711_v5, %v3124_v40  ;;  %v2773_v59 = vmul.f32 %v2711_v5, %v3181_v34 }
 0x2e3   :  { %1493 = vst.msk [vmem:[%s2966_s5 + $0x18] sm:$0xff] %vm2727_vm13, %v1483_v48  ;;  %v2777_v50 = vmul.f32 %v2711_v5, %v3182_v7  ;;  %v2781_v32 = vmul.f32 %v2711_v5, %v3183_v39  ;;  %v2785_v47 = vmul.f32 %v2711_v5, %v3184_v1  ;;  %v2789_v9 = vmul.f32 %v2711_v5, %v3185_v24 }
 0x2e4   :  { %v2793_v40 = vmul.f32 %v2711_v5, %v3125_v60  ;;  %v2799_v45 = vmul.f32 %v2711_v5, %v3130_v22  ;;  %v2803_v21 = vmul.f32 %v2711_v5, %v3133_v51  ;;  %v2807_v52 = vmul.f32 %v2711_v5, %v3186_v8  ;;  %v3188_v60 = vld [vmem:[#allocation57_spill] sm:$0xff] }
 0x2e5   :  { %v2811_v11 = vmul.f32 %v2711_v5, %v3187_v20  ;;  %v2815_v56 = vmul.f32 %v2711_v5, %v3188_v60  ;;  %v2819_v22 = vmul.f32 %v2711_v5, %v3126_v41  ;;  %v2823_v51 = vmul.f32 %v2711_v5, %v3131_v14 }
 0x2e6   :  { %v2827_v6 = vmul.f32 %v2711_v5, %v3134_v43  ;;  %v1136_v38 = vadd.f32 %v2795_v54, %v1110_v42  ;;  %v1137_v36 = vadd.f32 %v2795_v54, %v1111_v35  ;;  %v1138_v27 = vadd.f32 %v2795_v54, %v1112_v31 }
 0x2e7   :  { %v1139_v62 = vadd.f32 %v2795_v54, %v1113_v29  ;;  %v1140_v23 = vadd.f32 %v2795_v54, %v1114_v44  ;;  %v1141_v41 = vadd.f32 %v2795_v54, %v1115_v19  ;;  %v1142_v26 = vadd.f32 %v2795_v54, %v1116_v17 }
 0x2e8   :  { %v1143_v14 = vadd.f32 %v2795_v54, %v1117_v25  ;;  %vm1152_vm0 = vcmp.ge.f32.partialorder %v1136_v38, 0.0  ;;  %vm1153_vm14 = vcmp.ge.f32.partialorder %v1137_v36, 0.0  ;;  %vm1154_vm15 = vcmp.ge.f32.partialorder %v1138_v27, 0.0 }
 0x2e9   :  { %vm1155_vm1 = vcmp.ge.f32.partialorder %v1139_v62, 0.0  ;;  %vm1156_vm2 = vcmp.ge.f32.partialorder %v1140_v23, 0.0  ;;  %vm1157_vm3 = vcmp.ge.f32.partialorder %v1141_v41, 0.0  ;;  %vm1158_vm4 = vcmp.ge.f32.partialorder %v1142_v26, 0.0 }
 0x2ea   :  { %vm1159_vm5 = vcmp.ge.f32.partialorder %v1143_v14, 0.0  ;;  %v2839_v43 = vmul.f32 %v2711_v5, %v3135_v63  ;;  %v1168_v42 = vmul.f32 0.01, %v1136_v38  ;;  %v1169_v35 = vmul.f32 0.01, %v1137_v36 }
 0x2eb   :  { %v1170_v31 = vmul.f32 0.01, %v1138_v27  ;;  %v2843_v48 = vmul.f32 %v2711_v5, %v3136_v55  ;;  %v1171_v61 = vmul.f32 0.01, %v1139_v62  ;;  %v1172_v29 = vmul.f32 0.01, %v1140_v23 }
 0x2ec   :  { %v1173_v58 = vmul.f32 0.01, %v1141_v41  ;;  %v1174_v44 = vmul.f32 0.01, %v1142_v26  ;;  %v1175_v57 = vmul.f32 0.01, %v1143_v14  ;;  %v1216_v19 = vadd.f32 %v1200_v49, %v2795_v54 }
 0x2ed   :  { %v1217_v16 = vadd.f32 %v1201_v18, %v2795_v54  ;;  %v2848_v17 = vsel %vm1152_vm0, %v1136_v38, %v1168_v42  ;;  %v2851_v63 = vsel %vm1153_vm14, %v1137_v36, %v1169_v35  ;;  %v2854_v25 = vsel %vm1154_vm15, %v1138_v27, %v1170_v31 }
 0x2ee   :  { %v2857_v55 = vsel %vm1155_vm1, %v1139_v62, %v1171_v61  ;;  %v2860_v5 = vsel %vm1156_vm2, %v1140_v23, %v1172_v29  ;;  %v2863_v10 = vsel %vm1157_vm3, %v1141_v41, %v1173_v58  ;;  %v1218_v49 = vadd.f32 %v1202_v37, %v2795_v54 }
 0x2ef   :  { %v1219_v46 = vadd.f32 %v1203_v0, %v2795_v54  ;;  %v1220_v18 = vadd.f32 %v1204_v33, %v2795_v54  ;;  %v1221_v28 = vadd.f32 %v1205_v4, %v2795_v54  ;;  %v1222_v2 = vadd.f32 %v1206_v53, %v2795_v54 }
 0x2f0   :  { %v1223_v3 = vadd.f32 %v1207_v30, %v2795_v54  ;;  %vm1232_vm6 = vcmp.ge.f32.partialorder %v1216_v19, 0.0  ;;  %vm1233_vm7 = vcmp.ge.f32.partialorder %v1217_v16, 0.0  ;;  %vm1234_vm8 = vcmp.ge.f32.partialorder %v1218_v49, 0.0 }
 0x2f1   :  { %vm1235_vm9 = vcmp.ge.f32.partialorder %v1219_v46, 0.0  ;;  %vm1236_vm10 = vcmp.ge.f32.partialorder %v1220_v18, 0.0  ;;  %vm1237_vm11 = vcmp.ge.f32.partialorder %v1221_v28, 0.0  ;;  %vm1238_vm12 = vcmp.ge.f32.partialorder %v1222_v2, 0.0 }
 0x2f2   :  { %vm1239_vm0 = vcmp.ge.f32.partialorder %v1223_v3, 0.0  ;;  %v2872_v37 = vsel %vm1158_vm4, %v1142_v26, %v1174_v44  ;;  %v1248_v0 = vmul.f32 0.01, %v1216_v19  ;;  %v1249_v15 = vmul.f32 0.01, %v1217_v16 }
 0x2f3   :  { %v1250_v33 = vmul.f32 0.01, %v1218_v49  ;;  %v2875_v4 = vsel %vm1159_vm5, %v1143_v14, %v1175_v57  ;;  %v1251_v13 = vmul.f32 0.01, %v1219_v46  ;;  %v1252_v53 = vmul.f32 0.01, %v1220_v18 }
 0x2f4   :  { %v1253_v30 = vmul.f32 0.01, %v1221_v28  ;;  %v1254_v34 = vmul.f32 0.01, %v1222_v2  ;;  %v1255_v7 = vmul.f32 0.01, %v1223_v3  ;;  %v1264_v39 = vsel %vm1232_vm6, %v1216_v19, %v1248_v0 }
 0x2f5   :  { %v1265_v1 = vsel %vm1233_vm7, %v1217_v16, %v1249_v15  ;;  %v1266_v24 = vsel %vm1234_vm8, %v1218_v49, %v1250_v33  ;;  %v1267_v8 = vsel %vm1235_vm9, %v1219_v46, %v1251_v13  ;;  %v1268_v20 = vsel %vm1236_vm10, %v1220_v18, %v1252_v53 }
 0x2f6   :  { %v1269_v60 = vsel %vm1237_vm11, %v1221_v28, %v1253_v30  ;;  %v2884_v38 = vsel %vm1238_vm12, %v1222_v2, %v1254_v34  ;;  %v2887_v36 = vsel %vm1239_vm0, %v1223_v3, %v1255_v7  ;;  %v1312_v27 = vadd.f32 %v2773_v59, %v2795_v54 }
 0x2f7   :  { %v1313_v62 = vadd.f32 %v2777_v50, %v2795_v54  ;;  %v1280_v23 = vmax.f32 %v2848_v17, %v1264_v39  ;;  %v1281_v41 = vmax.f32 %v2851_v63, %v1265_v1  ;;  %v1282_v26 = vmax.f32 %v2854_v25, %v1266_v24 }
 0x2f8   :  { %v1283_v14 = vmax.f32 %v2857_v55, %v1267_v8  ;;  %v1284_v42 = vmax.f32 %v2860_v5, %v1268_v20  ;;  %v1285_v35 = vmax.f32 %v2863_v10, %v1269_v60  ;;  %v1314_v31 = vadd.f32 %v2781_v32, %v2795_v54 }
 0x2f9   :  { %v1315_v59 = vadd.f32 %v2785_v47, %v2795_v54  ;;  %v1316_v50 = vadd.f32 %v2789_v9, %v2795_v54  ;;  %v1317_v61 = vadd.f32 %v2793_v40, %v2795_v54  ;;  %v1318_v29 = vadd.f32 %v2799_v45, %v2795_v54 }
 0x2fa   :  { %v1319_v58 = vadd.f32 %v2803_v21, %v2795_v54  ;;  %vm1328_vm14 = vcmp.ge.f32.partialorder %v1312_v27, 0.0  ;;  %vm1329_vm15 = vcmp.ge.f32.partialorder %v1313_v62, 0.0  ;;  %vm1330_vm1 = vcmp.ge.f32.partialorder %v1314_v31, 0.0 }
 0x2fb   :  { %vm1331_vm2 = vcmp.ge.f32.partialorder %v1315_v59, 0.0  ;;  %vm1332_vm3 = vcmp.ge.f32.partialorder %v1316_v50, 0.0  ;;  %vm1333_vm4 = vcmp.ge.f32.partialorder %v1317_v61, 0.0  ;;  %vm1334_vm5 = vcmp.ge.f32.partialorder %v1318_v29, 0.0 }
 0x2fc   :  { %vm1335_vm6 = vcmp.ge.f32.partialorder %v1319_v58, 0.0  ;;  %v1286_v32 = vmax.f32 %v2872_v37, %v2884_v38  ;;  %v1344_v47 = vmul.f32 0.01, %v1312_v27  ;;  %v1345_v9 = vmul.f32 0.01, %v1313_v62 }
 0x2fd   :  { %v1346_v40 = vmul.f32 0.01, %v1314_v31  ;;  %v1287_v45 = vmax.f32 %v2875_v4, %v2887_v36  ;;  %v1347_v44 = vmul.f32 0.01, %v1315_v59  ;;  %v1348_v57 = vmul.f32 0.01, %v1316_v50 }
 0x2fe   :  { %v1349_v21 = vmul.f32 0.01, %v1317_v61  ;;  %v1350_v19 = vmul.f32 0.01, %v1318_v29  ;;  %v1351_v16 = vmul.f32 0.01, %v1319_v58  ;;  %v1408_v17 = vadd.f32 %v2807_v52, %v2795_v54 }
 0x2ff   :  { %v1409_v63 = vadd.f32 %v2811_v11, %v2795_v54  ;;  %v1360_v25 = vsel %vm1328_vm14, %v1312_v27, %v1344_v47  ;;  %v1361_v55 = vsel %vm1329_vm15, %v1313_v62, %v1345_v9  ;;  %v1362_v5 = vsel %vm1330_vm1, %v1314_v31, %v1346_v40 }
 0x300   :  { %v1363_v10 = vsel %vm1331_vm2, %v1315_v59, %v1347_v44  ;;  %v1364_v49 = vsel %vm1332_vm3, %v1316_v50, %v1348_v57  ;;  %v1365_v46 = vsel %vm1333_vm4, %v1317_v61, %v1349_v21  ;;  %v1366_v18 = vsel %vm1334_vm5, %v1318_v29, %v1350_v19 }
 0x301   :  { %v1367_v28 = vsel %vm1335_vm6, %v1319_v58, %v1351_v16  ;;  %v1376_v52 = vmax.f32 %v1280_v23, %v1360_v25  ;;  %v1377_v2 = vmax.f32 %v1281_v41, %v1361_v55  ;;  %v1378_v3 = vmax.f32 %v1282_v26, %v1362_v5 }
 0x302   :  { %v1379_v11 = vmax.f32 %v1283_v14, %v1363_v10  ;;  %v1380_v37 = vmax.f32 %v1284_v42, %v1364_v49  ;;  %v1381_v0 = vmax.f32 %v1285_v35, %v1365_v46  ;;  %v1410_v15 = vadd.f32 %v2815_v56, %v2795_v54 }
 0x303   :  { %v1411_v33 = vadd.f32 %v2819_v22, %v2795_v54  ;;  %v1412_v4 = vadd.f32 %v2823_v51, %v2795_v54  ;;  %v1413_v13 = vadd.f32 %v2827_v6, %v2795_v54  ;;  %v1414_v53 = vadd.f32 %v2839_v43, %v2795_v54 }
 0x304   :  { %v1415_v30 = vadd.f32 %v2843_v48, %v2795_v54  ;;  %vm1424_vm7 = vcmp.ge.f32.partialorder %v1408_v17, 0.0  ;;  %vm1425_vm8 = vcmp.ge.f32.partialorder %v1409_v63, 0.0  ;;  %vm1426_vm9 = vcmp.ge.f32.partialorder %v1410_v15, 0.0 }
 0x305   :  { %vm1427_vm10 = vcmp.ge.f32.partialorder %v1411_v33, 0.0  ;;  %vm1428_vm11 = vcmp.ge.f32.partialorder %v1412_v4, 0.0  ;;  %vm1429_vm12 = vcmp.ge.f32.partialorder %v1413_v13, 0.0  ;;  %vm1430_vm0 = vcmp.ge.f32.partialorder %v1414_v53, 0.0 }
 0x306   :  { %vm1431_vm14 = vcmp.ge.f32.partialorder %v1415_v30, 0.0  ;;  %v1382_v56 = vmax.f32 %v1286_v32, %v1366_v18  ;;  %v1440_v22 = vmul.f32 0.01, %v1408_v17  ;;  %v1441_v51 = vmul.f32 0.01, %v1409_v63 }
 0x307   :  { %v1442_v34 = vmul.f32 0.01, %v1410_v15  ;;  %v1383_v7 = vmax.f32 %v1287_v45, %v1367_v28  ;;  %v1443_v6 = vmul.f32 0.01, %v1411_v33  ;;  %v1444_v39 = vmul.f32 0.01, %v1412_v4 }
 0x308   :  { %v1445_v1 = vmul.f32 0.01, %v1413_v13  ;;  %v1446_v43 = vmul.f32 0.01, %v1414_v53  ;;  %v1447_v24 = vmul.f32 0.01, %v1415_v30  ;;  %v1456_v54 = vsel %vm1424_vm7, %v1408_v17, %v1440_v22 }
 0x309   :  { %v1457_v48 = vsel %vm1425_vm8, %v1409_v63, %v1441_v51  ;;  %v1458_v8 = vsel %vm1426_vm9, %v1410_v15, %v1442_v34  ;;  %v1459_v20 = vsel %vm1427_vm10, %v1411_v33, %v1443_v6  ;;  %v1460_v60 = vsel %vm1428_vm11, %v1412_v4, %v1444_v39 }
 0x30a   :  { %v1461_v38 = vsel %vm1429_vm12, %v1413_v13, %v1445_v1  ;;  %v1462_v36 = vsel %vm1430_vm0, %v1414_v53, %v1446_v43  ;;  %v1463_v27 = vsel %vm1431_vm14, %v1415_v30, %v1447_v24  ;;  %v1472_v62 = vmax.f32 %v1376_v52, %v1456_v54 }
 0x30b   :  { %v1473_v23 = vmax.f32 %v1377_v2, %v1457_v48  ;;  %v1474_v41 = vmax.f32 %v1378_v3, %v1458_v8  ;;  %v1475_v26 = vmax.f32 %v1379_v11, %v1459_v20  ;;  %v1476_v14 = vmax.f32 %v1380_v37, %v1460_v60 }
 0x30c   :  { %v1477_v42 = vmax.f32 %v1381_v0, %v1461_v38  ;;  %v1478_v35 = vmax.f32 %v1382_v56, %v1462_v36  ;;  %v1479_v31 = vmax.f32 %v1383_v7, %v1463_v27 }
 0x30d   :  { %v1484_v59 = vpack.c.bf16 %v1473_v23, %v1472_v62  ;;  %v1485_v50 = vpack.c.bf16 %v1475_v26, %v1474_v41 }
 0x30e   :  { %v1486_v61 = vpack.c.bf16 %v1477_v42, %v1476_v14  ;;  %v1487_v29 = vpack.c.bf16 %v1479_v31, %v1478_v35 }
 0x30f   :  { %1494 = vst [vmem:[%s2966_s5 + $0x20] sm:$0xff] %v1484_v59 }
 0x310   :  { %1495 = vst [vmem:[%s2966_s5 + $0x28] sm:$0xff] %v1485_v50 }
 0x311   :  { %1496 = vst [vmem:[%s2966_s5 + $0x30] sm:$0xff] %v1486_v61 }
 0x312   :  { %1497 = vst.msk [vmem:[%s2966_s5 + $0x38] sm:$0xff] %vm2727_vm13, %v1487_v29 }

// kernel: audio_magic_net_forward.5
= control target key start
LH: loop header
LB: loop body
LE: loop exit
PB: predicated region body
PF: predicated region fallthrough
CT: control target
= control target key end

     0   :  { %vm175_vm0 = vcmask 130048   ;;  %vm258_vm1 = vcmask 916480   ;;  %vm1330_vm14 = vcmask 1043456   ;;  %vm1331_vm15 = vcmask 916484   ;;  %s2711_s0 = inlined_call_operand.vmem [shape: bf16[4,144,240], index: 0, kind: input, shape index: {}]   ;;  %s2712_s1 = inlined_call_operand.vmem [shape: bf16[32,144], index: 1, kind: input, shape index: {}]   ;;  %s2713_s2 = inlined_call_operand.vmem [shape: f32[32,1], index: 2, kind: input, shape index: {}]   ;;  %s2714_s3 = inlined_call_operand.vmem [shape: f32[32,1], index: 3, kind: input, shape index: {}]   ;;  %s2715_s4 = inlined_call_operand.vmem [shape: f32[32,1], index: 4, kind: input, shape index: {}]   ;;  %s2716_s5 = inlined_call_operand.vmem [shape: bf16[32,240], index: 5, kind: output, shape index: {}]  }
   0x1   :  { %v1415_v0 = vld [vmem:[%s2711_s0 + $0x70] sm:$0xf]  ;;  %v1734_v1 = vld [vmem:[%s2711_s0 + $0x74] sm:$0xf0]  ;;  %v1423_v2 = vld [vmem:[%s2711_s0 + $0x80] sm:$0xf] }
   0x2   :  { %v1416_v3 = vor.u32 %v1734_v1, %v1415_v0  ;;  %v1736_v4 = vld [vmem:[%s2711_s0 + $0x84] sm:$0xf0]  ;;  %v1733_v5 = vld [vmem:[%s2711_s0 + $0x74] sm:$0xf]  ;;  %v1417_v6 = vld [vmem:[%s2711_s0 + $0x78] sm:$0xf0] }
   0x3   :  { %v1424_v7 = vor.u32 %v1736_v4, %v1423_v2  ;;  %v1420_v8 = vor.u32 %v1733_v5, %v1417_v6  ;;  %v1735_v9 = vld [vmem:[%s2711_s0 + $0x84] sm:$0xf]  ;;  %v1425_v10 = vld [vmem:[%s2711_s0 + $0x88] sm:$0xf0]  ;;  %v1407_v14 = vld [vmem:[%s2711_s0 + $0x60] sm:$0xf] }
   0x4   :  { %v1715_v11 = vld [vmem:[%s2712_s1 + $0x4] sm:$0xf]  ;;  %182 = vmatpush.bf16.msra.mxu0 %v1416_v3  ;;  %v1428_v12 = vor.u32 %v1735_v9, %v1425_v10  ;;  %v1345_v13 = vld [vmem:[%s2712_s1 + $0x8] sm:$0xf0]  ;;  %v1732_v15 = vld [vmem:[%s2711_s0 + $0x64] sm:$0xf0] }
   0x5   :  { %208 = vmatpush.bf16.msra.mxu1 %v1424_v7  ;;  %220 = vmatpush.bf16.msra.mxu2 %v1420_v8  ;;  %v1879_v16 = vor.u32 %v1715_v11, %v1345_v13  ;;  %v1408_v17 = vor.u32 %v1732_v15, %v1407_v14  ;;  %v1731_v18 = vld [vmem:[%s2711_s0 + $0x64] sm:$0xf]  ;;  %v1409_v19 = vld [vmem:[%s2711_s0 + $0x68] sm:$0xf0]  ;;  %v1509_v20 = vld [vmem:[%s2711_s0 + $0x100] sm:$0xf] }
   0x6   :  { %246 = vmatpush.bf16.msra.mxu3 %v1428_v12  ;;  %v1412_v21 = vor.u32 %v1731_v18, %v1409_v19  ;;  %v1752_v22 = vld [vmem:[%s2711_s0 + $0x104] sm:$0xf0]  ;;  %v1399_v23 = vld [vmem:[%s2711_s0 + $0x50] sm:$0xf]  ;;  %v1730_v24 = vld [vmem:[%s2711_s0 + $0x54] sm:$0xf0] }
   0x7   :  { %v1510_v25 = vor.u32 %v1752_v22, %v1509_v20  ;;  %v1729_v26 = vld [vmem:[%s2711_s0 + $0x54] sm:$0xf]  ;;  %v1401_v27 = vld [vmem:[%s2711_s0 + $0x58] sm:$0xf0]  ;;  %v1501_v28 = vld [vmem:[%s2711_s0 + $0xf0] sm:$0xf]  ;;  %v1400_v29 = vor.u32 %v1730_v24, %v1399_v23 }
   0x8   :  { %1429 = vmatmul.msk.bf16.vlgmr.msra.gmra.mxu1 %vm175_vm0, %v1879_v16  ;;  %183 = vmatpush.bf16.msra.mxu0 %v1408_v17  ;;  %v1750_v30 = vld [vmem:[%s2711_s0 + $0xf4] sm:$0xf0]  ;;  %v1404_v31 = vor.u32 %v1729_v26, %v1401_v27  ;;  %v1391_v32 = vld [vmem:[%s2711_s0 + $0x40] sm:$0xf]  ;;  %v1728_v33 = vld [vmem:[%s2711_s0 + $0x44] sm:$0xf0] }
   0x9   :  { %1431 = vmatmul.msk.bf16.vlgmr.msra.gmra.mxu3 %vm175_vm0, %v1879_v16  ;;  %221 = vmatpush.bf16.msra.mxu2 %v1412_v21  ;;  %v1727_v34 = vld [vmem:[%s2711_s0 + $0x44] sm:$0xf]  ;;  %v1502_v35 = vor.u32 %v1750_v30, %v1501_v28  ;;  %v1393_v36 = vld [vmem:[%s2711_s0 + $0x48] sm:$0xf0]  ;;  %v1517_v37 = vld [vmem:[%s2711_s0 + $0x110] sm:$0xf]  ;;  %v1392_v42 = vor.u32 %v1728_v33, %v1391_v32 }
   0xa   :  { %384 = vmatpush.bf16.msrb.mxu1 %v1510_v25  ;;  %v1754_v38 = vld [vmem:[%s2711_s0 + $0x114] sm:$0xf0]  ;;  %v1493_v39 = vld [vmem:[%s2711_s0 + $0xe0] sm:$0xf]  ;;  %v1748_v40 = vld [vmem:[%s2711_s0 + $0xe4] sm:$0xf0]  ;;  %v1396_v43 = vor.u32 %v1727_v34, %v1393_v36 }
   0xb   :  { %v1518_v41 = vor.u32 %v1754_v38, %v1517_v37  ;;  %v1383_v44 = vld [vmem:[%s2711_s0 + $0x30] sm:$0xf]  ;;  %v1726_v45 = vld [vmem:[%s2711_s0 + $0x34] sm:$0xf0]  ;;  %v1494_v46 = vor.u32 %v1748_v40, %v1493_v39  ;;  %v1725_v47 = vld [vmem:[%s2711_s0 + $0x34] sm:$0xf] }
   0xc   :  { %184 = vmatpush.bf16.msra.mxu0 %v1400_v29  ;;  %v1385_v48 = vld [vmem:[%s2711_s0 + $0x38] sm:$0xf0]  ;;  %v1485_v49 = vld [vmem:[%s2711_s0 + $0xd0] sm:$0xf]  ;;  %v1746_v50 = vld [vmem:[%s2711_s0 + $0xd4] sm:$0xf0]  ;;  %v1384_v51 = vor.u32 %v1726_v45, %v1383_v44 }
   0xd   :  { %222 = vmatpush.bf16.msra.mxu2 %v1404_v31  ;;  %410 = vmatpush.bf16.msrb.mxu3 %v1518_v41  ;;  %v1717_v52 = vld [vmem:[%s2712_s1 + $0x14] sm:$0xf]  ;;  %v1388_v53 = vor.u32 %v1725_v47, %v1385_v48  ;;  %v1353_v54 = vld [vmem:[%s2712_s1 + $0x18] sm:$0xf0]  ;;  %v1375_v55 = vld [vmem:[%s2711_s0 + $0x20] sm:$0xf]  ;;  %v1486_v57 = vor.u32 %v1746_v50, %v1485_v49 }
   0xe   :  { %385 = vmatpush.bf16.msrb.mxu1 %v1502_v35  ;;  %v1724_v56 = vld [vmem:[%s2711_s0 + $0x24] sm:$0xf0]  ;;  %v1723_v58 = vld [vmem:[%s2711_s0 + $0x24] sm:$0xf]  ;;  %v1377_v59 = vld [vmem:[%s2711_s0 + $0x28] sm:$0xf0]  ;;  %v1981_v62 = vor.u32 %v1717_v52, %v1353_v54 }
   0xf   :  { %v1477_v60 = vld [vmem:[%s2711_s0 + $0xc0] sm:$0xf]  ;;  %v1744_v61 = vld [vmem:[%s2711_s0 + $0xc4] sm:$0xf0]  ;;  %v1376_v63 = vor.u32 %v1724_v56, %v1375_v55  ;;  %v1380_v0 = vor.u32 %v1723_v58, %v1377_v59  ;;  %v1367_v1 = vld [vmem:[%s2711_s0 + $0x10] sm:$0xf] }
  0x10   :  { %185 = vmatpush.bf16.msra.mxu0 %v1392_v42  ;;  %v1722_v2 = vld [vmem:[%s2711_s0 + $0x14] sm:$0xf0]  ;;  %v1478_v3 = vor.u32 %v1744_v61, %v1477_v60  ;;  %v1721_v4 = vld [vmem:[%s2711_s0 + $0x14] sm:$0xf]  ;;  %v1369_v5 = vld [vmem:[%s2711_s0 + $0x18] sm:$0xf0] }
  0x11   :  { %223 = vmatpush.bf16.msra.mxu2 %v1396_v43  ;;  %v1469_v6 = vld [vmem:[%s2711_s0 + $0xb0] sm:$0xf]  ;;  %v1742_v7 = vld [vmem:[%s2711_s0 + $0xb4] sm:$0xf0]  ;;  %v1368_v8 = vor.u32 %v1722_v2, %v1367_v1  ;;  %v1359_v9 = vld [vmem:[%s2711_s0] sm:$0xf]  ;;  %v1372_v12 = vor.u32 %v1721_v4, %v1369_v5 }
  0x12   :  { %386 = vmatpush.bf16.msrb.mxu1 %v1494_v46  ;;  %v1720_v10 = vld [vmem:[%s2711_s0 + $0x4] sm:$0xf0]  ;;  %v43_v11 = vld [vmem:[%s2713_s2] sm:$0xff]  ;;  %v1753_v14 = vld [vmem:[%s2711_s0 + $0x114] sm:$0xf]  ;;  %v1470_v17 = vor.u32 %v1742_v7, %v1469_v6  ;;  %v1812_v21 = vmov 0  }
  0x13   :  { %v1719_v13 = vld [vmem:[%s2711_s0 + $0x4] sm:$0xf]  ;;  %v1519_v15 = vld [vmem:[%s2711_s0 + $0x118] sm:$0xf0]  ;;  %v1361_v18 = vld [vmem:[%s2711_s0 + $0x8] sm:$0xf0]  ;;  %1801 = vset.pattern.permute.xlu0 %v1812_v21  ;;  %1802 = vset.pattern.permute.xlu1 %v1812_v21  ;;  %v1360_v25 = vor.u32 %v1720_v10, %v1359_v9 }
  0x14   :  { %186 = vmatpush.bf16.msra.mxu0 %v1384_v51  ;;  %v1751_v19 = vld [vmem:[%s2711_s0 + $0x104] sm:$0xf]  ;;  %v1511_v20 = vld [vmem:[%s2711_s0 + $0x108] sm:$0xf0]  ;;  %v1522_v22 = vor.u32 %v1753_v14, %v1519_v15  ;;  %v1461_v23 = vld [vmem:[%s2711_s0 + $0xa0] sm:$0xf]  ;;  %49 = vperm.xlu0 %1801, %v43_v11   ;;  %v1364_v28 = vor.u32 %v1719_v13, %v1361_v18 }
  0x15   :  { %224 = vmatpush.bf16.msra.mxu2 %v1388_v53  ;;  %v1740_v24 = vld [vmem:[%s2711_s0 + $0xa4] sm:$0xf0]  ;;  %v1343_v26 = vld [vmem:[%s2712_s1] sm:$0xf]  ;;  %v1514_v29 = vor.u32 %v1751_v19, %v1511_v20  ;;  %1803 = vset.pattern.permute.xlu2 %v1812_v21  ;;  %v1749_v31 = vld [vmem:[%s2711_s0 + $0xf4] sm:$0xf] }
  0x16   :  { %387 = vmatpush.bf16.msrb.mxu1 %v1486_v57  ;;  %v1716_v27 = vld [vmem:[%s2712_s1 + $0x4] sm:$0xf0]  ;;  %1791 = vmatpush.bf16.msra.mxu3 %v1522_v22  ;;  %v1462_v30 = vor.u32 %v1740_v24, %v1461_v23  ;;  %v1503_v32 = vld [vmem:[%s2711_s0 + $0xf8] sm:$0xf0]  ;;  %v1453_v34 = vld [vmem:[%s2711_s0 + $0x90] sm:$0xf] }
  0x17   :  { %v2050_v33 = vor.u32 %v1716_v27, %v1343_v26  ;;  %v1738_v35 = vld [vmem:[%s2711_s0 + $0x94] sm:$0xf0]  ;;  %v45_v36 = vld [vmem:[%s2713_s2 + $0x10] sm:$0xff]  ;;  %v44_v39 = vld [vmem:[%s2713_s2 + $0x8] sm:$0xff]  ;;  %v1506_v40 = vor.u32 %v1749_v31, %v1503_v32 }
  0x18   :  { %1430 = vmatmul.msk.bf16.gmra.mxu1 %vm175_vm0, %v1981_v62  ;;  %187 = vmatpush.bf16.msra.mxu0 %v1376_v63  ;;  %v1603_v37 = vld [vmem:[%s2711_s0 + $0x190] sm:$0xf]  ;;  %v1770_v38 = vld [vmem:[%s2711_s0 + $0x194] sm:$0xf0]  ;;  %v1454_v41 = vor.u32 %v1738_v35, %v1453_v34  ;;  %v1747_v43 = vld [vmem:[%s2711_s0 + $0xe4] sm:$0xf] }
  0x19   :  { %1432 = vmatmul.msk.bf16.gmra.mxu3 %vm175_vm0, %v1981_v62  ;;  %225 = vmatpush.bf16.msra.mxu2 %v1380_v0  ;;  %v1604_v42 = vor.u32 %v1770_v38, %v1603_v37  ;;  %v1495_v44 = vld [vmem:[%s2711_s0 + $0xe8] sm:$0xf0]  ;;  %v1595_v45 = vld [vmem:[%s2711_s0 + $0x180] sm:$0xf]  ;;  %v1768_v46 = vld [vmem:[%s2711_s0 + $0x184] sm:$0xf0] }
  0x1a   :  { %388 = vmatpush.bf16.msrb.mxu1 %v1478_v3  ;;  %59 = vperm.xlu1 %1802, %v45_v36   ;;  %v46_v47 = vld [vmem:[%s2713_s2 + $0x18] sm:$0xff]  ;;  %v1498_v48 = vor.u32 %v1747_v43, %v1495_v44  ;;  %v1596_v49 = vor.u32 %v1768_v46, %v1595_v45  ;;  %v1745_v50 = vld [vmem:[%s2711_s0 + $0xd4] sm:$0xf]  ;;  %v1587_v52 = vld [vmem:[%s2711_s0 + $0x170] sm:$0xf] }
  0x1b   :  { %v1487_v51 = vld [vmem:[%s2711_s0 + $0xd8] sm:$0xf0]  ;;  %v1766_v53 = vld [vmem:[%s2711_s0 + $0x174] sm:$0xf0]  ;;  %v1351_v55 = vld [vmem:[%s2712_s1 + $0x10] sm:$0xf] }
  0x1c   :  { %188 = vmatpush.bf16.msra.mxu0 %v1368_v8  ;;  %54 = vperm.xlu0 %1801, %v44_v39   ;;  %v1490_v54 = vor.u32 %v1745_v50, %v1487_v51  ;;  %v1718_v56 = vld [vmem:[%s2712_s1 + $0x14] sm:$0xf0]  ;;  %v1743_v57 = vld [vmem:[%s2711_s0 + $0xc4] sm:$0xf]  ;;  %v1588_v58 = vor.u32 %v1766_v53, %v1587_v52  ;;  %v1479_v59 = vld [vmem:[%s2711_s0 + $0xc8] sm:$0xf0] }
  0x1d   :  { %226 = vmatpush.bf16.msra.mxu2 %v1372_v12  ;;  %v1579_v60 = vld [vmem:[%s2711_s0 + $0x160] sm:$0xf]  ;;  %v1764_v61 = vld [vmem:[%s2711_s0 + $0x164] sm:$0xf0]  ;;  %v1771_v63 = vld [vmem:[%s2711_s0 + $0x1a4] sm:$0xf]  ;;  %v1482_v4 = vor.u32 %v1743_v57, %v1479_v59  ;;  %v2132_v6 = vor.u32 %v1718_v56, %v1351_v55 }
  0x1e   :  { %389 = vmatpush.bf16.msrb.mxu1 %v1470_v17  ;;  %v1613_v0 = vld [vmem:[%s2711_s0 + $0x1a8] sm:$0xf0]  ;;  %v1611_v1 = vld [vmem:[%s2711_s0 + $0x1a0] sm:$0xf]  ;;  %v1772_v3 = vld [vmem:[%s2711_s0 + $0x1a4] sm:$0xf0]  ;;  %v1580_v7 = vor.u32 %v1764_v61, %v1579_v60 }
  0x1f   :  { %v1616_v2 = vor.u32 %v1771_v63, %v1613_v0  ;;  %v1612_v5 = vor.u32 %v1772_v3, %v1611_v1  ;;  %v1741_v8 = vld [vmem:[%s2711_s0 + $0xb4] sm:$0xf]  ;;  %v1471_v9 = vld [vmem:[%s2711_s0 + $0xb8] sm:$0xf0]  ;;  %v1571_v10 = vld [vmem:[%s2711_s0 + $0x150] sm:$0xf] }
  0x20   :  { %189 = vmatpush.bf16.msra.mxu0 %v1360_v25  ;;  %v1762_v11 = vld [vmem:[%s2711_s0 + $0x154] sm:$0xf0]  ;;  %v1474_v12 = vor.u32 %v1741_v8, %v1471_v9  ;;  %v1739_v14 = vld [vmem:[%s2711_s0 + $0xa4] sm:$0xf]  ;;  %v1463_v15 = vld [vmem:[%s2711_s0 + $0xa8] sm:$0xf0] }
  0x21   :  { %227 = vmatpush.bf16.msra.mxu2 %v1364_v28  ;;  %v1572_v13 = vor.u32 %v1762_v11, %v1571_v10  ;;  %v1563_v17 = vld [vmem:[%s2711_s0 + $0x140] sm:$0xf]  ;;  %v1760_v18 = vld [vmem:[%s2711_s0 + $0x144] sm:$0xf0]  ;;  %v1466_v19 = vor.u32 %v1739_v14, %v1463_v15  ;;  %v1737_v21 = vld [vmem:[%s2711_s0 + $0x94] sm:$0xf] }
  0x22   :  { %390 = vmatpush.bf16.msrb.mxu1 %v1462_v30  ;;  %64 = vperm.xlu1 %1802, %v46_v47   ;;  %v1564_v20 = vor.u32 %v1760_v18, %v1563_v17  ;;  %v1555_v23 = vld [vmem:[%s2711_s0 + $0x130] sm:$0xf]  ;;  %v1758_v24 = vld [vmem:[%s2711_s0 + $0x134] sm:$0xf0]  ;;  %v1769_v25 = vld [vmem:[%s2711_s0 + $0x194] sm:$0xf] }
  0x23   :  { %190 = vmatmul.bf16.vlgmr.msra.gmra.mxu0 %v2050_v33  ;;  %v1605_v26 = vld [vmem:[%s2711_s0 + $0x198] sm:$0xf0]  ;;  %v1556_v28 = vor.u32 %v1758_v24, %v1555_v23  ;;  %v1547_v30 = vld [vmem:[%s2711_s0 + $0x120] sm:$0xf]  ;;  %v1756_v31 = vld [vmem:[%s2711_s0 + $0x124] sm:$0xf0] }
  0x24   :  { %422 = vmatpush.bf16.msrb.mxu0 %v1514_v29  ;;  %228 = vmatmul.bf16.vlgmr.msra.gmra.mxu2 %v2050_v33  ;;  %v1608_v29 = vor.u32 %v1769_v25, %v1605_v26  ;;  %v1767_v32 = vld [vmem:[%s2711_s0 + $0x184] sm:$0xf]  ;;  %v1597_v34 = vld [vmem:[%s2711_s0 + $0x188] sm:$0xf0]  ;;  %v1697_v35 = vld [vmem:[%s2711_s0 + $0x220] sm:$0xf]  ;;  %v1548_v39 = vor.u32 %v1756_v31, %v1547_v30 }
  0x25   :  { %448 = vmatpush.bf16.msrb.mxu2 %v1522_v22  ;;  %v1455_v22 = vld [vmem:[%s2711_s0 + $0x98] sm:$0xf0]  ;;  %v1788_v36 = vld [vmem:[%s2711_s0 + $0x224] sm:$0xf0]  ;;  %v1789_v37 = vld [vmem:[%s2711_s0 + $0x234] sm:$0xf] }
  0x26   :  { %391 = vmatpush.bf16.msrb.mxu1 %v1454_v41  ;;  %v1458_v27 = vor.u32 %v1737_v21, %v1455_v22  ;;  %v1707_v38 = vld [vmem:[%s2711_s0 + $0x238] sm:$0xf0]  ;;  %v1698_v41 = vor.u32 %v1788_v36, %v1697_v35  ;;  %v1689_v45 = vld [vmem:[%s2711_s0 + $0x210] sm:$0xf]  ;;  %v1786_v46 = vld [vmem:[%s2711_s0 + $0x214] sm:$0xf0] }
  0x27   :  { %v1589_v43 = vld [vmem:[%s2711_s0 + $0x178] sm:$0xf0]  ;;  %v1710_v44 = vor.u32 %v1789_v37, %v1707_v38  ;;  %v1705_v47 = vld [vmem:[%s2711_s0 + $0x230] sm:$0xf]  ;;  %v1763_v50 = vld [vmem:[%s2711_s0 + $0x164] sm:$0xf]  ;;  %v1690_v52 = vor.u32 %v1786_v46, %v1689_v45 }
  0x28   :  { %423 = vmatpush.bf16.msrb.mxu0 %v1506_v40  ;;  %v1600_v40 = vor.u32 %v1767_v32, %v1597_v34  ;;  %v1581_v51 = vld [vmem:[%s2711_s0 + $0x168] sm:$0xf0]  ;;  %v1784_v55 = vld [vmem:[%s2711_s0 + $0x204] sm:$0xf0]  ;;  %v1761_v57 = vld [vmem:[%s2711_s0 + $0x154] sm:$0xf] }
  0x29   :  { %392 = vmatmul.bf16.vlgmr.msrb.gmra.mxu1 %v2050_v33  ;;  %1523 = vmatmul.msk.bf16.vlgmr.msrb.gmra.mxu3 %vm175_vm0, %v1879_v16  ;;  %v1584_v56 = vor.u32 %v1763_v50, %v1581_v51  ;;  %v1673_v60 = vld [vmem:[%s2711_s0 + $0x1f0] sm:$0xf]  ;;  %v1782_v61 = vld [vmem:[%s2711_s0 + $0x1f4] sm:$0xf0]  ;;  %v1759_v0 = vld [vmem:[%s2711_s0 + $0x144] sm:$0xf] }
  0x2a   :  { %589 = vmatpush.bf16.msra.mxu1 %v1604_v42  ;;  %653 = vmatpush.bf16.msra.mxu2 %v1616_v2  ;;  %v1765_v42 = vld [vmem:[%s2711_s0 + $0x174] sm:$0xf]  ;;  %v1565_v1 = vld [vmem:[%s2711_s0 + $0x148] sm:$0xf0]  ;;  %v1674_v2 = vor.u32 %v1782_v61, %v1673_v60  ;;  %v1665_v3 = vld [vmem:[%s2711_s0 + $0x1e0] sm:$0xf] }
  0x2b   :  { %615 = vmatpush.bf16.msrb.mxu3 %v1612_v5  ;;  %v1568_v5 = vor.u32 %v1759_v0, %v1565_v1  ;;  %v1557_v8 = vld [vmem:[%s2711_s0 + $0x138] sm:$0xf0]  ;;  %v1657_v10 = vld [vmem:[%s2711_s0 + $0x1d0] sm:$0xf]  ;;  %v1778_v11 = vld [vmem:[%s2711_s0 + $0x1d4] sm:$0xf0] }
  0x2c   :  { %424 = vmatpush.bf16.msrb.mxu0 %v1498_v48  ;;  %v1790_v48 = vld [vmem:[%s2711_s0 + $0x234] sm:$0xf0]  ;;  %v1549_v14 = vld [vmem:[%s2711_s0 + $0x128] sm:$0xf0]  ;;  %v1658_v15 = vor.u32 %v1778_v11, %v1657_v10  ;;  %v1787_v17 = vld [vmem:[%s2711_s0 + $0x224] sm:$0xf] }
  0x2d   :  { %v1706_v53 = vor.u32 %v1790_v48, %v1705_v47  ;;  %v1699_v18 = vld [vmem:[%s2711_s0 + $0x228] sm:$0xf0]  ;;  %v1785_v24 = vld [vmem:[%s2711_s0 + $0x214] sm:$0xf]  ;;  %v1691_v25 = vld [vmem:[%s2711_s0 + $0x218] sm:$0xf0] }
  0x2e   :  { %590 = vmatpush.bf16.msra.mxu1 %v1596_v49  ;;  %v1592_v49 = vor.u32 %v1765_v42, %v1589_v43  ;;  %v1702_v22 = vor.u32 %v1787_v17, %v1699_v18  ;;  %v1641_v26 = vld [vmem:[%s2711_s0 + $0x1b0] sm:$0xf]  ;;  %v1783_v30 = vld [vmem:[%s2711_s0 + $0x204] sm:$0xf]  ;;  %v1683_v31 = vld [vmem:[%s2711_s0 + $0x208] sm:$0xf0] }
  0x2f   :  { %v1686_v32 = vor.u32 %v1783_v30, %v1683_v31  ;;  %v1781_v34 = vld [vmem:[%s2711_s0 + $0x1f4] sm:$0xf]  ;;  %v1675_v35 = vld [vmem:[%s2711_s0 + $0x1f8] sm:$0xf0]  ;;  %v1779_v37 = vld [vmem:[%s2711_s0 + $0x1e4] sm:$0xf] }
  0x30   :  { %425 = vmatpush.bf16.msrb.mxu0 %v1490_v54  ;;  %v1681_v54 = vld [vmem:[%s2711_s0 + $0x200] sm:$0xf]  ;;  %v1678_v36 = vor.u32 %v1781_v34, %v1675_v35  ;;  %v1667_v38 = vld [vmem:[%s2711_s0 + $0x1e8] sm:$0xf0]  ;;  %v1775_v43 = vld [vmem:[%s2711_s0 + $0x1c4] sm:$0xf] }
  0x31   :  { %v1682_v59 = vor.u32 %v1784_v55, %v1681_v54  ;;  %v1773_v46 = vld [vmem:[%s2711_s0 + $0x1b4] sm:$0xf]  ;;  %v1643_v47 = vld [vmem:[%s2711_s0 + $0x1b8] sm:$0xf0] }
  0x32   :  { %591 = vmatpush.bf16.msra.mxu1 %v1588_v58  ;;  %v1573_v58 = vld [vmem:[%s2711_s0 + $0x158] sm:$0xf0]  ;;  %v1646_v48 = vor.u32 %v1773_v46, %v1643_v47 }
  0x33   :  { %195 = vmatmul.bf16.gmra.mxu0 %v2132_v6  ;;  %v1576_v63 = vor.u32 %v1761_v57, %v1573_v58 }
  0x34   :  { %426 = vmatpush.bf16.msrb.mxu0 %v1482_v4  ;;  %233 = vmatmul.bf16.gmra.mxu2 %v2132_v6  ;;  %v1780_v4 = vld [vmem:[%s2711_s0 + $0x1e4] sm:$0xf0] }
  0x35   :  { %v1666_v9 = vor.u32 %v1780_v4, %v1665_v3 }
  0x36   :  { %592 = vmatpush.bf16.msra.mxu1 %v1580_v7  ;;  %v1757_v7 = vld [vmem:[%s2711_s0 + $0x134] sm:$0xf] }
  0x38   :  { %427 = vmatpush.bf16.msrb.mxu0 %v1474_v12  ;;  %v1560_v12 = vor.u32 %v1757_v7, %v1557_v8 }
  0x39   :  { %397 = vmatmul.bf16.gmra.mxu1 %v2132_v6  ;;  %1524 = vmatmul.msk.bf16.gmra.mxu3 %vm175_vm0, %v1981_v62 }
  0x3a   :  { %593 = vmatpush.bf16.msra.mxu1 %v1572_v13  ;;  %v1755_v13 = vld [vmem:[%s2711_s0 + $0x124] sm:$0xf] }
  0x3b   :  { %v1552_v21 = vor.u32 %v1755_v13, %v1549_v14 }
  0x3c   :  { %428 = vmatpush.bf16.msrb.mxu0 %v1466_v19  ;;  %v1649_v19 = vld [vmem:[%s2711_s0 + $0x1c0] sm:$0xf] }
  0x3e   :  { %594 = vmatpush.bf16.msra.mxu1 %v1564_v20  ;;  %v1776_v20 = vld [vmem:[%s2711_s0 + $0x1c4] sm:$0xf0] }
  0x3f   :  { %v1650_v23 = vor.u32 %v1776_v20, %v1649_v19 }
  0x40   :  { %429 = vmatpush.bf16.msrb.mxu0 %v1458_v27  ;;  %v1774_v27 = vld [vmem:[%s2711_s0 + $0x1b4] sm:$0xf0] }
  0x42   :  { %595 = vmatpush.bf16.msra.mxu1 %v1556_v28  ;;  %v1694_v28 = vor.u32 %v1785_v24, %v1691_v25 }
  0x43   :  { %430 = vmatmul.bf16.vlgmr.msrb.gmra.mxu0 %v2050_v33 }
  0x44   :  { %627 = vmatpush.bf16.msra.mxu0 %v1608_v29  ;;  %1525 = vmatmul.msk.bf16.vlgmr.msrb.gmra.mxu2 %vm175_vm0, %v1879_v16  ;;  %v1642_v29 = vor.u32 %v1774_v27, %v1641_v26 }
  0x45   :  { %858 = vmatpush.bf16.msrb.mxu2 %v1710_v44  ;;  %v1651_v44 = vld [vmem:[%s2711_s0 + $0x1c8] sm:$0xf0] }
  0x46   :  { %596 = vmatpush.bf16.msra.mxu1 %v1548_v39  ;;  %v1670_v39 = vor.u32 %v1779_v37, %v1667_v38  ;;  %v1654_v45 = vor.u32 %v1775_v43, %v1651_v44 }
  0x48   :  { %628 = vmatpush.bf16.msra.mxu0 %v1600_v40  ;;  %v1777_v40 = vld [vmem:[%s2711_s0 + $0x1d4] sm:$0xf] }
  0x49   :  { %1526 = vmatmul.msk.bf16.vlgmr.msra.gmra.mxu3 %vm175_vm0, %v1981_v62  ;;  %597 = vmatmul.bf16.vlgmr.msra.gmra.mxu1 %v2050_v33 }
  0x4a   :  { %794 = vmatpush.bf16.msrb.mxu1 %v1698_v41  ;;  %820 = vmatpush.bf16.msra.mxu3 %v1706_v53  ;;  %v1659_v41 = vld [vmem:[%s2711_s0 + $0x1d8] sm:$0xf0] }
  0x4b   :  { %v1662_v42 = vor.u32 %v1777_v40, %v1659_v41 }
  0x4c   :  { %629 = vmatpush.bf16.msra.mxu0 %v1592_v49 }
  0x4e   :  { %795 = vmatpush.bf16.msrb.mxu1 %v1690_v52 }
  0x50   :  { %630 = vmatpush.bf16.msra.mxu0 %v1584_v56 }
  0x52   :  { %796 = vmatpush.bf16.msrb.mxu1 %v1682_v59 }
  0x53   :  { %435 = vmatmul.bf16.gmra.mxu0 %v2132_v6 }
  0x54   :  { %631 = vmatpush.bf16.msra.mxu0 %v1576_v63  ;;  %1619 = vmatmul.msk.bf16.vlgmr.msra.gmra.mxu2 %vm175_vm0, %v1879_v16 }
  0x56   :  { %797 = vmatpush.bf16.msrb.mxu1 %v1674_v2 }
  0x58   :  { %632 = vmatpush.bf16.msra.mxu0 %v1568_v5 }
  0x59   :  { %602 = vmatmul.bf16.gmra.mxu1 %v2132_v6  ;;  %1617 = vmatmul.msk.bf16.vlgmr.msrb.gmra.mxu3 %vm175_vm0, %v1879_v16 }
  0x5a   :  { %798 = vmatpush.bf16.msrb.mxu1 %v1666_v9 }
  0x5c   :  { %633 = vmatpush.bf16.msra.mxu0 %v1560_v12 }
  0x5e   :  { %799 = vmatpush.bf16.msrb.mxu1 %v1658_v15 }
  0x60   :  { %634 = vmatpush.bf16.msra.mxu0 %v1552_v21 }
  0x62   :  { %800 = vmatpush.bf16.msrb.mxu1 %v1650_v23 }
  0x63   :  { %635 = vmatmul.bf16.vlgmr.msra.gmra.mxu0 %v2050_v33 }
  0x64   :  { %832 = vmatpush.bf16.msrb.mxu0 %v1702_v22  ;;  %1620 = vmatmul.msk.bf16.gmra.mxu2 %vm175_vm0, %v1981_v62 }
  0x66   :  { %801 = vmatpush.bf16.msrb.mxu1 %v1642_v29 }
  0x68   :  { %833 = vmatpush.bf16.msrb.mxu0 %v1694_v28 }
  0x69   :  { %1618 = vmatmul.msk.bf16.gmra.mxu3 %vm175_vm0, %v1981_v62  ;;  %802 = vmatmul.bf16.vlgmr.msrb.gmra.mxu1 %v2050_v33 }
  0x6a   :  { %1792 = vmatpush.bf16.msra.mxu1 %v1702_v22 }
  0x6c   :  { %834 = vmatpush.bf16.msrb.mxu0 %v1686_v32 }
  0x6e   :  { %1793 = vmatpush.bf16.msra.mxu1 %v1694_v28 }
  0x70   :  { %835 = vmatpush.bf16.msrb.mxu0 %v1678_v36 }
  0x72   :  { %1794 = vmatpush.bf16.msra.mxu1 %v1686_v32 }
  0x73   :  { %640 = vmatmul.bf16.gmra.mxu0 %v2132_v6 }
  0x74   :  { %836 = vmatpush.bf16.msrb.mxu0 %v1670_v39  ;;  %1713 = vmatmul.msk.bf16.vlgmr.msrb.gmra.mxu2 %vm175_vm0, %v1879_v16 }
  0x76   :  { %1795 = vmatpush.bf16.msra.mxu1 %v1678_v36 }
  0x78   :  { %837 = vmatpush.bf16.msrb.mxu0 %v1662_v42 }
  0x79   :  { %807 = vmatmul.bf16.gmra.mxu1 %v2132_v6  ;;  %1711 = vmatmul.msk.bf16.vlgmr.msra.gmra.mxu3 %vm175_vm0, %v1879_v16 }
  0x7a   :  { %1796 = vmatpush.bf16.msra.mxu1 %v1670_v39 }
  0x7c   :  { %838 = vmatpush.bf16.msrb.mxu0 %v1654_v45 }
  0x7e   :  { %1797 = vmatpush.bf16.msra.mxu1 %v1662_v42 }
  0x80   :  { %839 = vmatpush.bf16.msrb.mxu0 %v1646_v48 }
  0x82   :  { %1798 = vmatpush.bf16.msra.mxu1 %v1654_v45 }
  0x83   :  { %840 = vmatmul.bf16.vlgmr.msrb.gmra.mxu0 %v2050_v33 }
  0x84   :  { %1714 = vmatmul.msk.bf16.gmra.mxu2 %vm175_vm0, %v1981_v62 }
  0x85   :  { %v210_v49 = vpop.f32.mrf.mxu1 }
  0x86   :  { %1799 = vmatpush.bf16.msra.mxu1 %v1646_v48  ;;  %v2367_v56 = vpop.permute.xlu0 %49 }
  0x89   :  { %1712 = vmatmul.msk.bf16.gmra.mxu3 %vm175_vm0, %v1981_v62  ;;  %845 = vmatmul.bf16.vlgmr.msra.gmra.mxu1 %v2132_v6 }
  0x8c   :  { %v248_v50 = vpop.f32.mrf.mxu3  ;;  %v2384_v10 = vpop.permute.xlu1 %59 }
  0x8d   :  { %v212_v51 = vpop.f32.mrf.mxu1 }
  0x8e   :  { %v2375_v63 = vpop.permute.xlu0 %54 }
  0x94   :  { %v250_v52 = vpop.f32.mrf.mxu3  ;;  %v2397_v23 = vpop.permute.xlu1 %64 }
  0x95   :  { %v215_v53 = vpop.f32.mrf.mxu1 }
  0x9c   :  { %v253_v54 = vpop.f32.mrf.mxu3 }
  0x9d   :  { %v217_v16 = vpop.f32.mrf.mxu1 }
  0xa0   :  { %v191_v55 = vpop.f32.mrf.mxu0 }
  0xa1   :  { %v192_v58 = vadd.f32 %v191_v55, %v2367_v56 }
  0xa3   :  { %v2373_v6 = vadd.f32 %v210_v49, %v192_v58 }
  0xa4   :  { %v255_v57 = vpop.f32.mrf.mxu3 }
  0xa6   :  { %v393_v33 = vpop.f32.mrf.mxu1 }
  0xa7   :  { %v229_v59 = vpop.f32.mrf.mxu2  ;;  %v394_v37 = vadd.f32 %v393_v33, %v2367_v56 }
  0xa8   :  { %v230_v60 = vadd.f32 %v229_v59, %v2367_v56  ;;  %v193_v61 = vpop.f32.mrf.mxu0 }
  0xa9   :  { %v194_v4 = vadd.f32 %v193_v61, %v2375_v63 }
  0xaa   :  { %v2371_v62 = vadd.f32 %v248_v50, %v230_v60 }
  0xab   :  { %v2386_v11 = vadd.f32 %v212_v51, %v194_v4 }
  0xac   :  { %v412_v0 = vpop.f32.mrf.mxu3  ;;  %v259_v1 = vsel %vm258_vm1, %v2371_v62, 0.0 }
  0xad   :  { %v260_v2 = vadd.f32 %v259_v1, %v2373_v6  ;;  %v2415_v44 = vadd.f32 %v412_v0, %v394_v37 }
  0xae   :  { %v395_v3 = vpop.f32.mrf.mxu1 }
  0xaf   :  { %v231_v5 = vpop.f32.mrf.mxu2  ;;  %261 = vadd.xlane.f32.xlu2 %v260_v2  ;;  %v396_v48 = vadd.f32 %v395_v3, %v2375_v63 }
  0xb0   :  { %v232_v7 = vadd.f32 %v231_v5, %v2375_v63  ;;  %v196_v8 = vpop.f32.mrf.mxu0 }
  0xb1   :  { %v197_v17 = vadd.f32 %v196_v8, %v2384_v10 }
  0xb2   :  { %v2382_v9 = vadd.f32 %v250_v52, %v232_v7 }
  0xb3   :  { %v2395_v22 = vadd.f32 %v215_v53, %v197_v17 }
  0xb4   :  { %v414_v12 = vpop.f32.mrf.mxu3  ;;  %v263_v13 = vsel %vm258_vm1, %v2382_v9, 0.0 }
  0xb5   :  { %v264_v14 = vadd.f32 %v263_v13, %v2386_v11 }
  0xb6   :  { %v398_v15 = vpop.f32.mrf.mxu1 }
  0xb7   :  { %v234_v18 = vpop.f32.mrf.mxu2  ;;  %265 = vadd.xlane.f32.xlu2 %v264_v14  ;;  %v399_v59 = vadd.f32 %v398_v15, %v2384_v10 }
  0xb8   :  { %v235_v19 = vadd.f32 %v234_v18, %v2384_v10  ;;  %v198_v20 = vpop.f32.mrf.mxu0 }
  0xb9   :  { %v199_v28 = vadd.f32 %v198_v20, %v2397_v23 }
  0xba   :  { %v2393_v21 = vadd.f32 %v253_v54, %v235_v19  ;;  %v2424_v54 = vadd.f32 %v414_v12, %v396_v48 }
  0xbb   :  { %v2406_v34 = vadd.f32 %v217_v16, %v199_v28 }
  0xbc   :  { %v417_v24 = vpop.f32.mrf.mxu3  ;;  %v267_v25 = vsel %vm258_vm1, %v2393_v21, 0.0 }
  0xbd   :  { %v268_v26 = vadd.f32 %v267_v25, %v2395_v22  ;;  %v2435_v2 = vadd.f32 %v417_v24, %v399_v59 }
  0xbe   :  { %v400_v27 = vpop.f32.mrf.mxu1 }
  0xbf   :  { %v236_v29 = vpop.f32.mrf.mxu2  ;;  %269 = vadd.xlane.f32.xlu0 %v268_v26  ;;  %v401_v8 = vadd.f32 %v400_v27, %v2397_v23 }
  0xc0   :  { %v237_v30 = vadd.f32 %v236_v29, %v2397_v23  ;;  %v431_v31 = vpop.f32.mrf.mxu0 }
  0xc1   :  { %v432_v39 = vadd.f32 %v431_v31, %v2367_v56 }
  0xc2   :  { %v2404_v32 = vadd.f32 %v255_v57, %v237_v30 }
  0xc4   :  { %v419_v35 = vpop.f32.mrf.mxu3  ;;  %v271_v36 = vsel %vm258_vm1, %v2404_v32, 0.0 }
  0xc5   :  { %v272_v38 = vadd.f32 %v271_v36, %v2406_v34  ;;  %v2444_v17 = vadd.f32 %v419_v35, %v401_v8 }
  0xc6   :  { %v598_v40 = vpop.f32.mrf.mxu1 }
  0xc7   :  { %v450_v41 = vpop.f32.mrf.mxu2  ;;  %273 = vadd.xlane.f32.xlu1 %v272_v38  ;;  %v599_v26 = vadd.f32 %v598_v40, %v2367_v56 }
  0xc8   :  { %v2413_v42 = vadd.f32 %v450_v41, %v432_v39  ;;  %v433_v43 = vpop.f32.mrf.mxu0 }
  0xc9   :  { %v434_v49 = vadd.f32 %v433_v43, %v2375_v63 }
  0xca   :  { %v460_v45 = vsel %vm258_vm1, %v2413_v42, 0.0 }
  0xcb   :  { %v461_v46 = vadd.f32 %v460_v45, %v2415_v44 }
  0xcc   :  { %v455_v47 = vpop.f32.mrf.mxu3 }
  0xcd   :  { %462 = vadd.xlane.f32.xlu2 %v461_v46 }
  0xce   :  { %v600_v50 = vpop.f32.mrf.mxu1 }
  0xcf   :  { %v452_v51 = vpop.f32.mrf.mxu2  ;;  %v601_v39 = vadd.f32 %v600_v50, %v2375_v63 }
  0xd0   :  { %v2422_v52 = vadd.f32 %v452_v51, %v434_v49  ;;  %v436_v53 = vpop.f32.mrf.mxu0 }
  0xd1   :  { %v437_v16 = vadd.f32 %v436_v53, %v2384_v10 }
  0xd2   :  { %v464_v55 = vsel %vm258_vm1, %v2422_v52, 0.0 }
  0xd3   :  { %v465_v57 = vadd.f32 %v464_v55, %v2424_v54  ;;  %v2430_v33 = vadd.f32 %v455_v47, %v437_v16 }
  0xd4   :  { %v457_v58 = vpop.f32.mrf.mxu3 }
  0xd5   :  { %466 = vadd.xlane.f32.xlu2 %v465_v57  ;;  %v468_v1 = vsel %vm258_vm1, %v2430_v33, 0.0 }
  0xd6   :  { %v603_v60 = vpop.f32.mrf.mxu1  ;;  %v469_v4 = vadd.f32 %v468_v1, %v2435_v2 }
  0xd7   :  { %v655_v61 = vpop.f32.mrf.mxu2  ;;  %v604_v47 = vadd.f32 %v603_v60, %v2384_v10 }
  0xd8   :  { %v438_v0 = vpop.f32.mrf.mxu0 }
  0xd9   :  { %v439_v3 = vadd.f32 %v438_v0, %v2397_v23 }
  0xdb   :  { %v2439_v5 = vadd.f32 %v457_v58, %v439_v3 }
  0xdc   :  { %v617_v7 = vpop.f32.mrf.mxu3 }
  0xdd   :  { %470 = vadd.xlane.f32.xlu2 %v469_v4  ;;  %v472_v15 = vsel %vm258_vm1, %v2439_v5, 0.0  ;;  %v2453_v30 = vadd.f32 %v617_v7, %v599_v26 }
  0xde   :  { %v605_v12 = vpop.f32.mrf.mxu1  ;;  %v473_v19 = vadd.f32 %v472_v15, %v2444_v17 }
  0xdf   :  { %v657_v13 = vpop.f32.mrf.mxu2  ;;  %v606_v60 = vadd.f32 %v605_v12, %v2397_v23 }
  0xe0   :  { %v636_v14 = vpop.f32.mrf.mxu0 }
  0xe1   :  { %v637_v18 = vadd.f32 %v636_v14, %v2367_v56 }
  0xe3   :  { %v2448_v20 = vadd.f32 %v655_v61, %v637_v18 }
  0xe4   :  { %v619_v24 = vpop.f32.mrf.mxu3 }
  0xe5   :  { %474 = vadd.xlane.f32.xlu2 %v473_v19  ;;  %v665_v29 = vsel %vm258_vm1, %v2448_v20, 0.0  ;;  %v2462_v45 = vadd.f32 %v619_v24, %v601_v39 }
  0xe6   :  { %v803_v25 = vpop.f32.mrf.mxu1  ;;  %v666_v35 = vadd.f32 %v665_v29, %v2453_v30 }
  0xe7   :  { %v660_v27 = vpop.f32.mrf.mxu2  ;;  %v804_v15 = vadd.f32 %v803_v25, %v2367_v56 }
  0xe8   :  { %v638_v28 = vpop.f32.mrf.mxu0 }
  0xe9   :  { %v639_v31 = vadd.f32 %v638_v28, %v2375_v63 }
  0xeb   :  { %v2457_v36 = vadd.f32 %v657_v13, %v639_v31 }
  0xec   :  { %v622_v37 = vpop.f32.mrf.mxu3 }
  0xed   :  { %667 = vadd.xlane.f32.xlu2 %v666_v35  ;;  %v669_v43 = vsel %vm258_vm1, %v2457_v36, 0.0  ;;  %v2469_v51 = vadd.f32 %v622_v37, %v604_v47 }
  0xee   :  { %v805_v38 = vpop.f32.mrf.mxu1  ;;  %v670_v49 = vadd.f32 %v669_v43, %v2462_v45 }
  0xef   :  { %v662_v41 = vpop.f32.mrf.mxu2 }
  0xf0   :  { %v641_v40 = vpop.f32.mrf.mxu0 }
  0xf1   :  { %v642_v46 = vadd.f32 %v641_v40, %v2384_v10 }
  0xf3   :  { %v2466_v48 = vadd.f32 %v660_v27, %v642_v46 }
  0xf4   :  { %v624_v53 = vpop.f32.mrf.mxu3 }
  0xf5   :  { %671 = vadd.xlane.f32.xlu2 %v670_v49  ;;  %v673_v50 = vsel %vm258_vm1, %v2466_v48, 0.0  ;;  %v2478_v0 = vadd.f32 %v624_v53, %v606_v60 }
  0xf6   :  { %v808_v16 = vpop.f32.mrf.mxu1  ;;  %v674_v55 = vadd.f32 %v673_v50, %v2469_v51 }
  0xf7   :  { %v860_v57 = vpop.f32.mrf.mxu2  ;;  %v809_v37 = vadd.f32 %v808_v16, %v2384_v10 }
  0xf8   :  { %v643_v58 = vpop.f32.mrf.mxu0  ;;  %675 = vadd.xlane.f32.xlu0 %v674_v55 }
  0xf9   :  { %v644_v59 = vadd.f32 %v643_v58, %v2397_v23 }
  0xfb   :  { %v2476_v61 = vadd.f32 %v662_v41, %v644_v59 }
  0xfc   :  { %v822_v1 = vpop.f32.mrf.mxu3 }
  0xfd   :  { %v677_v3 = vsel %vm258_vm1, %v2476_v61, 0.0  ;;  %v2487_v12 = vadd.f32 %v822_v1, %v804_v15 }
  0xfe   :  { %v810_v4 = vpop.f32.mrf.mxu1  ;;  %v678_v7 = vadd.f32 %v677_v3, %v2478_v0 }
  0xff   :  { %v862_v8 = vpop.f32.mrf.mxu2  ;;  %v811_v16 = vadd.f32 %v810_v4, %v2397_v23 }
 0x100   :  { %v841_v13 = vpop.f32.mrf.mxu0  ;;  %679 = vadd.xlane.f32.xlu1 %v678_v7 }
 0x101   :  { %v842_v14 = vadd.f32 %v841_v13, %v2367_v56  ;;  %v806_v56 = vadd.f32 %v805_v38, %v2375_v63 }
 0x103   :  { %v2485_v18 = vadd.f32 %v860_v57, %v842_v14 }
 0x104   :  { %v824_v19 = vpop.f32.mrf.mxu3 }
 0x105   :  { %v870_v24 = vsel %vm258_vm1, %v2485_v18, 0.0  ;;  %v2500_v41 = vadd.f32 %v824_v19, %v806_v56 }
 0x106   :  { %v846_v26 = vpop.f32.mrf.mxu1  ;;  %v871_v27 = vadd.f32 %v870_v24, %v2487_v12 }
 0x107   :  { %v847_v28 = vadd.f32 %v846_v26, %v2384_v10  ;;  %v865_v29 = vpop.f32.mrf.mxu2 }
 0x108   :  { %v843_v31 = vpop.f32.mrf.mxu0  ;;  %872 = vadd.xlane.f32.xlu2 %v871_v27 }
 0x109   :  { %v844_v35 = vadd.f32 %v843_v31, %v2375_v63  ;;  %v2495_v25 = vadd.f32 %v865_v29, %v847_v28 }
 0x10b   :  { %v2498_v39 = vadd.f32 %v862_v8, %v844_v35  ;;  %v878_v49 = vsel %vm258_vm1, %v2495_v25, 0.0 }
 0x10c   :  { %v827_v40 = vpop.f32.mrf.mxu3 }
 0x10d   :  { %v2502_v43 = vadd.f32 %v827_v40, %v809_v37  ;;  %v874_v46 = vsel %vm258_vm1, %v2498_v39, 0.0 }
 0x10e   :  { %v848_v47 = vpop.f32.mrf.mxu1  ;;  %v875_v63 = vadd.f32 %v874_v46, %v2500_v41 }
 0x10f   :  { %v849_v38 = vadd.f32 %v848_v47, %v2397_v23  ;;  %v867_v53 = vpop.f32.mrf.mxu2  ;;  %v879_v10 = vadd.f32 %v878_v49, %v2502_v43 }
 0x110   :  { %876 = vadd.xlane.f32.xlu0 %v875_v63 }
 0x111   :  { %880 = vadd.xlane.f32.xlu1 %v879_v10  ;;  %v2511_v50 = vadd.f32 %v867_v53, %v849_v38 }
 0x113   :  { %v882_v58 = vsel %vm258_vm1, %v2511_v50, 0.0 }
 0x114   :  { %v829_v55 = vpop.f32.mrf.mxu3 }
 0x115   :  { %v2514_v57 = vadd.f32 %v829_v55, %v811_v16 }
 0x117   :  { %v883_v59 = vadd.f32 %v882_v58, %v2514_v57 }
 0x119   :  { %884 = vadd.xlane.f32.xlu2 %v883_v59 }
 0x122   :  { %v262_v60 = vpop.xlane.xlu2 %261 }
 0x12a   :  { %v266_v1 = vpop.xlane.xlu2 %265 }
 0x132   :  { %v270_v15 = vpop.xlane.xlu0 %269 }
 0x13a   :  { %v274_v24 = vpop.xlane.xlu1 %273 }
 0x140   :  { %v463_v3 = vpop.xlane.xlu2 %462 }
 0x141   :  { %v476_v23 = vadd.f32 %v463_v3, %v262_v60 }
 0x148   :  { %v467_v7 = vpop.xlane.xlu2 %466 }
 0x149   :  { %v477_v35 = vadd.f32 %v467_v7, %v266_v1 }
 0x150   :  { %v471_v8 = vpop.xlane.xlu2 %470 }
 0x151   :  { %v478_v47 = vadd.f32 %v471_v8, %v270_v15 }
 0x158   :  { %v475_v13 = vpop.xlane.xlu2 %474 }
 0x160   :  { %v668_v14 = vpop.xlane.xlu2 %667 }
 0x161   :  { %v681_v4 = vadd.f32 %v668_v14, %v476_v23 }
 0x168   :  { %v672_v19 = vpop.xlane.xlu2 %671 }
 0x169   :  { %v682_v49 = vadd.f32 %v672_v19, %v477_v35 }
 0x16b   :  { %v676_v26 = vpop.xlane.xlu0 %675 }
 0x16c   :  { %v683_v58 = vadd.f32 %v676_v26, %v478_v47 }
 0x173   :  { %v680_v28 = vpop.xlane.xlu1 %679 }
 0x17b   :  { %v873_v27 = vpop.xlane.xlu2 %872 }
 0x17c   :  { %v886_v29 = vadd.f32 %v873_v27, %v681_v4 }
 0x17e   :  { %v2519_v31 = vmul.f32 0.0010416667, %v886_v29 }
 0x180   :  { %v962_v56 = vsub.f32 %v2453_v30, %v2519_v31  ;;  %v963_v37 = vsub.f32 %v2448_v20, %v2519_v31  ;;  %v926_v40 = vsub.f32 %v2415_v44, %v2519_v31  ;;  %v927_v46 = vsub.f32 %v2413_v42, %v2519_v31 }
 0x181   :  { %v894_v63 = vsub.f32 %v2373_v6, %v2519_v31  ;;  %v895_v38 = vsub.f32 %v2371_v62, %v2519_v31  ;;  %v999_v15 = vsub.f32 %v2485_v18, %v2519_v31  ;;  %v998_v35 = vsub.f32 %v2487_v12, %v2519_v31 }
 0x182   :  { %v970_v53 = vmul.f32 %v962_v56, %v962_v56  ;;  %v971_v10 = vmul.f32 %v963_v37, %v963_v37  ;;  %v934_v16 = vmul.f32 %v926_v40, %v926_v40  ;;  %v935_v55 = vmul.f32 %v927_v46, %v927_v46 }
 0x183   :  { %v877_v59 = vpop.xlane.xlu0 %876  ;;  %v902_v60 = vmul.f32 %v894_v63, %v894_v63  ;;  %v903_v1 = vmul.f32 %v895_v38, %v895_v38  ;;  %v479_v37 = vadd.f32 %v475_v13, %v274_v24  ;;  %v1007_v40 = vmul.f32 %v999_v15, %v999_v15 }
 0x184   :  { %v881_v3 = vpop.xlane.xlu1 %880  ;;  %v887_v7 = vadd.f32 %v877_v59, %v682_v49  ;;  %v978_v14 = vsel %vm258_vm1, %v971_v10, 0.0  ;;  %v942_v8 = vsel %vm258_vm1, %v935_v55, 0.0 }
 0x185   :  { %v888_v19 = vadd.f32 %v881_v3, %v683_v58  ;;  %v979_v23 = vadd.f32 %v978_v14, %v970_v53  ;;  %v943_v4 = vadd.f32 %v942_v8, %v934_v16  ;;  %v910_v27 = vsel %vm258_vm1, %v903_v1, 0.0 }
 0x186   :  { %v2538_v29 = vmul.f32 0.0010416667, %v887_v7  ;;  %v911_v26 = vadd.f32 %v910_v27, %v902_v60  ;;  %v684_v38 = vadd.f32 %v680_v28, %v479_v37  ;;  %v1006_v53 = vmul.f32 %v998_v35, %v998_v35 }
 0x187   :  { %v2542_v56 = vmul.f32 0.0010416667, %v888_v19  ;;  %980 = vadd.xlane.f32.xlu2 %v979_v23  ;;  %944 = vadd.xlane.f32.xlu1 %v943_v4  ;;  %v1014_v60 = vsel %vm258_vm1, %v1007_v40, 0.0 }
 0x188   :  { %912 = vadd.xlane.f32.xlu0 %v911_v26  ;;  %v929_v10 = vsub.f32 %v2422_v52, %v2538_v29  ;;  %v897_v13 = vsub.f32 %v2382_v9, %v2538_v29  ;;  %v928_v14 = vsub.f32 %v2424_v54, %v2538_v29  ;;  %v896_v23 = vsub.f32 %v2386_v11, %v2538_v29 }
 0x189   :  { %v898_v46 = vsub.f32 %v2395_v22, %v2542_v56  ;;  %v899_v47 = vsub.f32 %v2393_v21, %v2542_v56  ;;  %v966_v49 = vsub.f32 %v2469_v51, %v2542_v56  ;;  %v967_v63 = vsub.f32 %v2466_v48, %v2542_v56 }
 0x18a   :  { %v931_v1 = vsub.f32 %v2430_v33, %v2542_v56  ;;  %v937_v19 = vmul.f32 %v929_v10, %v929_v10  ;;  %v1015_v27 = vadd.f32 %v1014_v60, %v1006_v53  ;;  %v905_v26 = vmul.f32 %v897_v13, %v897_v13 }
 0x18b   :  { %v906_v24 = vmul.f32 %v898_v46, %v898_v46  ;;  %v907_v16 = vmul.f32 %v899_v47, %v899_v47  ;;  %v974_v55 = vmul.f32 %v966_v49, %v966_v49  ;;  %v975_v58 = vmul.f32 %v967_v63, %v967_v63 }
 0x18c   :  { %v885_v59 = vpop.xlane.xlu2 %884  ;;  %v930_v35 = vsub.f32 %v2435_v2, %v2542_v56  ;;  %v939_v37 = vmul.f32 %v931_v1, %v931_v1  ;;  %v936_v40 = vmul.f32 %v928_v14, %v928_v14  ;;  %v946_v46 = vsel %vm258_vm1, %v937_v19, 0.0 }
 0x18d   :  { %v889_v3 = vadd.f32 %v885_v59, %v684_v38  ;;  %v918_v28 = vsel %vm258_vm1, %v907_v16, 0.0  ;;  %v986_v7 = vsel %vm258_vm1, %v975_v58, 0.0  ;;  %v904_v47 = vmul.f32 %v896_v23, %v896_v23 }
 0x18e   :  { %v919_v8 = vadd.f32 %v918_v28, %v906_v24  ;;  %v987_v15 = vadd.f32 %v986_v7, %v974_v55  ;;  %v914_v49 = vsel %vm258_vm1, %v905_v26, 0.0  ;;  %v938_v63 = vmul.f32 %v930_v35, %v930_v35 }
 0x18f   :  { %v2565_v4 = vmul.f32 0.0010416667, %v889_v3  ;;  %v950_v10 = vsel %vm258_vm1, %v939_v37, 0.0  ;;  %v965_v13 = vsub.f32 %v2457_v36, %v2538_v29  ;;  %v947_v24 = vadd.f32 %v946_v46, %v936_v40 }
 0x190   :  { %920 = vadd.xlane.f32.xlu2 %v919_v8  ;;  %988 = vadd.xlane.f32.xlu1 %v987_v15  ;;  %v915_v16 = vadd.f32 %v914_v49, %v904_v47  ;;  %v951_v59 = vadd.f32 %v950_v10, %v938_v63  ;;  %v964_v60 = vsub.f32 %v2462_v45, %v2538_v29 }
 0x191   :  { %1016 = vadd.xlane.f32.xlu0 %v1015_v27  ;;  %v969_v38 = vsub.f32 %v2476_v61, %v2565_v4  ;;  %v933_v53 = vsub.f32 %v2439_v5, %v2565_v4  ;;  %v968_v55 = vsub.f32 %v2478_v0, %v2565_v4  ;;  %v932_v58 = vsub.f32 %v2444_v17, %v2565_v4 }
 0x192   :  { %v973_v28 = vmul.f32 %v965_v13, %v965_v13  ;;  %v1003_v8 = vsub.f32 %v2495_v25, %v2542_v56  ;;  %v972_v15 = vmul.f32 %v964_v60, %v964_v60  ;;  %v1001_v27 = vsub.f32 %v2498_v39, %v2538_v29 }
 0x193   :  { %v977_v1 = vmul.f32 %v969_v38, %v969_v38  ;;  %v941_v3 = vmul.f32 %v933_v53, %v933_v53  ;;  %v976_v7 = vmul.f32 %v968_v55, %v968_v55  ;;  %v940_v14 = vmul.f32 %v932_v58, %v932_v58 }
 0x194   :  { %v982_v26 = vsel %vm258_vm1, %v973_v28, 0.0  ;;  %v901_v35 = vsub.f32 %v2404_v32, %v2565_v4  ;;  %v1002_v46 = vsub.f32 %v2502_v43, %v2542_v56  ;;  %v1000_v47 = vsub.f32 %v2500_v41, %v2538_v29 }
 0x195   :  { %v990_v19 = vsel %vm258_vm1, %v977_v1, 0.0  ;;  %v954_v23 = vsel %vm258_vm1, %v941_v3, 0.0  ;;  %v983_v49 = vadd.f32 %v982_v26, %v972_v15  ;;  %v1011_v63 = vmul.f32 %v1003_v8, %v1003_v8 }
 0x196   :  { %v991_v37 = vadd.f32 %v990_v19, %v976_v7  ;;  %v955_v40 = vadd.f32 %v954_v23, %v940_v14  ;;  %v1009_v38 = vmul.f32 %v1001_v27, %v1001_v27  ;;  %v900_v53 = vsub.f32 %v2406_v34, %v2565_v4 }
 0x197   :  { %v909_v10 = vmul.f32 %v901_v35, %v901_v35  ;;  %v1010_v13 = vmul.f32 %v1002_v46, %v1002_v46  ;;  %v1005_v60 = vsub.f32 %v2511_v50, %v2565_v4  ;;  %v1004_v7 = vsub.f32 %v2514_v57, %v2565_v4 }
 0x198   :  { %948 = vadd.xlane.f32.xlu2 %v947_v24  ;;  %916 = vadd.xlane.f32.xlu1 %v915_v16  ;;  %v1008_v24 = vmul.f32 %v1000_v47, %v1000_v47  ;;  %v1022_v16 = vsel %vm258_vm1, %v1011_v63, 0.0  ;;  %v1018_v55 = vsel %vm258_vm1, %v1009_v38, 0.0  ;;  %v908_v58 = vmul.f32 %v900_v53, %v900_v53 }
 0x199   :  { %952 = vadd.xlane.f32.xlu0 %v951_v59  ;;  %v922_v59 = vsel %vm258_vm1, %v909_v10, 0.0  ;;  %v1023_v1 = vadd.f32 %v1022_v16, %v1010_v13  ;;  %v1013_v14 = vmul.f32 %v1005_v60, %v1005_v60  ;;  %v1012_v8 = vmul.f32 %v1004_v7, %v1004_v7 }
 0x19a   :  { %v1019_v3 = vadd.f32 %v1018_v55, %v1008_v24  ;;  %v923_v28 = vadd.f32 %v922_v59, %v908_v58 }
 0x19b   :  { %v1026_v15 = vsel %vm258_vm1, %v1013_v14, 0.0 }
 0x19c   :  { %v1027_v19 = vadd.f32 %v1026_v15, %v1012_v8  ;;  %v1038_v15 = vld [vmem:[%s2714_s3] sm:$0xff] }
 0x1a0   :  { %992 = vadd.xlane.f32.xlu2 %v991_v37  ;;  %956 = vadd.xlane.f32.xlu1 %v955_v40 }
 0x1a1   :  { %984 = vadd.xlane.f32.xlu0 %v983_v49 }
 0x1a8   :  { %1024 = vadd.xlane.f32.xlu2 %v1023_v1  ;;  %1020 = vadd.xlane.f32.xlu1 %v1019_v3 }
 0x1a9   :  { %924 = vadd.xlane.f32.xlu0 %v923_v28 }
 0x1b1   :  { %1028 = vadd.xlane.f32.xlu0 %v1027_v19 }
 0x1fa   :  { %v945_v23 = vpop.xlane.xlu1 %944  ;;  %v981_v27 = vpop.xlane.xlu2 %980 }
 0x1fb   :  { %v913_v26 = vpop.xlane.xlu0 %912 }
 0x1fc   :  { %v958_v35 = vadd.f32 %v945_v23, %v913_v26 }
 0x1fe   :  { %v994_v37 = vadd.f32 %v981_v27, %v958_v35 }
 0x203   :  { %v989_v40 = vpop.xlane.xlu1 %988  ;;  %v921_v46 = vpop.xlane.xlu2 %920 }
 0x204   :  { %v1017_v47 = vpop.xlane.xlu0 %1016 }
 0x205   :  { %v1030_v49 = vadd.f32 %v1017_v47, %v994_v37 }
 0x207   :  { %v1034_v63 = vmul.f32 0.0010416667, %v1030_v49 }
 0x209   :  { %v1042_v38 = vadd.f32 1e-05, %v1034_v63 }
 0x20b   :  { %1804 = vrsqrt.f32 %v1042_v38  ;;  %v917_v53 = vpop.xlane.xlu1 %916  ;;  %v949_v10 = vpop.xlane.xlu2 %948  ;;  %vm1052_vm3 = vweird.f32 %v1042_v38 }
 0x20c   :  { %v953_v13 = vpop.xlane.xlu0 %952  ;;  %v959_v7 = vadd.f32 %v949_v10, %v917_v53 }
 0x20d   :  { %v960_v3 = vadd.f32 %v953_v13, %v921_v46 }
 0x20f   :  { %v996_v8 = vadd.f32 %v989_v40, %v960_v3 }
 0x211   :  { %v1805_v24 = vpop.eup %1804 }
 0x212   :  { %v1047_v16 = vmul.f32 %v1805_v24, %v1042_v38  ;;  %vm1053_vm2 = vweird.f32 %v1805_v24  ;;  %v1090_v38 = vld [vmem:[%s2715_s4] sm:$0xff] }
 0x213   :  { %v957_v55 = vpop.xlane.xlu1 %956  ;;  %v993_v58 = vpop.xlane.xlu2 %992  ;;  %vm1054_vm4 = vmor %vm1052_vm3, %vm1053_vm2 }
 0x214   :  { %v1048_v59 = vmul.f32 %v1805_v24, %v1047_v16  ;;  %v985_v60 = vpop.xlane.xlu0 %984 }
 0x215   :  { %v995_v14 = vadd.f32 %v985_v60, %v959_v7 }
 0x216   :  { %v1049_v1 = vmul.f32 0.5, %v1048_v59 }
 0x218   :  { %v1050_v28 = vsub.f32 1.5, %v1049_v1 }
 0x21a   :  { %v1051_v19 = vmul.f32 %v1805_v24, %v1050_v28 }
 0x21b   :  { %v1021_v23 = vpop.xlane.xlu1 %1020  ;;  %v1025_v27 = vpop.xlane.xlu2 %1024 }
 0x21c   :  { %v1031_v26 = vadd.f32 %v1021_v23, %v995_v14  ;;  %v925_v35 = vpop.xlane.xlu0 %924  ;;  %v1032_v37 = vadd.f32 %v1025_v27, %v996_v8  ;;  %v1055_v47 = vsel %vm1054_vm4, %v1805_v24, %v1051_v19 }
 0x21d   :  { %v1086_v49 = vmul.f32 %v1055_v47, %v1038_v15  ;;  %v961_v40 = vadd.f32 %v957_v55, %v925_v35  ;;  %v1040_v47 = vld [vmem:[%s2714_s3 + $0x10] sm:$0xff] }
 0x21e   :  { %v1035_v46 = vmul.f32 0.0010416667, %v1031_v26  ;;  %v1036_v63 = vmul.f32 0.0010416667, %v1032_v37 }
 0x21f   :  { %1104 = vperm.xlu1 %1802, %v1086_v49   ;;  %v1094_v53 = vmul.f32 %v1086_v49, %v2519_v31  ;;  %v997_v59 = vadd.f32 %v993_v58, %v961_v40  ;;  %v1039_v58 = vld [vmem:[%s2714_s3 + $0x8] sm:$0xff] }
 0x220   :  { %v1043_v10 = vadd.f32 1e-05, %v1035_v46  ;;  %v1044_v13 = vadd.f32 1e-05, %v1036_v63 }
 0x221   :  { %v1098_v16 = vsub.f32 %v1090_v38, %v1094_v53 }
 0x222   :  { %1806 = vrsqrt.f32 %v1043_v10  ;;  %vm1062_vm7 = vweird.f32 %v1043_v10  ;;  %vm1072_vm9 = vweird.f32 %v1044_v13 }
 0x223   :  { %1808 = vrsqrt.f32 %v1044_v13  ;;  %1132 = vperm.xlu0 %1801, %v1098_v16  }
 0x224   :  { %v1029_v60 = vpop.xlane.xlu0 %1028 }
 0x225   :  { %v1033_v24 = vadd.f32 %v1029_v60, %v997_v59  ;;  %v1041_v60 = vld [vmem:[%s2714_s3 + $0x18] sm:$0xff] }
 0x227   :  { %v1037_v1 = vmul.f32 0.0010416667, %v1033_v24 }
 0x228   :  { %v1807_v3 = vpop.eup %1806 }
 0x229   :  { %v1809_v28 = vpop.eup %1808  ;;  %v1057_v7 = vmul.f32 %v1807_v3, %v1043_v10  ;;  %v1045_v14 = vadd.f32 1e-05, %v1037_v1  ;;  %vm1063_vm5 = vweird.f32 %v1807_v3 }
 0x22a   :  { %v1067_v8 = vmul.f32 %v1809_v28, %v1044_v13  ;;  %vm1073_vm6 = vweird.f32 %v1809_v28  ;;  %vm1064_vm8 = vmor %vm1062_vm7, %vm1063_vm5  ;;  %v1091_v13 = vld [vmem:[%s2715_s4 + $0x8] sm:$0xff] }
 0x22b   :  { %v1058_v15 = vmul.f32 %v1807_v3, %v1057_v7  ;;  %1810 = vrsqrt.f32 %v1045_v14  ;;  %vm1074_vm10 = vmor %vm1072_vm9, %vm1073_vm6  ;;  %vm1082_vm12 = vweird.f32 %v1045_v14  ;;  %v1093_v7 = vld [vmem:[%s2715_s4 + $0x18] sm:$0xff] }
 0x22c   :  { %v1068_v55 = vmul.f32 %v1809_v28, %v1067_v8 }
 0x22d   :  { %v1059_v19 = vmul.f32 0.5, %v1058_v15  ;;  %v1092_v15 = vld [vmem:[%s2715_s4 + $0x10] sm:$0xff] }
 0x22e   :  { %v1069_v31 = vmul.f32 0.5, %v1068_v55 }
 0x22f   :  { %v1060_v23 = vsub.f32 1.5, %v1059_v19 }
 0x230   :  { %v1070_v27 = vsub.f32 1.5, %v1069_v31 }
 0x231   :  { %v1811_v26 = vpop.eup %1810  ;;  %v1061_v35 = vmul.f32 %v1807_v3, %v1060_v23 }
 0x232   :  { %v1077_v37 = vmul.f32 %v1811_v26, %v1045_v14  ;;  %v1071_v49 = vmul.f32 %v1809_v28, %v1070_v27  ;;  %vm1083_vm11 = vweird.f32 %v1811_v26 }
 0x233   :  { %v1065_v46 = vsel %vm1064_vm8, %v1807_v3, %v1061_v35  ;;  %vm1084_vm13 = vmor %vm1082_vm12, %vm1083_vm11 }
 0x234   :  { %v1078_v63 = vmul.f32 %v1811_v26, %v1077_v37  ;;  %v1087_v38 = vmul.f32 %v1065_v46, %v1039_v58  ;;  %v1075_v40 = vsel %vm1074_vm10, %v1809_v28, %v1071_v49  ;;  %vm2657_vm10 = vmor %vm1331_vm15, %vm1330_vm14 }
 0x235   :  { %v1088_v53 = vmul.f32 %v1075_v40, %v1040_v47 }
 0x236   :  { %v1079_v10 = vmul.f32 0.5, %v1078_v63  ;;  %1109 = vperm.xlu2 %1803, %v1087_v38   ;;  %v1095_v59 = vmul.f32 %v1087_v38, %v2538_v29 }
 0x237   :  { %1114 = vperm.xlu0 %1801, %v1088_v53   ;;  %v1096_v14 = vmul.f32 %v1088_v53, %v2542_v56 }
 0x238   :  { %v1080_v16 = vsub.f32 1.5, %v1079_v10  ;;  %v1099_v1 = vsub.f32 %v1091_v13, %v1095_v59 }
 0x239   :  { %v1100_v55 = vsub.f32 %v1092_v15, %v1096_v14 }
 0x23a   :  { %v1081_v24 = vmul.f32 %v1811_v26, %v1080_v16 }
 0x23c   :  { %v1085_v3 = vsel %vm1084_vm13, %v1811_v26, %v1081_v24 }
 0x23d   :  { %v1089_v28 = vmul.f32 %v1085_v3, %v1041_v60 }
 0x23e   :  { %1137 = vperm.xlu2 %1803, %v1099_v1  }
 0x23f   :  { %1119 = vperm.xlu1 %1802, %v1089_v28   ;;  %v1097_v29 = vmul.f32 %v1089_v28, %v2565_v4 }
 0x241   :  { %v1101_v8 = vsub.f32 %v1093_v7, %v1097_v29 }
 0x243   :  { %1147 = vperm.xlu0 %1801, %v1101_v8  }
 0x247   :  { %1142 = vperm.xlu1 %1802, %v1100_v55  }
 0x290   :  { %v1110_v19 = vpop.permute.xlu2 %1109 }
 0x291   :  { %v1105_v31 = vpop.permute.xlu1 %1104  ;;  %v1124_v23 = vmul.f32 %v1110_v19, %v2386_v11  ;;  %v1125_v27 = vmul.f32 %v1110_v19, %v2382_v9  ;;  %v1184_v26 = vmul.f32 %v1110_v19, %v2424_v54  ;;  %v1185_v4 = vmul.f32 %v1110_v19, %v2422_v52 }
 0x292   :  { %v1122_v58 = vmul.f32 %v1105_v31, %v2373_v6  ;;  %v1123_v56 = vmul.f32 %v1105_v31, %v2371_v62  ;;  %v1182_v35 = vmul.f32 %v1105_v31, %v2415_v44  ;;  %v1183_v37 = vmul.f32 %v1105_v31, %v2413_v42 }
 0x293   :  { %v1230_v47 = vmul.f32 %v1105_v31, %v2453_v30  ;;  %v1231_v49 = vmul.f32 %v1105_v31, %v2448_v20  ;;  %v1278_v11 = vmul.f32 %v1105_v31, %v2487_v12  ;;  %v1279_v9 = vmul.f32 %v1105_v31, %v2485_v18 }
 0x294   :  { %v1232_v54 = vmul.f32 %v1110_v19, %v2462_v45  ;;  %v2649_v52 = vmul.f32 %v1110_v19, %v2457_v36  ;;  %v1280_v62 = vmul.f32 %v1110_v19, %v2500_v41  ;;  %v2653_v6 = vmul.f32 %v1110_v19, %v2498_v39 }
 0x295   :  { %v1133_v46 = vpop.permute.xlu0 %1132 }
 0x296   :  { %v1150_v42 = vadd.f32 %v1133_v46, %v1122_v58  ;;  %v1151_v44 = vadd.f32 %v1133_v46, %v1123_v56  ;;  %v1190_v30 = vadd.f32 %v1182_v35, %v1133_v46  ;;  %v1191_v63 = vadd.f32 %v1183_v37, %v1133_v46 }
 0x297   :  { %v1238_v20 = vadd.f32 %v1230_v47, %v1133_v46  ;;  %v1239_v12 = vadd.f32 %v1231_v49, %v1133_v46  ;;  %v1286_v18 = vadd.f32 %v1278_v11, %v1133_v46  ;;  %v1287_v38 = vadd.f32 %v1279_v9, %v1133_v46 }
 0x298   :  { %vm1158_vm0 = vcmp.ge.f32.partialorder %v1150_v42, 0.0  ;;  %vm1159_vm1 = vcmp.ge.f32.partialorder %v1151_v44, 0.0  ;;  %v1166_v45 = vmul.f32 0.01, %v1150_v42  ;;  %v1167_v36 = vmul.f32 0.01, %v1151_v44  ;;  %v1138_v60 = vpop.permute.xlu2 %1137 }
 0x299   :  { %vm1198_vm2 = vcmp.ge.f32.partialorder %v1190_v30, 0.0  ;;  %vm1199_vm3 = vcmp.ge.f32.partialorder %v1191_v63, 0.0  ;;  %v1206_v41 = vmul.f32 0.01, %v1190_v30  ;;  %v1207_v40 = vmul.f32 0.01, %v1191_v63 }
 0x29a   :  { %v1174_v39 = vsel %vm1158_vm0, %v1150_v42, %v1166_v45  ;;  %v1175_v53 = vsel %vm1159_vm1, %v1151_v44, %v1167_v36  ;;  %vm1246_vm4 = vcmp.ge.f32.partialorder %v1238_v20, 0.0  ;;  %vm1247_vm5 = vcmp.ge.f32.partialorder %v1239_v12, 0.0 }
 0x29b   :  { %v1214_v10 = vsel %vm1198_vm2, %v1190_v30, %v1206_v41  ;;  %v1215_v16 = vsel %vm1199_vm3, %v1191_v63, %v1207_v40  ;;  %v1254_v59 = vmul.f32 0.01, %v1238_v20  ;;  %v1255_v13 = vmul.f32 0.01, %v1239_v12 }
 0x29c   :  { %v1222_v24 = vmax.f32 %v1174_v39, %v1214_v10  ;;  %v1223_v1 = vmax.f32 %v1175_v53, %v1215_v16  ;;  %vm1294_vm6 = vcmp.ge.f32.partialorder %v1286_v18, 0.0  ;;  %vm1295_vm7 = vcmp.ge.f32.partialorder %v1287_v38, 0.0 }
 0x29d   :  { %v1262_v3 = vsel %vm1246_vm4, %v1238_v20, %v1254_v59  ;;  %v1263_v28 = vsel %vm1247_vm5, %v1239_v12, %v1255_v13  ;;  %v1302_v7 = vmul.f32 0.01, %v1286_v18  ;;  %v1303_v29 = vmul.f32 0.01, %v1287_v38 }
 0x29e   :  { %v1270_v8 = vmax.f32 %v1222_v24, %v1262_v3  ;;  %v1271_v14 = vmax.f32 %v1223_v1, %v1263_v28  ;;  %v1152_v15 = vadd.f32 %v1138_v60, %v1124_v23  ;;  %v1153_v55 = vadd.f32 %v1138_v60, %v1125_v27 }
 0x29f   :  { %v1310_v19 = vsel %vm1294_vm6, %v1286_v18, %v1302_v7  ;;  %v1311_v31 = vsel %vm1295_vm7, %v1287_v38, %v1303_v29  ;;  %v1192_v58 = vadd.f32 %v1184_v26, %v1138_v60  ;;  %v1193_v56 = vadd.f32 %v1185_v4, %v1138_v60 }
 0x2a0   :  { %v1318_v35 = vmax.f32 %v1270_v8, %v1310_v19  ;;  %v1319_v37 = vmax.f32 %v1271_v14, %v1311_v31  ;;  %vm1160_vm8 = vcmp.ge.f32.partialorder %v1152_v15, 0.0  ;;  %vm1161_vm9 = vcmp.ge.f32.partialorder %v1153_v55, 0.0 }
 0x2a1   :  { %v1168_v49 = vmul.f32 0.01, %v1152_v15  ;;  %v1169_v11 = vmul.f32 0.01, %v1153_v55  ;;  %vm1200_vm11 = vcmp.ge.f32.partialorder %v1192_v58, 0.0  ;;  %vm1201_vm12 = vcmp.ge.f32.partialorder %v1193_v56, 0.0 }
 0x2a2   :  { %v1326_v23 = vpack.c.bf16 %v1319_v37, %v1318_v35  ;;  %v1208_v27 = vmul.f32 0.01, %v1192_v58  ;;  %v1209_v9 = vmul.f32 0.01, %v1193_v56  ;;  %v1240_v46 = vadd.f32 %v1232_v54, %v1138_v60 }
 0x2a3   :  { %v1176_v26 = vsel %vm1160_vm8, %v1152_v15, %v1168_v49  ;;  %v1177_v4 = vsel %vm1161_vm9, %v1153_v55, %v1169_v11  ;;  %v1241_v42 = vadd.f32 %v2649_v52, %v1138_v60  ;;  %v1288_v44 = vadd.f32 %v1280_v62, %v1138_v60 }
 0x2a4   :  { %1333 = vst.msk [vmem:[%s2716_s5] sm:$0xff] %vm2657_vm10, %v1326_v23  ;;  %v1216_v30 = vsel %vm1200_vm11, %v1192_v58, %v1208_v27  ;;  %v1217_v63 = vsel %vm1201_vm12, %v1193_v56, %v1209_v9  ;;  %vm1248_vm13 = vcmp.ge.f32.partialorder %v1240_v46, 0.0  ;;  %v1256_v20 = vmul.f32 0.01, %v1240_v46 }
 0x2a5   :  { %v1224_v12 = vmax.f32 %v1176_v26, %v1216_v30  ;;  %v1225_v18 = vmax.f32 %v1177_v4, %v1217_v63  ;;  %vm1249_vm14 = vcmp.ge.f32.partialorder %v1241_v42, 0.0  ;;  %v1257_v38 = vmul.f32 0.01, %v1241_v42 }
 0x2a6   :  { %v1264_v54 = vsel %vm1248_vm13, %v1240_v46, %v1256_v20  ;;  %v1289_v45 = vadd.f32 %v2653_v6, %v1138_v60  ;;  %vm1296_vm15 = vcmp.ge.f32.partialorder %v1288_v44, 0.0  ;;  %v1304_v52 = vmul.f32 0.01, %v1288_v44 }
 0x2a7   :  { %v1265_v62 = vsel %vm1249_vm14, %v1241_v42, %v1257_v38  ;;  %v1272_v36 = vmax.f32 %v1224_v12, %v1264_v54 }
 0x2a8   :  { %v1273_v41 = vmax.f32 %v1225_v18, %v1265_v62  ;;  %vm1297_vm0 = vcmp.ge.f32.partialorder %v1289_v45, 0.0  ;;  %v1305_v40 = vmul.f32 0.01, %v1289_v45  ;;  %v1312_v39 = vsel %vm1296_vm15, %v1288_v44, %v1304_v52 }
 0x2a9   :  { %v1320_v53 = vmax.f32 %v1272_v36, %v1312_v39  ;;  %v1115_v13 = vpop.permute.xlu0 %1114 }
 0x2aa   :  { %v1313_v10 = vsel %vm1297_vm0, %v1289_v45, %v1305_v40  ;;  %v1126_v60 = vmul.f32 %v1115_v13, %v2395_v22  ;;  %v1127_v24 = vmul.f32 %v1115_v13, %v2393_v21  ;;  %v1186_v1 = vmul.f32 %v1115_v13, %v2435_v2 }
 0x2ab   :  { %v1321_v16 = vmax.f32 %v1273_v41, %v1313_v10  ;;  %v1187_v3 = vmul.f32 %v1115_v13, %v2430_v33  ;;  %v2678_v28 = vmul.f32 %v1115_v13, %v2469_v51  ;;  %v2681_v7 = vmul.f32 %v1115_v13, %v2466_v48 }
 0x2ac   :  { %v2684_v29 = vmul.f32 %v1115_v13, %v2502_v43  ;;  %v2687_v8 = vmul.f32 %v1115_v13, %v2495_v25 }
 0x2ad   :  { %v1327_v59 = vpack.c.bf16 %v1321_v16, %v1320_v53 }
 0x2af   :  { %1334 = vst.msk [vmem:[%s2716_s5 + $0x8] sm:$0xff] %vm2657_vm10, %v1327_v59 }
 0x2b1   :  { %v1120_v6 = vpop.permute.xlu1 %1119 }
 0x2b2   :  { %v1128_v22 = vmul.f32 %v1120_v6, %v2406_v34  ;;  %v1129_v21 = vmul.f32 %v1120_v6, %v2404_v32  ;;  %v1188_v2 = vmul.f32 %v1120_v6, %v2444_v17  ;;  %v1189_v33 = vmul.f32 %v1120_v6, %v2439_v5 }
 0x2b3   :  { %v1236_v51 = vmul.f32 %v1120_v6, %v2478_v0  ;;  %v1237_v14 = vmul.f32 %v1120_v6, %v2476_v61  ;;  %v1284_v48 = vmul.f32 %v1120_v6, %v2514_v57  ;;  %v1285_v43 = vmul.f32 %v1120_v6, %v2511_v50 }
 0x2b5   :  { %v1148_v15 = vpop.permute.xlu0 %1147 }
 0x2b6   :  { %v1156_v55 = vadd.f32 %v1148_v15, %v1128_v22  ;;  %v1157_v25 = vadd.f32 %v1148_v15, %v1129_v21  ;;  %v1196_v19 = vadd.f32 %v1188_v2, %v1148_v15  ;;  %v1197_v31 = vadd.f32 %v1189_v33, %v1148_v15 }
 0x2b7   :  { %v1244_v34 = vadd.f32 %v1236_v51, %v1148_v15  ;;  %v1245_v58 = vadd.f32 %v1237_v14, %v1148_v15  ;;  %v1292_v32 = vadd.f32 %v1284_v48, %v1148_v15  ;;  %v1293_v56 = vadd.f32 %v1285_v43, %v1148_v15 }
 0x2b8   :  { %vm1164_vm1 = vcmp.ge.f32.partialorder %v1156_v55, 0.0  ;;  %vm1165_vm2 = vcmp.ge.f32.partialorder %v1157_v25, 0.0  ;;  %v1172_v5 = vmul.f32 0.01, %v1156_v55  ;;  %v1173_v17 = vmul.f32 0.01, %v1157_v25 }
 0x2b9   :  { %vm1204_vm3 = vcmp.ge.f32.partialorder %v1196_v19, 0.0  ;;  %vm1205_vm4 = vcmp.ge.f32.partialorder %v1197_v31, 0.0  ;;  %v1212_v61 = vmul.f32 0.01, %v1196_v19  ;;  %v1213_v0 = vmul.f32 0.01, %v1197_v31  ;;  %v1143_v23 = vpop.permute.xlu1 %1142 }
 0x2ba   :  { %v1180_v57 = vsel %vm1164_vm1, %v1156_v55, %v1172_v5  ;;  %v1181_v35 = vsel %vm1165_vm2, %v1157_v25, %v1173_v17  ;;  %vm1252_vm5 = vcmp.ge.f32.partialorder %v1244_v34, 0.0  ;;  %vm1253_vm6 = vcmp.ge.f32.partialorder %v1245_v58, 0.0 }
 0x2bb   :  { %v1220_v50 = vsel %vm1204_vm3, %v1196_v19, %v1212_v61  ;;  %v1221_v37 = vsel %vm1205_vm4, %v1197_v31, %v1213_v0  ;;  %v1260_v49 = vmul.f32 0.01, %v1244_v34  ;;  %v1261_v11 = vmul.f32 0.01, %v1245_v58 }
 0x2bc   :  { %v1228_v27 = vmax.f32 %v1180_v57, %v1220_v50  ;;  %v1229_v9 = vmax.f32 %v1181_v35, %v1221_v37  ;;  %vm1300_vm7 = vcmp.ge.f32.partialorder %v1292_v32, 0.0  ;;  %vm1301_vm8 = vcmp.ge.f32.partialorder %v1293_v56, 0.0 }
 0x2bd   :  { %v1268_v46 = vsel %vm1252_vm5, %v1244_v34, %v1260_v49  ;;  %v1269_v26 = vsel %vm1253_vm6, %v1245_v58, %v1261_v11  ;;  %v1308_v4 = vmul.f32 0.01, %v1292_v32  ;;  %v1309_v42 = vmul.f32 0.01, %v1293_v56 }
 0x2be   :  { %v1276_v44 = vmax.f32 %v1228_v27, %v1268_v46  ;;  %v1277_v30 = vmax.f32 %v1229_v9, %v1269_v26  ;;  %v1154_v63 = vadd.f32 %v1143_v23, %v1126_v60  ;;  %v1155_v20 = vadd.f32 %v1143_v23, %v1127_v24 }
 0x2bf   :  { %v1316_v12 = vsel %vm1300_vm7, %v1292_v32, %v1308_v4  ;;  %v1317_v18 = vsel %vm1301_vm8, %v1293_v56, %v1309_v42  ;;  %v1194_v38 = vadd.f32 %v1186_v1, %v1143_v23  ;;  %v1195_v54 = vadd.f32 %v1187_v3, %v1143_v23 }
 0x2c0   :  { %v1324_v45 = vmax.f32 %v1276_v44, %v1316_v12  ;;  %v1325_v52 = vmax.f32 %v1277_v30, %v1317_v18  ;;  %vm1162_vm9 = vcmp.ge.f32.partialorder %v1154_v63, 0.0  ;;  %vm1163_vm11 = vcmp.ge.f32.partialorder %v1155_v20, 0.0 }
 0x2c1   :  { %v1170_v62 = vmul.f32 0.01, %v1154_v63  ;;  %v1171_v36 = vmul.f32 0.01, %v1155_v20  ;;  %vm1202_vm12 = vcmp.ge.f32.partialorder %v1194_v38, 0.0  ;;  %vm1203_vm13 = vcmp.ge.f32.partialorder %v1195_v54, 0.0 }
 0x2c2   :  { %v1329_v41 = vpack.c.bf16 %v1325_v52, %v1324_v45  ;;  %v1210_v40 = vmul.f32 0.01, %v1194_v38  ;;  %v1211_v39 = vmul.f32 0.01, %v1195_v54  ;;  %v1242_v53 = vadd.f32 %v2678_v28, %v1143_v23 }
 0x2c3   :  { %v1178_v10 = vsel %vm1162_vm9, %v1154_v63, %v1170_v62  ;;  %v1179_v16 = vsel %vm1163_vm11, %v1155_v20, %v1171_v36  ;;  %v1243_v59 = vadd.f32 %v2681_v7, %v1143_v23  ;;  %v1290_v13 = vadd.f32 %v2684_v29, %v1143_v23 }
 0x2c4   :  { %1336 = vst.msk [vmem:[%s2716_s5 + $0x18] sm:$0xff] %vm2657_vm10, %v1329_v41  ;;  %v1218_v6 = vsel %vm1202_vm12, %v1194_v38, %v1210_v40  ;;  %v1219_v60 = vsel %vm1203_vm13, %v1195_v54, %v1211_v39  ;;  %vm1250_vm14 = vcmp.ge.f32.partialorder %v1242_v53, 0.0  ;;  %v1258_v24 = vmul.f32 0.01, %v1242_v53 }
 0x2c5   :  { %v1226_v1 = vmax.f32 %v1178_v10, %v1218_v6  ;;  %v1227_v3 = vmax.f32 %v1179_v16, %v1219_v60  ;;  %vm1251_vm15 = vcmp.ge.f32.partialorder %v1243_v59, 0.0  ;;  %v1259_v28 = vmul.f32 0.01, %v1243_v59 }
 0x2c6   :  { %v1266_v22 = vsel %vm1250_vm14, %v1242_v53, %v1258_v24  ;;  %v1291_v21 = vadd.f32 %v2687_v8, %v1143_v23  ;;  %vm1298_vm0 = vcmp.ge.f32.partialorder %v1290_v13, 0.0  ;;  %v1306_v7 = vmul.f32 0.01, %v1290_v13 }
 0x2c7   :  { %v1267_v29 = vsel %vm1251_vm15, %v1243_v59, %v1259_v28  ;;  %v1274_v2 = vmax.f32 %v1226_v1, %v1266_v22 }
 0x2c8   :  { %v1275_v33 = vmax.f32 %v1227_v3, %v1267_v29  ;;  %vm1299_vm1 = vcmp.ge.f32.partialorder %v1291_v21, 0.0  ;;  %v1307_v51 = vmul.f32 0.01, %v1291_v21  ;;  %v1314_v14 = vsel %vm1298_vm0, %v1290_v13, %v1306_v7 }
 0x2c9   :  { %v1322_v48 = vmax.f32 %v1274_v2, %v1314_v14 }
 0x2ca   :  { %v1315_v43 = vsel %vm1299_vm1, %v1291_v21, %v1307_v51 }
 0x2cb   :  { %v1323_v15 = vmax.f32 %v1275_v33, %v1315_v43 }
 0x2cd   :  { %v1328_v55 = vpack.c.bf16 %v1323_v15, %v1322_v48 }
 0x2cf   :  { %1335 = vst.msk [vmem:[%s2716_s5 + $0x10] sm:$0xff] %vm2657_vm10, %v1328_v55 }

// kernel: audio_magic_net_forward.6
= control target key start
LH: loop header
LB: loop body
LE: loop exit
PB: predicated region body
PF: predicated region fallthrough
CT: control target
= control target key end

     0   :  { %vm289_vm0 = vcmask 261120   ;;  %v2383_v20 = vmov 0   ;;  %vm389_vm1 = vcmask 490496   ;;  %s3297_s0 = inlined_call_operand.vmem [shape: bf16[4,288,60], index: 0, kind: input, shape index: {}]   ;;  %s3298_s1 = inlined_call_operand.vmem [shape: bf16[64,288], index: 1, kind: input, shape index: {}]   ;;  %s3299_s2 = inlined_call_operand.vmem [shape: f32[64,1], index: 2, kind: input, shape index: {}]   ;;  %s3300_s3 = inlined_call_operand.vmem [shape: f32[64,1], index: 3, kind: input, shape index: {}]   ;;  %s3301_s4 = inlined_call_operand.vmem [shape: f32[64,1], index: 4, kind: input, shape index: {}]   ;;  %s3302_s5 = inlined_call_operand.vmem [shape: bf16[64,60], index: 5, kind: output, shape index: {}]  }
   0x1   :  { %v2298_v0 = vld [vmem:[%s3297_s0 + $0x38] sm:$0xff]  ;;  %v2308_v2 = vld [vmem:[%s3297_s0 + $0x88] sm:$0xff]  ;;  %v2297_v4 = vld [vmem:[%s3297_s0 + $0x30] sm:$0xff]  ;;  %2364 = vset.pattern.permute.xlu0 %v2383_v20  ;;  %2365 = vset.pattern.permute.xlu1 %v2383_v20 }
   0x2   :  { %v2306_v1 = vld [vmem:[%s3297_s0 + $0x78] sm:$0xff]  ;;  %v2316_v3 = vld [vmem:[%s3297_s0 + $0xc8] sm:$0xff]  ;;  %302 = vmatpush.bf16.msra.mxu0 %v2298_v0  ;;  %v2305_v5 = vld [vmem:[%s3297_s0 + $0x70] sm:$0xff]  ;;  %366 = vmatpush.bf16.msra.mxu2 %v2308_v2 }
   0x3   :  { %331 = vmatpush.bf16.msra.mxu1 %v2306_v1  ;;  %v2307_v6 = vld [vmem:[%s3297_s0 + $0x80] sm:$0xff]  ;;  %559 = vmatpush.bf16.msra.mxu3 %v2316_v3  ;;  %v1829_v8 = vld [vmem:[%s3298_s1 + $0x8] sm:$0xf]  ;;  %v2281_v9 = vld [vmem:[%s3298_s1 + $0x10] sm:$0xf0] }
   0x4   :  { %v2315_v7 = vld [vmem:[%s3297_s0 + $0xc0] sm:$0xff]  ;;  %v2324_v10 = vld [vmem:[%s3297_s0 + $0x108] sm:$0xff]  ;;  %v2447_v11 = vor.u32 %v2281_v9, %v1829_v8  ;;  %v2314_v14 = vld [vmem:[%s3297_s0 + $0xb8] sm:$0xff]  ;;  %2366 = vset.pattern.permute.xlu2 %v2383_v20 }
   0x5   :  { %v2296_v12 = vld [vmem:[%s3297_s0 + $0x28] sm:$0xff]  ;;  %v2323_v15 = vld [vmem:[%s3297_s0 + $0x100] sm:$0xff]  ;;  %v2313_v18 = vld [vmem:[%s3297_s0 + $0xb0] sm:$0xff] }
   0x6   :  { %303 = vmatpush.bf16.msra.mxu0 %v2297_v4  ;;  %367 = vmatpush.bf16.msra.mxu2 %v2307_v6  ;;  %v2304_v13 = vld [vmem:[%s3297_s0 + $0x68] sm:$0xff]  ;;  %v2295_v16 = vld [vmem:[%s3297_s0 + $0x20] sm:$0xff]  ;;  %v2322_v19 = vld [vmem:[%s3297_s0 + $0xf8] sm:$0xff] }
   0x7   :  { %332 = vmatpush.bf16.msra.mxu1 %v2305_v5  ;;  %560 = vmatpush.bf16.msra.mxu3 %v2315_v7  ;;  %v2303_v17 = vld [vmem:[%s3297_s0 + $0x60] sm:$0xff]  ;;  %v2294_v21 = vld [vmem:[%s3297_s0 + $0x18] sm:$0xff]  ;;  %v2312_v23 = vld [vmem:[%s3297_s0 + $0xa8] sm:$0xff] }
   0x8   :  { %v2302_v22 = vld [vmem:[%s3297_s0 + $0x58] sm:$0xff]  ;;  %v73_v24 = vld [vmem:[%s3299_s2] sm:$0xff]  ;;  %v2321_v25 = vld [vmem:[%s3297_s0 + $0xf0] sm:$0xff] }
   0x9   :  { %1939 = vmatmul.msk.bf16.vlgmr.msra.gmra.mxu2 %vm289_vm0, %v2447_v11  ;;  %83 = vperm.xlu0 %2364, %v73_v24   ;;  %v2293_v26 = vld [vmem:[%s3297_s0 + $0x10] sm:$0xff]  ;;  %v2311_v28 = vld [vmem:[%s3297_s0 + $0xa0] sm:$0xff]  ;;  %v2284_v30 = vld [vmem:[%s3298_s1 + $0x28] sm:$0xf0] }
   0xa   :  { %588 = vmatpush.bf16.msrb.mxu2 %v2324_v10  ;;  %304 = vmatpush.bf16.msra.mxu0 %v2296_v12  ;;  %v2301_v27 = vld [vmem:[%s3297_s0 + $0x50] sm:$0xff]  ;;  %v1841_v29 = vld [vmem:[%s3298_s1 + $0x20] sm:$0xf]  ;;  %v2320_v31 = vld [vmem:[%s3297_s0 + $0xe8] sm:$0xff] }
   0xb   :  { %333 = vmatpush.bf16.msra.mxu1 %v2304_v13  ;;  %561 = vmatpush.bf16.msra.mxu3 %v2314_v14  ;;  %v74_v32 = vld [vmem:[%s3299_s2 + $0x8] sm:$0xff]  ;;  %v2511_v33 = vor.u32 %v2284_v30, %v1841_v29  ;;  %v2310_v36 = vld [vmem:[%s3297_s0 + $0x98] sm:$0xff]  ;;  %v2319_v37 = vld [vmem:[%s3297_s0 + $0xe0] sm:$0xff] }
   0xc   :  { %v2292_v34 = vld [vmem:[%s3297_s0 + $0x8] sm:$0xff]  ;;  %v2291_v38 = vld [vmem:[%s3297_s0] sm:$0xff]  ;;  %v75_v42 = vld [vmem:[%s3299_s2 + $0x10] sm:$0xff] }
   0xd   :  { %v2300_v35 = vld [vmem:[%s3297_s0 + $0x48] sm:$0xff]  ;;  %v2299_v39 = vld [vmem:[%s3297_s0 + $0x40] sm:$0xff]  ;;  %v2309_v43 = vld [vmem:[%s3297_s0 + $0x90] sm:$0xff]  ;;  %93 = vperm.xlu1 %2365, %v75_v42  }
   0xe   :  { %589 = vmatpush.bf16.msrb.mxu2 %v2323_v15  ;;  %305 = vmatpush.bf16.msra.mxu0 %v2295_v16  ;;  %v1821_v40 = vld [vmem:[%s3298_s1] sm:$0xf]  ;;  %v2280_v41 = vld [vmem:[%s3298_s1 + $0x8] sm:$0xf0]  ;;  %v2279_v44 = vld [vmem:[%s3298_s1 + $0x4] sm:$0xf] }
   0xf   :  { %334 = vmatpush.bf16.msra.mxu1 %v2303_v17  ;;  %562 = vmatpush.bf16.msra.mxu3 %v2313_v18  ;;  %v1823_v45 = vld [vmem:[%s3298_s1 + $0xc] sm:$0xf0]  ;;  %v2326_v46 = vld [vmem:[%s3297_s0 + $0x118] sm:$0xff]  ;;  %v2557_v48 = vor.u32 %v2280_v41, %v1821_v40  ;;  %v2287_v56 = vld [vmem:[%s3298_s1 + $0x40] sm:$0xf0] }
  0x10   :  { %v2342_v47 = vld [vmem:[%s3297_s0 + $0x198] sm:$0xff]  ;;  %v2562_v50 = vor.u32 %v2279_v44, %v1823_v45  ;;  %v2341_v52 = vld [vmem:[%s3297_s0 + $0x190] sm:$0xff]  ;;  %v2340_v59 = vld [vmem:[%s3297_s0 + $0x188] sm:$0xff] }
  0x11   :  { %88 = vperm.xlu0 %2364, %v74_v32   ;;  %v2334_v49 = vld [vmem:[%s3297_s0 + $0x158] sm:$0xff]  ;;  %v2333_v53 = vld [vmem:[%s3297_s0 + $0x150] sm:$0xff]  ;;  %v2332_v60 = vld [vmem:[%s3297_s0 + $0x148] sm:$0xff] }
  0x12   :  { %590 = vmatpush.bf16.msrb.mxu2 %v2322_v19  ;;  %306 = vmatpush.bf16.msra.mxu0 %v2294_v21  ;;  %v2318_v51 = vld [vmem:[%s3297_s0 + $0xd8] sm:$0xff]  ;;  %v2325_v55 = vld [vmem:[%s3297_s0 + $0x110] sm:$0xff]  ;;  %v2339_v62 = vld [vmem:[%s3297_s0 + $0x180] sm:$0xff] }
  0x13   :  { %335 = vmatpush.bf16.msra.mxu1 %v2302_v22  ;;  %563 = vmatpush.bf16.msra.mxu3 %v2312_v23  ;;  %v1853_v54 = vld [vmem:[%s3298_s1 + $0x38] sm:$0xf]  ;;  %v2317_v57 = vld [vmem:[%s3297_s0 + $0xd0] sm:$0xff]  ;;  %v2331_v63 = vld [vmem:[%s3297_s0 + $0x140] sm:$0xff] }
  0x14   :  { %v76_v58 = vld [vmem:[%s3299_s2 + $0x18] sm:$0xff]  ;;  %v2597_v61 = vor.u32 %v2287_v56, %v1853_v54  ;;  %v2283_v1 = vld [vmem:[%s3298_s1 + $0x20] sm:$0xf0]  ;;  %v2344_v2 = vld [vmem:[%s3297_s0 + $0x1a8] sm:$0xff] }
  0x15   :  { %98 = vperm.xlu1 %2365, %v76_v58   ;;  %v1833_v0 = vld [vmem:[%s3298_s1 + $0x18] sm:$0xf]  ;;  %v2282_v3 = vld [vmem:[%s3298_s1 + $0x1c] sm:$0xf]  ;;  %v1835_v4 = vld [vmem:[%s3298_s1 + $0x24] sm:$0xf0] }
  0x16   :  { %591 = vmatpush.bf16.msrb.mxu2 %v2321_v25  ;;  %307 = vmatpush.bf16.msra.mxu0 %v2293_v26  ;;  %v2338_v5 = vld [vmem:[%s3297_s0 + $0x178] sm:$0xff]  ;;  %v2625_v6 = vor.u32 %v2283_v1, %v1833_v0  ;;  %v2630_v8 = vor.u32 %v2282_v3, %v1835_v4  ;;  %v2337_v9 = vld [vmem:[%s3297_s0 + $0x170] sm:$0xff]  ;;  %v2336_v14 = vld [vmem:[%s3297_s0 + $0x168] sm:$0xff] }
  0x17   :  { %336 = vmatpush.bf16.msra.mxu1 %v2301_v27  ;;  %564 = vmatpush.bf16.msra.mxu3 %v2311_v28  ;;  %v2330_v7 = vld [vmem:[%s3297_s0 + $0x138] sm:$0xff]  ;;  %v2329_v10 = vld [vmem:[%s3297_s0 + $0x130] sm:$0xff]  ;;  %v2328_v15 = vld [vmem:[%s3297_s0 + $0x128] sm:$0xff] }
  0x18   :  { %v1865_v12 = vld [vmem:[%s3298_s1 + $0x50] sm:$0xf]  ;;  %v2290_v13 = vld [vmem:[%s3298_s1 + $0x58] sm:$0xf0]  ;;  %v2335_v19 = vld [vmem:[%s3297_s0 + $0x160] sm:$0xff] }
  0x19   :  { %1940 = vmatmul.msk.bf16.gmra.mxu2 %vm289_vm0, %v2511_v33  ;;  %v2653_v16 = vor.u32 %v2290_v13, %v1865_v12  ;;  %v1845_v17 = vld [vmem:[%s3298_s1 + $0x30] sm:$0xf]  ;;  %v2286_v18 = vld [vmem:[%s3298_s1 + $0x38] sm:$0xf0]  ;;  %v2327_v21 = vld [vmem:[%s3297_s0 + $0x120] sm:$0xff] }
  0x1a   :  { %592 = vmatpush.bf16.msrb.mxu2 %v2320_v31  ;;  %308 = vmatpush.bf16.msra.mxu0 %v2292_v34  ;;  %v79_v20 = vld [vmem:[%s3299_s2 + $0x30] sm:$0xff]  ;;  %v1847_v23 = vld [vmem:[%s3298_s1 + $0x3c] sm:$0xf0]  ;;  %v2678_v24 = vor.u32 %v2286_v18, %v1845_v17  ;;  %v2362_v26 = vld [vmem:[%s3297_s0 + $0x238] sm:$0xff] }
  0x1b   :  { %337 = vmatpush.bf16.msra.mxu1 %v2300_v35  ;;  %565 = vmatpush.bf16.msra.mxu3 %v2310_v36  ;;  %v2285_v22 = vld [vmem:[%s3298_s1 + $0x34] sm:$0xf]  ;;  %v77_v27 = vld [vmem:[%s3299_s2 + $0x20] sm:$0xff]  ;;  %v80_v28 = vld [vmem:[%s3299_s2 + $0x38] sm:$0xff] }
  0x1c   :  { %113 = vperm.xlu0 %2364, %v79_v20   ;;  %v2680_v25 = vor.u32 %v2285_v22, %v1847_v23  ;;  %103 = vperm.xlu2 %2366, %v77_v27   ;;  %v2352_v29 = vld [vmem:[%s3297_s0 + $0x1e8] sm:$0xff]  ;;  %v2289_v32 = vld [vmem:[%s3298_s1 + $0x50] sm:$0xf0]  ;;  %v2343_v34 = vld [vmem:[%s3297_s0 + $0x1a0] sm:$0xff] }
  0x1d   :  { %118 = vperm.xlu1 %2365, %v80_v28   ;;  %v2360_v30 = vld [vmem:[%s3297_s0 + $0x228] sm:$0xff]  ;;  %v2351_v36 = vld [vmem:[%s3297_s0 + $0x1e0] sm:$0xff]  ;;  %v2350_v42 = vld [vmem:[%s3297_s0 + $0x1d8] sm:$0xff] }
  0x1e   :  { %593 = vmatpush.bf16.msrb.mxu2 %v2319_v37  ;;  %309 = vmatpush.bf16.msra.mxu0 %v2291_v38  ;;  %v1857_v31 = vld [vmem:[%s3298_s1 + $0x48] sm:$0xf]  ;;  %v2288_v37 = vld [vmem:[%s3298_s1 + $0x4c] sm:$0xf]  ;;  %v1859_v38 = vld [vmem:[%s3298_s1 + $0x54] sm:$0xf0] }
  0x1f   :  { %338 = vmatpush.bf16.msra.mxu1 %v2299_v39  ;;  %566 = vmatpush.bf16.msra.mxu3 %v2309_v43  ;;  %v78_v35 = vld [vmem:[%s3299_s2 + $0x28] sm:$0xff]  ;;  %v2359_v39 = vld [vmem:[%s3297_s0 + $0x220] sm:$0xff]  ;;  %v2725_v40 = vor.u32 %v2289_v32, %v1857_v31  ;;  %v2727_v41 = vor.u32 %v2288_v37, %v1859_v38  ;;  %v2358_v43 = vld [vmem:[%s3297_s0 + $0x218] sm:$0xff] }
  0x20   :  { %v2349_v44 = vld [vmem:[%s3297_s0 + $0x1d0] sm:$0xff]  ;;  %v2354_v54 = vld [vmem:[%s3297_s0 + $0x1f8] sm:$0xff] }
  0x21   :  { %310 = vmatmul.bf16.vlgmr.msra.gmra.mxu0 %v2557_v48  ;;  %v2357_v45 = vld [vmem:[%s3297_s0 + $0x210] sm:$0xff] }
  0x22   :  { %623 = vmatpush.bf16.msrb.mxu0 %v2326_v46  ;;  %339 = vmatmul.bf16.vlgmr.msra.gmra.mxu1 %v2562_v50  ;;  %v2361_v46 = vld [vmem:[%s3297_s0 + $0x230] sm:$0xff] }
  0x23   :  { %852 = vmatpush.bf16.msrb.mxu3 %v2342_v47  ;;  %823 = vmatpush.bf16.msrb.mxu1 %v2334_v49  ;;  %v2348_v47 = vld [vmem:[%s3297_s0 + $0x1c8] sm:$0xff]  ;;  %v2353_v56 = vld [vmem:[%s3297_s0 + $0x1f0] sm:$0xff] }
  0x24   :  { %567 = vmatmul.bf16.vlgmr.msra.gmra.mxu3 %v2557_v48  ;;  %594 = vmatpush.bf16.msrb.mxu2 %v2318_v51  ;;  %v2356_v49 = vld [vmem:[%s3297_s0 + $0x208] sm:$0xff]  ;;  %v2347_v51 = vld [vmem:[%s3297_s0 + $0x1c0] sm:$0xff] }
  0x25   :  { %108 = vperm.xlu2 %2366, %v78_v35  }
  0x26   :  { %624 = vmatpush.bf16.msrb.mxu0 %v2325_v55  ;;  %v2345_v55 = vld [vmem:[%s3297_s0 + $0x1b0] sm:$0xff] }
  0x27   :  { %853 = vmatpush.bf16.msrb.mxu3 %v2341_v52  ;;  %824 = vmatpush.bf16.msrb.mxu1 %v2333_v53  ;;  %v2355_v52 = vld [vmem:[%s3297_s0 + $0x200] sm:$0xff]  ;;  %v2346_v53 = vld [vmem:[%s3297_s0 + $0x1b8] sm:$0xff] }
  0x28   :  { %595 = vmatpush.bf16.msrb.mxu2 %v2317_v57 }
  0x29   :  { %1941 = vmatmul.msk.bf16.gmra.mxu2 %vm289_vm0, %v2597_v61 }
  0x2a   :  { %1087 = vmatpush.bf16.msra.mxu0 %v2352_v29 }
  0x2b   :  { %854 = vmatpush.bf16.msrb.mxu3 %v2340_v59  ;;  %825 = vmatpush.bf16.msrb.mxu1 %v2332_v60 }
  0x2c   :  { %887 = vmatpush.bf16.msra.mxu2 %v2344_v2 }
  0x2e   :  { %1088 = vmatpush.bf16.msra.mxu0 %v2351_v36 }
  0x2f   :  { %855 = vmatpush.bf16.msrb.mxu3 %v2339_v62  ;;  %826 = vmatpush.bf16.msrb.mxu1 %v2331_v63 }
  0x30   :  { %888 = vmatpush.bf16.msra.mxu2 %v2343_v34 }
  0x31   :  { %315 = vmatmul.bf16.gmra.mxu0 %v2625_v6 }
  0x32   :  { %344 = vmatmul.bf16.gmra.mxu1 %v2630_v8  ;;  %1089 = vmatpush.bf16.msra.mxu0 %v2350_v42 }
  0x33   :  { %856 = vmatpush.bf16.msrb.mxu3 %v2338_v5  ;;  %827 = vmatpush.bf16.msrb.mxu1 %v2330_v7 }
  0x34   :  { %572 = vmatmul.bf16.gmra.mxu3 %v2625_v6 }
  0x36   :  { %1090 = vmatpush.bf16.msra.mxu0 %v2349_v44 }
  0x37   :  { %857 = vmatpush.bf16.msrb.mxu3 %v2337_v9  ;;  %828 = vmatpush.bf16.msrb.mxu1 %v2329_v10 }
  0x39   :  { %1942 = vmatmul.msk.bf16.gmra.mxu2 %vm289_vm0, %v2653_v16 }
  0x3a   :  { %1091 = vmatpush.bf16.msra.mxu0 %v2348_v47 }
  0x3b   :  { %858 = vmatpush.bf16.msrb.mxu3 %v2336_v14  ;;  %829 = vmatpush.bf16.msrb.mxu1 %v2328_v15 }
  0x3e   :  { %1092 = vmatpush.bf16.msra.mxu0 %v2347_v51 }
  0x3f   :  { %859 = vmatpush.bf16.msrb.mxu3 %v2335_v19  ;;  %830 = vmatpush.bf16.msrb.mxu1 %v2327_v21 }
  0x41   :  { %320 = vmatmul.bf16.gmra.mxu0 %v2678_v24 }
  0x42   :  { %349 = vmatmul.bf16.gmra.mxu1 %v2680_v25  ;;  %1093 = vmatpush.bf16.msra.mxu0 %v2346_v53 }
  0x43   :  { %1151 = vmatpush.bf16.msra.mxu3 %v2362_v26  ;;  %1116 = vmatpush.bf16.msra.mxu1 %v2360_v30 }
  0x44   :  { %577 = vmatmul.bf16.gmra.mxu3 %v2678_v24 }
  0x46   :  { %1094 = vmatpush.bf16.msra.mxu0 %v2345_v55 }
  0x47   :  { %1117 = vmatpush.bf16.msra.mxu1 %v2359_v39  ;;  %1152 = vmatpush.bf16.msra.mxu3 %v2361_v46 }
  0x49   :  { %596 = vmatmul.bf16.vlgmr.msrb.gmra.mxu2 %v2562_v50 }
  0x4b   :  { %1118 = vmatpush.bf16.msra.mxu1 %v2358_v43 }
  0x4f   :  { %1119 = vmatpush.bf16.msra.mxu1 %v2357_v45 }
  0x51   :  { %325 = vmatmul.bf16.gmra.mxu0 %v2725_v40 }
  0x52   :  { %354 = vmatmul.bf16.gmra.mxu1 %v2727_v41 }
  0x53   :  { %1120 = vmatpush.bf16.msra.mxu1 %v2356_v49 }
  0x54   :  { %582 = vmatmul.bf16.gmra.mxu3 %v2725_v40 }
  0x57   :  { %1121 = vmatpush.bf16.msra.mxu1 %v2355_v52 }
  0x59   :  { %601 = vmatmul.bf16.gmra.mxu2 %v2630_v8 }
  0x5b   :  { %1122 = vmatpush.bf16.msra.mxu1 %v2354_v54 }
  0x5f   :  { %1123 = vmatpush.bf16.msra.mxu1 %v2353_v56 }
  0x61   :  { %2051 = vmatmul.msk.bf16.vlgmr.msrb.gmra.mxu0 %vm289_vm0, %v2447_v11 }
  0x62   :  { %831 = vmatmul.bf16.vlgmr.msrb.gmra.mxu1 %v2557_v48 }
  0x64   :  { %860 = vmatmul.bf16.vlgmr.msrb.gmra.mxu3 %v2562_v50 }
  0x69   :  { %606 = vmatmul.bf16.gmra.mxu2 %v2680_v25 }
  0x71   :  { %2052 = vmatmul.msk.bf16.gmra.mxu0 %vm289_vm0, %v2511_v33 }
  0x72   :  { %836 = vmatmul.bf16.gmra.mxu1 %v2625_v6 }
  0x74   :  { %865 = vmatmul.bf16.gmra.mxu3 %v2630_v8 }
  0x79   :  { %611 = vmatmul.bf16.gmra.mxu2 %v2727_v41 }
  0x7b   :  { %v2794_v59 = vpop.permute.xlu0 %83 }
  0x81   :  { %2053 = vmatmul.msk.bf16.gmra.mxu0 %vm289_vm0, %v2597_v61 }
  0x82   :  { %841 = vmatmul.bf16.gmra.mxu1 %v2678_v24 }
  0x83   :  { %v2803_v3 = vpop.permute.xlu0 %88 }
  0x84   :  { %870 = vmatmul.bf16.gmra.mxu3 %v2680_v25 }
  0x89   :  { %2163 = vmatmul.msk.bf16.vlgmr.msra.gmra.mxu2 %vm289_vm0, %v2447_v11 }
  0x8c   :  { %v369_v57 = vpop.f32.mrf.mxu2 }
  0x91   :  { %2054 = vmatmul.msk.bf16.gmra.mxu0 %vm289_vm0, %v2653_v16 }
  0x92   :  { %846 = vmatmul.bf16.gmra.mxu1 %v2725_v40 }
  0x94   :  { %875 = vmatmul.bf16.gmra.mxu3 %v2727_v41  ;;  %v371_v58 = vpop.f32.mrf.mxu2 }
  0x99   :  { %2164 = vmatmul.msk.bf16.gmra.mxu2 %vm289_vm0, %v2511_v33 }
  0x9c   :  { %v374_v60 = vpop.f32.mrf.mxu2 }
  0x9e   :  { %v311_v62 = vpop.f32.mrf.mxu0 }
  0x9f   :  { %v312_v63 = vadd.f32 %v311_v62, %v2794_v59  ;;  %v340_v0 = vpop.f32.mrf.mxu1 }
  0xa1   :  { %v341_v1 = vadd.f32 %v340_v0, %v312_v63  ;;  %1095 = vmatmul.bf16.vlgmr.msra.gmra.mxu0 %v2557_v48 }
  0xa2   :  { %1124 = vmatmul.bf16.vlgmr.msra.gmra.mxu1 %v2562_v50 }
  0xa3   :  { %v2801_v2 = vadd.f32 %v369_v57, %v341_v1 }
  0xa4   :  { %2275 = vmatmul.msk.bf16.vlgmr.msra.gmra.mxu3 %vm289_vm0, %v2447_v11  ;;  %v376_v4 = vpop.f32.mrf.mxu2  ;;  %v2812_v11 = vpop.permute.xlu1 %93 }
  0xa5   :  { %v390_v7 = vsel %vm389_vm1, %v2801_v2, 0.0 }
  0xa6   :  { %v313_v9 = vpop.f32.mrf.mxu0  ;;  %391 = vadd.xlane.f32.xlu2 %v390_v7 }
  0xa7   :  { %v2805_v5 = vpop.f32.mrf.mxu3  ;;  %v314_v48 = vadd.f32 %v313_v9, %v2803_v3  ;;  %v342_v10 = vpop.f32.mrf.mxu1 }
  0xa9   :  { %v343_v50 = vadd.f32 %v342_v10, %v314_v48  ;;  %2165 = vmatmul.msk.bf16.gmra.mxu2 %vm289_vm0, %v2597_v61 }
  0xab   :  { %v2814_v12 = vadd.f32 %v371_v58, %v343_v50 }
  0xac   :  { %v379_v13 = vpop.f32.mrf.mxu2  ;;  %v2827_v22 = vpop.permute.xlu1 %98 }
  0xad   :  { %v393_v15 = vsel %vm389_vm1, %v2814_v12, 0.0 }
  0xae   :  { %v316_v17 = vpop.f32.mrf.mxu0  ;;  %394 = vadd.xlane.f32.xlu0 %v393_v15 }
  0xaf   :  { %v2816_v14 = vpop.f32.mrf.mxu3  ;;  %v317_v18 = vadd.f32 %v316_v17, %v2812_v11  ;;  %v345_v19 = vpop.f32.mrf.mxu1 }
  0xb1   :  { %v346_v20 = vadd.f32 %v345_v19, %v317_v18  ;;  %1100 = vmatmul.bf16.gmra.mxu0 %v2625_v6 }
  0xb2   :  { %1129 = vmatmul.bf16.gmra.mxu1 %v2630_v8 }
  0xb3   :  { %v2825_v21 = vadd.f32 %v374_v60, %v346_v20 }
  0xb4   :  { %2276 = vmatmul.msk.bf16.gmra.mxu3 %vm289_vm0, %v2511_v33  ;;  %v381_v23 = vpop.f32.mrf.mxu2  ;;  %v2836_v33 = vpop.permute.xlu2 %103 }
  0xb5   :  { %v396_v27 = vsel %vm389_vm1, %v2825_v21, 0.0  ;;  %v2873_v60 = vpop.permute.xlu1 %118 }
  0xb6   :  { %v318_v28 = vpop.f32.mrf.mxu0  ;;  %397 = vadd.xlane.f32.xlu1 %v396_v27 }
  0xb7   :  { %v2829_v26 = vpop.f32.mrf.mxu3  ;;  %v319_v29 = vadd.f32 %v318_v28, %v2827_v22  ;;  %v347_v6 = vpop.f32.mrf.mxu1 }
  0xb9   :  { %v348_v30 = vadd.f32 %v347_v6, %v319_v29  ;;  %2166 = vmatmul.msk.bf16.gmra.mxu2 %vm289_vm0, %v2653_v16 }
  0xbb   :  { %v2838_v8 = vadd.f32 %v376_v4, %v348_v30  ;;  %v574_v30 = vadd.f32 %v2829_v26, %v2812_v11 }
  0xbc   :  { %v384_v31 = vpop.f32.mrf.mxu2  ;;  %v2851_v42 = vpop.permute.xlu2 %108 }
  0xbd   :  { %v399_v34 = vsel %vm389_vm1, %v2838_v8, 0.0 }
  0xbe   :  { %v321_v35 = vpop.f32.mrf.mxu0  ;;  %400 = vadd.xlane.f32.xlu2 %v399_v34 }
  0xbf   :  { %v2840_v32 = vpop.f32.mrf.mxu3  ;;  %v322_v36 = vadd.f32 %v321_v35, %v2836_v33  ;;  %v350_v37 = vpop.f32.mrf.mxu1 }
  0xc1   :  { %v351_v38 = vadd.f32 %v350_v37, %v322_v36  ;;  %1105 = vmatmul.bf16.gmra.mxu0 %v2678_v24 }
  0xc2   :  { %1134 = vmatmul.bf16.gmra.mxu1 %v2680_v25 }
  0xc3   :  { %v2849_v39 = vadd.f32 %v379_v13, %v351_v38 }
  0xc4   :  { %2277 = vmatmul.msk.bf16.gmra.mxu3 %vm289_vm0, %v2597_v61  ;;  %v386_v43 = vpop.f32.mrf.mxu2  ;;  %v2860_v61 = vpop.permute.xlu0 %113 }
  0xc5   :  { %v402_v45 = vsel %vm389_vm1, %v2849_v39, 0.0 }
  0xc6   :  { %v323_v46 = vpop.f32.mrf.mxu0  ;;  %403 = vadd.xlane.f32.xlu2 %v402_v45 }
  0xc7   :  { %v2853_v44 = vpop.f32.mrf.mxu3  ;;  %v324_v47 = vadd.f32 %v323_v46, %v2851_v42  ;;  %v352_v24 = vpop.f32.mrf.mxu1 }
  0xc9   :  { %v353_v49 = vadd.f32 %v352_v24, %v324_v47 }
  0xcb   :  { %v2858_v51 = vadd.f32 %v381_v23, %v353_v49 }
  0xcc   :  { %v597_v52 = vpop.f32.mrf.mxu2 }
  0xcd   :  { %v405_v53 = vsel %vm389_vm1, %v2858_v51, 0.0 }
  0xce   :  { %v326_v54 = vpop.f32.mrf.mxu0  ;;  %406 = vadd.xlane.f32.xlu0 %v405_v53  ;;  %v579_v53 = vadd.f32 %v2853_v44, %v2836_v33 }
  0xcf   :  { %v2862_v25 = vpop.f32.mrf.mxu3  ;;  %v327_v55 = vadd.f32 %v326_v54, %v2860_v61  ;;  %v355_v56 = vpop.f32.mrf.mxu1 }
  0xd1   :  { %v356_v57 = vadd.f32 %v355_v56, %v327_v55  ;;  %1110 = vmatmul.bf16.gmra.mxu0 %v2725_v40 }
  0xd2   :  { %1139 = vmatmul.bf16.gmra.mxu1 %v2727_v41 }
  0xd3   :  { %v2871_v58 = vadd.f32 %v384_v31, %v356_v57 }
  0xd4   :  { %2278 = vmatmul.msk.bf16.gmra.mxu3 %vm289_vm0, %v2653_v16  ;;  %v599_v63 = vpop.f32.mrf.mxu2  ;;  %v569_v16 = vadd.f32 %v2805_v5, %v2794_v59  ;;  %v571_v5 = vadd.f32 %v2816_v14, %v2803_v3 }
  0xd5   :  { %v408_v0 = vsel %vm389_vm1, %v2871_v58, 0.0 }
  0xd6   :  { %v328_v1 = vpop.f32.mrf.mxu0  ;;  %409 = vadd.xlane.f32.xlu1 %v408_v0  ;;  %v598_v9 = vadd.f32 %v597_v52, %v569_v16  ;;  %v600_v19 = vadd.f32 %v599_v63, %v571_v5 }
  0xd7   :  { %v2875_v62 = vpop.f32.mrf.mxu3  ;;  %v329_v4 = vadd.f32 %v328_v1, %v2873_v60  ;;  %v357_v40 = vpop.f32.mrf.mxu1  ;;  %v581_v1 = vadd.f32 %v2862_v25, %v2851_v42 }
  0xd9   :  { %v358_v7 = vadd.f32 %v357_v40, %v329_v4 }
  0xdb   :  { %v2882_v41 = vadd.f32 %v386_v43, %v358_v7  ;;  %v576_v43 = vadd.f32 %v2840_v32, %v2827_v22 }
  0xdc   :  { %v602_v10 = vpop.f32.mrf.mxu2 }
  0xdd   :  { %v411_v50 = vsel %vm389_vm1, %v2882_v41, 0.0  ;;  %v603_v31 = vadd.f32 %v602_v10, %v574_v30 }
  0xde   :  { %v626_v13 = vpop.f32.mrf.mxu0  ;;  %412 = vadd.xlane.f32.xlu2 %v411_v50 }
  0xdf   :  { %v2884_v48 = vpop.f32.mrf.mxu3  ;;  %v2888_v15 = vadd.f32 %v626_v13, %v598_v9  ;;  %v832_v17 = vpop.f32.mrf.mxu1  ;;  %v584_v13 = vadd.f32 %v2875_v62, %v2860_v61 }
  0xe0   :  { %v833_v10 = vadd.f32 %v832_v17, %v2794_v59 }
  0xe1   :  { %v646_v18 = vsel %vm389_vm1, %v2888_v15, 0.0 }
  0xe2   :  { %647 = vadd.xlane.f32.xlu0 %v646_v18 }
  0xe4   :  { %v604_v20 = vpop.f32.mrf.mxu2 }
  0xe5   :  { %v605_v45 = vadd.f32 %v604_v20, %v576_v43 }
  0xe6   :  { %v628_v27 = vpop.f32.mrf.mxu0 }
  0xe7   :  { %v861_v23 = vpop.f32.mrf.mxu3  ;;  %v2894_v28 = vadd.f32 %v628_v27, %v600_v19  ;;  %v834_v29 = vpop.f32.mrf.mxu1 }
  0xe8   :  { %v862_v18 = vadd.f32 %v861_v23, %v833_v10  ;;  %v835_v62 = vadd.f32 %v834_v29, %v2803_v3  ;;  %v586_v23 = vadd.f32 %v2884_v48, %v2873_v60 }
  0xe9   :  { %v649_v6 = vsel %vm389_vm1, %v2894_v28, 0.0 }
  0xea   :  { %650 = vadd.xlane.f32.xlu1 %v649_v6 }
  0xec   :  { %v607_v34 = vpop.f32.mrf.mxu2 }
  0xed   :  { %v608_v54 = vadd.f32 %v607_v34, %v579_v53 }
  0xee   :  { %v631_v36 = vpop.f32.mrf.mxu0 }
  0xef   :  { %v863_v35 = vpop.f32.mrf.mxu3  ;;  %v2900_v37 = vadd.f32 %v631_v36, %v603_v31  ;;  %v837_v14 = vpop.f32.mrf.mxu1 }
  0xf0   :  { %v864_v34 = vadd.f32 %v863_v35, %v835_v62  ;;  %v838_v48 = vadd.f32 %v837_v14, %v2812_v11 }
  0xf1   :  { %v652_v38 = vsel %vm389_vm1, %v2900_v37, 0.0 }
  0xf2   :  { %653 = vadd.xlane.f32.xlu2 %v652_v38 }
  0xf4   :  { %v609_v46 = vpop.f32.mrf.mxu2 }
  0xf5   :  { %v610_v4 = vadd.f32 %v609_v46, %v581_v1 }
  0xf6   :  { %v633_v24 = vpop.f32.mrf.mxu0 }
  0xf7   :  { %v866_v47 = vpop.f32.mrf.mxu3  ;;  %v2906_v49 = vadd.f32 %v633_v24, %v605_v45  ;;  %v839_v26 = vpop.f32.mrf.mxu1 }
  0xf8   :  { %v867_v35 = vadd.f32 %v866_v47, %v838_v48 }
  0xf9   :  { %v655_v52 = vsel %vm389_vm1, %v2906_v49, 0.0 }
  0xfa   :  { %656 = vadd.xlane.f32.xlu0 %v655_v52 }
  0xfc   :  { %v612_v55 = vpop.f32.mrf.mxu2 }
  0xfd   :  { %v613_v5 = vadd.f32 %v612_v55, %v584_v13 }
  0xfe   :  { %v636_v57 = vpop.f32.mrf.mxu0 }
  0xff   :  { %v868_v56 = vpop.f32.mrf.mxu3  ;;  %v2912_v63 = vadd.f32 %v636_v57, %v608_v54  ;;  %v2914_v32 = vpop.f32.mrf.mxu1 }
 0x101   :  { %v658_v0 = vsel %vm389_vm1, %v2912_v63, 0.0 }
 0x102   :  { %659 = vadd.xlane.f32.xlu1 %v658_v0 }
 0x104   :  { %v614_v40 = vpop.f32.mrf.mxu2 }
 0x105   :  { %v615_v36 = vadd.f32 %v614_v40, %v586_v23 }
 0x106   :  { %v638_v16 = vpop.f32.mrf.mxu0 }
 0x107   :  { %v871_v7 = vpop.f32.mrf.mxu3  ;;  %v2920_v44 = vadd.f32 %v638_v16, %v610_v4  ;;  %v2922_v9 = vpop.f32.mrf.mxu1  ;;  %v840_v16 = vadd.f32 %v839_v26, %v2827_v22 }
 0x109   :  { %v661_v50 = vsel %vm389_vm1, %v2920_v44, 0.0  ;;  %v869_v10 = vadd.f32 %v868_v56, %v840_v16  ;;  %v843_v56 = vadd.f32 %v2914_v32, %v2836_v33  ;;  %v845_v32 = vadd.f32 %v2922_v9, %v2851_v42 }
 0x10a   :  { %662 = vadd.xlane.f32.xlu2 %v661_v50 }
 0x10c   :  { %v890_v19 = vpop.f32.mrf.mxu2 }
 0x10d   :  { %v2931_v20 = vadd.f32 %v890_v19, %v862_v18 }
 0x10e   :  { %v641_v27 = vpop.f32.mrf.mxu0 }
 0x10f   :  { %v2929_v25 = vpop.f32.mrf.mxu3  ;;  %v2933_v6 = vadd.f32 %v641_v27, %v613_v5  ;;  %v2935_v30 = vpop.f32.mrf.mxu1  ;;  %v910_v31 = vsel %vm389_vm1, %v2931_v20, 0.0 }
 0x110   :  { %v848_v9 = vadd.f32 %v2935_v30, %v2860_v61 }
 0x111   :  { %v664_v17 = vsel %vm389_vm1, %v2933_v6, 0.0 }
 0x112   :  { %665 = vadd.xlane.f32.xlu0 %v664_v17  ;;  %911 = vadd.xlane.f32.xlu2 %v910_v31  ;;  %v872_v17 = vadd.f32 %v871_v7, %v843_v56  ;;  %v874_v7 = vadd.f32 %v2929_v25, %v845_v32 }
 0x114   :  { %v892_v43 = vpop.f32.mrf.mxu2 }
 0x115   :  { %v2946_v45 = vadd.f32 %v892_v43, %v864_v34 }
 0x116   :  { %v643_v46 = vpop.f32.mrf.mxu0 }
 0x117   :  { %v2944_v38 = vpop.f32.mrf.mxu3  ;;  %v2948_v24 = vadd.f32 %v643_v46, %v615_v36  ;;  %v2950_v52 = vpop.f32.mrf.mxu1  ;;  %v913_v53 = vsel %vm389_vm1, %v2946_v45, 0.0 }
 0x118   :  { %v877_v25 = vadd.f32 %v2944_v38, %v848_v9  ;;  %v850_v30 = vadd.f32 %v2950_v52, %v2873_v60 }
 0x119   :  { %v667_v29 = vsel %vm389_vm1, %v2948_v24, 0.0 }
 0x11a   :  { %668 = vadd.xlane.f32.xlu1 %v667_v29  ;;  %914 = vadd.xlane.f32.xlu0 %v913_v53 }
 0x11c   :  { %v895_v55 = vpop.f32.mrf.mxu2 }
 0x11d   :  { %v2959_v57 = vadd.f32 %v895_v55, %v867_v35 }
 0x11e   :  { %v1096_v0 = vpop.f32.mrf.mxu0 }
 0x11f   :  { %v2957_v54 = vpop.f32.mrf.mxu3  ;;  %v1125_v1 = vpop.f32.mrf.mxu1  ;;  %v1097_v4 = vadd.f32 %v1096_v0, %v2794_v59  ;;  %v916_v40 = vsel %vm389_vm1, %v2959_v57, 0.0 }
 0x120   :  { %v879_v38 = vadd.f32 %v2957_v54, %v850_v30 }
 0x121   :  { %v1126_v14 = vadd.f32 %v1125_v1, %v1097_v4 }
 0x122   :  { %917 = vadd.xlane.f32.xlu1 %v916_v40 }
 0x124   :  { %v897_v50 = vpop.f32.mrf.mxu2 }
 0x125   :  { %v2965_v47 = vadd.f32 %v897_v50, %v869_v10 }
 0x126   :  { %v1098_v5 = vpop.f32.mrf.mxu0 }
 0x127   :  { %v1154_v13 = vpop.f32.mrf.mxu3  ;;  %v1127_v19 = vpop.f32.mrf.mxu1  ;;  %v1099_v27 = vadd.f32 %v1098_v5, %v2803_v3  ;;  %v919_v59 = vsel %vm389_vm1, %v2965_v47, 0.0 }
 0x128   :  { %v2967_v18 = vadd.f32 %v1154_v13, %v1126_v14  ;;  %920 = vadd.xlane.f32.xlu2 %v919_v59 }
 0x129   :  { %v1128_v31 = vadd.f32 %v1127_v19, %v1099_v27 }
 0x12a   :  { %v1174_v26 = vsel %vm389_vm1, %v2967_v18, 0.0 }
 0x12b   :  { %1175 = vadd.xlane.f32.xlu1 %v1174_v26 }
 0x12c   :  { %v900_v62 = vpop.f32.mrf.mxu2 }
 0x12d   :  { %v2976_v34 = vadd.f32 %v900_v62, %v872_v17 }
 0x12e   :  { %v1101_v3 = vpop.f32.mrf.mxu0 }
 0x12f   :  { %v1156_v23 = vpop.f32.mrf.mxu3  ;;  %v1130_v43 = vpop.f32.mrf.mxu1  ;;  %v1102_v46 = vadd.f32 %v1101_v3, %v2812_v11  ;;  %v922_v29 = vsel %vm389_vm1, %v2976_v34, 0.0 }
 0x130   :  { %v2978_v36 = vadd.f32 %v1156_v23, %v1128_v31  ;;  %923 = vadd.xlane.f32.xlu0 %v922_v29 }
 0x131   :  { %v1131_v48 = vadd.f32 %v1130_v43, %v1102_v46 }
 0x132   :  { %v1177_v53 = vsel %vm389_vm1, %v2978_v36, 0.0 }
 0x133   :  { %1178 = vadd.xlane.f32.xlu2 %v1177_v53 }
 0x134   :  { %v902_v35 = vpop.f32.mrf.mxu2 }
 0x135   :  { %v2988_v0 = vadd.f32 %v902_v35, %v874_v7 }
 0x136   :  { %v1103_v11 = vpop.f32.mrf.mxu0 }
 0x137   :  { %v1159_v55 = vpop.f32.mrf.mxu3  ;;  %v1132_v4 = vpop.f32.mrf.mxu1  ;;  %v1104_v40 = vadd.f32 %v1103_v11, %v2827_v22  ;;  %v925_v16 = vsel %vm389_vm1, %v2988_v0, 0.0 }
 0x138   :  { %v2990_v1 = vadd.f32 %v1159_v55, %v1131_v48  ;;  %926 = vadd.xlane.f32.xlu1 %v925_v16 }
 0x139   :  { %v1133_v14 = vadd.f32 %v1132_v4, %v1104_v40 }
 0x13a   :  { %v1180_v10 = vsel %vm389_vm1, %v2990_v1, 0.0 }
 0x13b   :  { %1181 = vadd.xlane.f32.xlu0 %v1180_v10 }
 0x13c   :  { %v905_v50 = vpop.f32.mrf.mxu2 }
 0x13d   :  { %v3000_v5 = vadd.f32 %v905_v50, %v877_v25 }
 0x13e   :  { %v1106_v22 = vpop.f32.mrf.mxu0 }
 0x13f   :  { %v1161_v13 = vpop.f32.mrf.mxu3  ;;  %v1135_v27 = vpop.f32.mrf.mxu1  ;;  %v1107_v59 = vadd.f32 %v1106_v22, %v2836_v33  ;;  %v928_v56 = vsel %vm389_vm1, %v3000_v5, 0.0 }
 0x140   :  { %v3002_v19 = vadd.f32 %v1161_v13, %v1133_v14  ;;  %929 = vadd.xlane.f32.xlu2 %v928_v56  ;;  %v395_v22 = vpop.xlane.xlu0 %394 }
 0x141   :  { %v1136_v17 = vadd.f32 %v1135_v27, %v1107_v59  ;;  %v398_v59 = vpop.xlane.xlu1 %397 }
 0x142   :  { %v1183_v26 = vsel %vm389_vm1, %v3002_v19, 0.0 }
 0x143   :  { %1184 = vadd.xlane.f32.xlu1 %v1183_v26 }
 0x144   :  { %v907_v31 = vpop.f32.mrf.mxu2 }
 0x145   :  { %v3012_v23 = vadd.f32 %v907_v31, %v879_v38 }
 0x146   :  { %v1108_v33 = vpop.f32.mrf.mxu0 }
 0x147   :  { %v1164_v62 = vpop.f32.mrf.mxu3  ;;  %v1137_v43 = vpop.f32.mrf.mxu1  ;;  %v1109_v46 = vadd.f32 %v1108_v33, %v2851_v42  ;;  %v931_v29 = vsel %vm389_vm1, %v3012_v23, 0.0 }
 0x148   :  { %v3014_v3 = vadd.f32 %v1164_v62, %v1136_v17  ;;  %932 = vadd.xlane.f32.xlu0 %v931_v29  ;;  %v3037_v26 = vpop.xlane.xlu0 %406 }
 0x149   :  { %v1138_v52 = vadd.f32 %v1137_v43, %v1109_v46  ;;  %v410_v56 = vpop.xlane.xlu1 %409 }
 0x14a   :  { %v1186_v53 = vsel %vm389_vm1, %v3014_v3, 0.0 }
 0x14b   :  { %1187 = vadd.xlane.f32.xlu2 %v1186_v53 }
 0x14e   :  { %v1111_v7 = vpop.f32.mrf.mxu0 }
 0x14f   :  { %v1166_v54 = vpop.f32.mrf.mxu3  ;;  %v1140_v48 = vpop.f32.mrf.mxu1  ;;  %v1112_v35 = vadd.f32 %v1111_v7, %v2860_v61 }
 0x150   :  { %v3021_v32 = vadd.f32 %v1166_v54, %v1138_v52  ;;  %v392_v61 = vpop.xlane.xlu2 %391 }
 0x151   :  { %v1141_v42 = vadd.f32 %v1140_v48, %v1112_v35 }
 0x152   :  { %v1189_v55 = vsel %vm389_vm1, %v3021_v32, 0.0 }
 0x153   :  { %1190 = vadd.xlane.f32.xlu0 %v1189_v55 }
 0x155   :  { %v648_v30 = vpop.xlane.xlu0 %647 }
 0x156   :  { %v1113_v40 = vpop.f32.mrf.mxu0  ;;  %v670_v48 = vadd.f32 %v648_v30, %v392_v61 }
 0x157   :  { %v1169_v11 = vpop.f32.mrf.mxu3  ;;  %v1114_v16 = vadd.f32 %v1113_v40, %v2873_v60  ;;  %v1142_v9 = vpop.f32.mrf.mxu1 }
 0x158   :  { %v3026_v4 = vadd.f32 %v1169_v11, %v1141_v42  ;;  %v3035_v27 = vpop.xlane.xlu2 %400 }
 0x159   :  { %v1143_v25 = vadd.f32 %v1142_v9, %v1114_v16 }
 0x15a   :  { %v1192_v10 = vsel %vm389_vm1, %v3026_v4, 0.0 }
 0x15b   :  { %1193 = vadd.xlane.f32.xlu1 %v1192_v10 }
 0x15d   :  { %v651_v17 = vpop.xlane.xlu1 %650 }
 0x15e   :  { %v671_v10 = vadd.f32 %v651_v17, %v395_v22 }
 0x15f   :  { %v1171_v14 = vpop.f32.mrf.mxu3 }
 0x160   :  { %v3031_v50 = vadd.f32 %v1171_v14, %v1143_v25  ;;  %v3039_v60 = vpop.xlane.xlu2 %403 }
 0x162   :  { %v1195_v13 = vsel %vm389_vm1, %v3031_v50, 0.0 }
 0x163   :  { %1196 = vadd.xlane.f32.xlu2 %v1195_v13 }
 0x168   :  { %v413_v38 = vpop.xlane.xlu2 %412 }
 0x16d   :  { %v657_v31 = vpop.xlane.xlu0 %656 }
 0x170   :  { %v654_v62 = vpop.xlane.xlu2 %653 }
 0x175   :  { %v3041_v33 = vpop.xlane.xlu1 %659 }
 0x17d   :  { %v3045_v29 = vpop.xlane.xlu2 %662 }
 0x185   :  { %v666_v43 = vpop.xlane.xlu0 %665  ;;  %v912_v54 = vpop.xlane.xlu2 %911 }
 0x186   :  { %v3043_v46 = vadd.f32 %v666_v43, %v410_v56  ;;  %v934_v35 = vadd.f32 %v912_v54, %v670_v48 }
 0x18d   :  { %v669_v53 = vpop.xlane.xlu1 %668  ;;  %v915_v55 = vpop.xlane.xlu0 %914 }
 0x18e   :  { %v3047_v52 = vadd.f32 %v669_v53, %v413_v38  ;;  %v935_v13 = vadd.f32 %v915_v55, %v671_v10  ;;  %v672_v55 = vadd.f32 %v654_v62, %v398_v59 }
 0x195   :  { %v918_v7 = vpop.xlane.xlu1 %917 }
 0x196   :  { %v936_v10 = vadd.f32 %v918_v7, %v672_v55 }
 0x19b   :  { %v921_v42 = vpop.xlane.xlu2 %920 }
 0x19e   :  { %v1176_v11 = vpop.xlane.xlu1 %1175 }
 0x19f   :  { %v1198_v40 = vadd.f32 %v1176_v11, %v934_v35 }
 0x1a1   :  { %v3049_v16 = vmul.f32 0.004166667, %v1198_v40 }
 0x1a3   :  { %v1302_v9 = vsub.f32 %v2931_v20, %v3049_v16  ;;  %v1254_v25 = vsub.f32 %v2888_v15, %v3049_v16  ;;  %v1214_v14 = vsub.f32 %v2801_v2, %v3049_v16  ;;  %v924_v56 = vpop.xlane.xlu0 %923  ;;  %v1350_v35 = vsub.f32 %v2967_v18, %v3049_v16 }
 0x1a5   :  { %v1310_v30 = vmul.f32 %v1302_v9, %v1302_v9  ;;  %v1262_v38 = vmul.f32 %v1254_v25, %v1254_v25  ;;  %v1222_v43 = vmul.f32 %v1214_v14, %v1214_v14  ;;  %v1358_v9 = vmul.f32 %v1350_v35, %v1350_v35 }
 0x1a6   :  { %v1179_v61 = vpop.xlane.xlu2 %1178 }
 0x1a7   :  { %v1199_v53 = vadd.f32 %v1179_v61, %v935_v13  ;;  %v1318_v54 = vsel %vm389_vm1, %v1310_v30, 0.0  ;;  %v1270_v22 = vsel %vm389_vm1, %v1262_v38, 0.0  ;;  %v1230_v17 = vsel %vm389_vm1, %v1222_v43, 0.0 }
 0x1a8   :  { %1319 = vadd.xlane.f32.xlu1 %v1318_v54  ;;  %1271 = vadd.xlane.f32.xlu2 %v1270_v22  ;;  %v673_v54 = vadd.f32 %v657_v31, %v3035_v27 }
 0x1a9   :  { %v3060_v48 = vmul.f32 0.004166667, %v1199_v53  ;;  %1231 = vadd.xlane.f32.xlu0 %v1230_v17  ;;  %v1366_v53 = vsel %vm389_vm1, %v1358_v9, 0.0 }
 0x1aa   :  { %v937_v35 = vadd.f32 %v921_v42, %v673_v54 }
 0x1ab   :  { %v1303_v11 = vsub.f32 %v2946_v45, %v3060_v48  ;;  %v1215_v40 = vsub.f32 %v2814_v12, %v3060_v48  ;;  %v927_v13 = vpop.xlane.xlu1 %926  ;;  %v1351_v59 = vsub.f32 %v2978_v36, %v3060_v48  ;;  %v1255_v7 = vsub.f32 %v2894_v28, %v3060_v48 }
 0x1ad   :  { %v1311_v25 = vmul.f32 %v1303_v11, %v1303_v11  ;;  %v1223_v14 = vmul.f32 %v1215_v40, %v1215_v40  ;;  %v1359_v17 = vmul.f32 %v1351_v59, %v1351_v59  ;;  %v1263_v11 = vmul.f32 %v1255_v7, %v1255_v7 }
 0x1ae   :  { %v1182_v61 = vpop.xlane.xlu0 %1181 }
 0x1af   :  { %v1200_v30 = vadd.f32 %v1182_v61, %v936_v10  ;;  %v1321_v38 = vsel %vm389_vm1, %v1311_v25, 0.0  ;;  %v1233_v43 = vsel %vm389_vm1, %v1223_v14, 0.0  ;;  %v1369_v14 = vsel %vm389_vm1, %v1359_v17, 0.0 }
 0x1b0   :  { %1322 = vadd.xlane.f32.xlu2 %v1321_v38  ;;  %1234 = vadd.xlane.f32.xlu1 %v1233_v43  ;;  %v1273_v31 = vsel %vm389_vm1, %v1263_v11, 0.0  ;;  %v674_v38 = vadd.f32 %v3041_v33, %v3039_v60 }
 0x1b1   :  { %v3072_v62 = vmul.f32 0.004166667, %v1200_v30  ;;  %1367 = vadd.xlane.f32.xlu0 %v1366_v53 }
 0x1b2   :  { %v938_v7 = vadd.f32 %v924_v56, %v674_v38 }
 0x1b3   :  { %v1216_v22 = vsub.f32 %v2825_v21, %v3072_v62  ;;  %v3080_v10 = vpop.xlane.xlu2 %929  ;;  %v1352_v61 = vsub.f32 %v2990_v1, %v3072_v62  ;;  %v1256_v27 = vsub.f32 %v2900_v37, %v3072_v62  ;;  %v1304_v42 = vsub.f32 %v2959_v57, %v3072_v62 }
 0x1b5   :  { %v1224_v55 = vmul.f32 %v1216_v22, %v1216_v22  ;;  %v1360_v43 = vmul.f32 %v1352_v61, %v1352_v61  ;;  %v1264_v59 = vmul.f32 %v1256_v27, %v1256_v27  ;;  %v1312_v53 = vmul.f32 %v1304_v42, %v1304_v42 }
 0x1b6   :  { %v1185_v40 = vpop.xlane.xlu1 %1184 }
 0x1b7   :  { %v1201_v25 = vadd.f32 %v1185_v40, %v937_v35  ;;  %v1236_v9 = vsel %vm389_vm1, %v1224_v55, 0.0  ;;  %v1372_v55 = vsel %vm389_vm1, %v1360_v43, 0.0  ;;  %v1276_v11 = vsel %vm389_vm1, %v1264_v59, 0.0 }
 0x1b8   :  { %1237 = vadd.xlane.f32.xlu2 %v1236_v9  ;;  %1370 = vadd.xlane.f32.xlu1 %v1369_v14  ;;  %v1324_v60 = vsel %vm389_vm1, %v1312_v53, 0.0 }
 0x1b9   :  { %1274 = vadd.xlane.f32.xlu0 %v1273_v31  ;;  %v3091_v30 = vmul.f32 0.004166667, %v1201_v25  ;;  %v675_v25 = vadd.f32 %v3045_v29, %v3037_v26 }
 0x1bb   :  { %v933_v54 = vpop.xlane.xlu0 %932  ;;  %v1257_v17 = vsub.f32 %v2906_v49, %v3091_v30  ;;  %v1305_v40 = vsub.f32 %v2965_v47, %v3091_v30  ;;  %v1217_v33 = vsub.f32 %v2838_v8, %v3091_v30  ;;  %v939_v27 = vadd.f32 %v927_v13, %v675_v25 }
 0x1bc   :  { %v1353_v29 = vsub.f32 %v3002_v19, %v3091_v30 }
 0x1bd   :  { %v1265_v56 = vmul.f32 %v1257_v17, %v1257_v17  ;;  %v1313_v14 = vmul.f32 %v1305_v40, %v1305_v40  ;;  %v1225_v61 = vmul.f32 %v1217_v33, %v1217_v33 }
 0x1be   :  { %v1188_v22 = vpop.xlane.xlu2 %1187  ;;  %v1361_v17 = vmul.f32 %v1353_v29, %v1353_v29 }
 0x1bf   :  { %v1202_v35 = vadd.f32 %v1188_v22, %v938_v7  ;;  %v1279_v42 = vsel %vm389_vm1, %v1265_v56, 0.0  ;;  %v1327_v43 = vsel %vm389_vm1, %v1313_v14, 0.0  ;;  %v1239_v26 = vsel %vm389_vm1, %v1225_v61, 0.0 }
 0x1c0   :  { %1373 = vadd.xlane.f32.xlu2 %v1372_v55  ;;  %1277 = vadd.xlane.f32.xlu1 %v1276_v11 }
 0x1c1   :  { %1325 = vadd.xlane.f32.xlu0 %v1324_v60  ;;  %v3106_v9 = vmul.f32 0.004166667, %v1202_v35  ;;  %v1375_v60 = vsel %vm389_vm1, %v1361_v17, 0.0  ;;  %v941_v17 = vadd.f32 %v933_v54, %v3047_v52 }
 0x1c3   :  { %v1306_v59 = vsub.f32 %v2976_v34, %v3106_v9  ;;  %v1218_v53 = vsub.f32 %v2849_v39, %v3106_v9  ;;  %v1354_v40 = vsub.f32 %v3014_v3, %v3106_v9  ;;  %v1258_v33 = vsub.f32 %v2912_v63, %v3106_v9 }
 0x1c5   :  { %v1314_v7 = vmul.f32 %v1306_v59, %v1306_v59  ;;  %v1226_v22 = vmul.f32 %v1218_v53, %v1218_v53  ;;  %v1362_v25 = vmul.f32 %v1354_v40, %v1354_v40  ;;  %v1266_v61 = vmul.f32 %v1258_v33, %v1258_v33 }
 0x1c6   :  { %v1191_v31 = vpop.xlane.xlu0 %1190 }
 0x1c7   :  { %v1203_v38 = vadd.f32 %v1191_v31, %v939_v27  ;;  %v1330_v35 = vsel %vm389_vm1, %v1314_v7, 0.0  ;;  %v1242_v55 = vsel %vm389_vm1, %v1226_v22, 0.0  ;;  %v940_v27 = vadd.f32 %v3080_v10, %v3043_v46 }
 0x1c8   :  { %1280 = vadd.xlane.f32.xlu2 %v1279_v42  ;;  %1328 = vadd.xlane.f32.xlu1 %v1327_v43  ;;  %v1378_v43 = vsel %vm389_vm1, %v1362_v25, 0.0  ;;  %v1282_v53 = vsel %vm389_vm1, %v1266_v61, 0.0 }
 0x1c9   :  { %1240 = vadd.xlane.f32.xlu0 %v1239_v26  ;;  %v3117_v13 = vmul.f32 0.004166667, %v1203_v38 }
 0x1cb   :  { %v1219_v11 = vsub.f32 %v2858_v51, %v3117_v13  ;;  %v1355_v31 = vsub.f32 %v3021_v32, %v3117_v13  ;;  %v1259_v59 = vsub.f32 %v2920_v44, %v3117_v13  ;;  %v1307_v26 = vsub.f32 %v2988_v0, %v3117_v13 }
 0x1cd   :  { %v1227_v56 = vmul.f32 %v1219_v11, %v1219_v11  ;;  %v1363_v46 = vmul.f32 %v1355_v31, %v1355_v31  ;;  %v1267_v29 = vmul.f32 %v1259_v59, %v1259_v59  ;;  %v1315_v22 = vmul.f32 %v1307_v26, %v1307_v26 }
 0x1ce   :  { %v1194_v14 = vpop.xlane.xlu1 %1193 }
 0x1cf   :  { %v1204_v42 = vadd.f32 %v1194_v14, %v940_v27  ;;  %v1245_v38 = vsel %vm389_vm1, %v1227_v56, 0.0  ;;  %v1285_v11 = vsel %vm389_vm1, %v1267_v29, 0.0  ;;  %v1333_v33 = vsel %vm389_vm1, %v1315_v22, 0.0 }
 0x1d0   :  { %1331 = vadd.xlane.f32.xlu2 %v1330_v35  ;;  %1243 = vadd.xlane.f32.xlu1 %v1242_v55  ;;  %v1381_v35 = vsel %vm389_vm1, %v1363_v46, 0.0 }
 0x1d1   :  { %1376 = vadd.xlane.f32.xlu0 %v1375_v60  ;;  %v3139_v10 = vmul.f32 0.004166667, %v1204_v42 }
 0x1d3   :  { %v1260_v40 = vsub.f32 %v2933_v6, %v3139_v10  ;;  %v1308_v60 = vsub.f32 %v3000_v5, %v3139_v10  ;;  %v1220_v56 = vsub.f32 %v2871_v58, %v3139_v10 }
 0x1d5   :  { %v1268_v54 = vmul.f32 %v1260_v40, %v1260_v40  ;;  %v1316_v25 = vmul.f32 %v1308_v60, %v1308_v60  ;;  %v1228_v14 = vmul.f32 %v1220_v56, %v1220_v56 }
 0x1d6   :  { %v1197_v7 = vpop.xlane.xlu2 %1196 }
 0x1d7   :  { %v1205_v55 = vadd.f32 %v1197_v7, %v941_v17  ;;  %v1288_v61 = vsel %vm389_vm1, %v1268_v54, 0.0  ;;  %v1336_v27 = vsel %vm389_vm1, %v1316_v25, 0.0 }
 0x1d8   :  { %1246 = vadd.xlane.f32.xlu2 %v1245_v38  ;;  %1379 = vadd.xlane.f32.xlu1 %v1378_v43  ;;  %v1248_v38 = vsel %vm389_vm1, %v1228_v14, 0.0  ;;  %v1356_v43 = vsub.f32 %v3026_v4, %v3139_v10 }
 0x1d9   :  { %1283 = vadd.xlane.f32.xlu0 %v1282_v53  ;;  %v3151_v52 = vmul.f32 0.004166667, %v1205_v55 }
 0x1da   :  { %v1364_v26 = vmul.f32 %v1356_v43, %v1356_v43 }
 0x1db   :  { %v1309_v31 = vsub.f32 %v3012_v23, %v3151_v52  ;;  %v1221_v42 = vsub.f32 %v2882_v41, %v3151_v52  ;;  %v1357_v7 = vsub.f32 %v3031_v50, %v3151_v52  ;;  %v1261_v17 = vsub.f32 %v2948_v24, %v3151_v52 }
 0x1dc   :  { %v1384_v22 = vsel %vm389_vm1, %v1364_v26, 0.0 }
 0x1dd   :  { %v1317_v59 = vmul.f32 %v1309_v31, %v1309_v31  ;;  %v1229_v53 = vmul.f32 %v1221_v42, %v1221_v42  ;;  %v1269_v55 = vmul.f32 %v1261_v17, %v1261_v17 }
 0x1df   :  { %v1339_v46 = vsel %vm389_vm1, %v1317_v59, 0.0  ;;  %v1251_v29 = vsel %vm389_vm1, %v1229_v53, 0.0  ;;  %v1291_v40 = vsel %vm389_vm1, %v1269_v55, 0.0 }
 0x1e0   :  { %1382 = vadd.xlane.f32.xlu2 %v1381_v35  ;;  %1286 = vadd.xlane.f32.xlu1 %v1285_v11  ;;  %v1365_v35 = vmul.f32 %v1357_v7, %v1357_v7 }
 0x1e1   :  { %1334 = vadd.xlane.f32.xlu0 %v1333_v33 }
 0x1e2   :  { %v1387_v11 = vsel %vm389_vm1, %v1365_v35, 0.0 }
 0x1e8   :  { %1289 = vadd.xlane.f32.xlu2 %v1288_v61  ;;  %1337 = vadd.xlane.f32.xlu1 %v1336_v27 }
 0x1e9   :  { %1249 = vadd.xlane.f32.xlu0 %v1248_v38 }
 0x1f0   :  { %1340 = vadd.xlane.f32.xlu2 %v1339_v46  ;;  %1252 = vadd.xlane.f32.xlu1 %v1251_v29 }
 0x1f1   :  { %1385 = vadd.xlane.f32.xlu0 %v1384_v22 }
 0x1f8   :  { %1388 = vadd.xlane.f32.xlu1 %v1387_v11 }
 0x1f9   :  { %1292 = vadd.xlane.f32.xlu0 %v1291_v40 }
 0x21b   :  { %v1320_v60 = vpop.xlane.xlu1 %1319  ;;  %v1272_v33 = vpop.xlane.xlu2 %1271 }
 0x21c   :  { %v1232_v56 = vpop.xlane.xlu0 %1231 }
 0x21d   :  { %v1294_v54 = vadd.f32 %v1272_v33, %v1232_v56 }
 0x21f   :  { %v1342_v25 = vadd.f32 %v1320_v60, %v1294_v54 }
 0x223   :  { %v1235_v14 = vpop.xlane.xlu1 %1234  ;;  %v1323_v61 = vpop.xlane.xlu2 %1322 }
 0x224   :  { %v1368_v27 = vpop.xlane.xlu0 %1367 }
 0x225   :  { %v1390_v31 = vadd.f32 %v1368_v27, %v1342_v25 }
 0x227   :  { %v1398_v42 = vmul.f32 0.004166667, %v1390_v31 }
 0x229   :  { %v1414_v38 = vadd.f32 1e-05, %v1398_v42 }
 0x22b   :  { %2367 = vrsqrt.f32 %v1414_v38  ;;  %v1371_v43 = vpop.xlane.xlu1 %1370  ;;  %v1238_v59 = vpop.xlane.xlu2 %1237  ;;  %vm1428_vm3 = vweird.f32 %v1414_v38 }
 0x22c   :  { %v1275_v53 = vpop.xlane.xlu0 %1274 }
 0x22d   :  { %v1295_v26 = vadd.f32 %v1275_v53, %v1235_v14  ;;  %v1406_v14 = vld [vmem:[%s3300_s3] sm:$0xff] }
 0x22f   :  { %v1343_v46 = vadd.f32 %v1323_v61, %v1295_v26 }
 0x231   :  { %v2368_v29 = vpop.eup %2367  ;;  %v1391_v7 = vadd.f32 %v1371_v43, %v1343_v46 }
 0x232   :  { %v1423_v22 = vmul.f32 %v2368_v29, %v1414_v38  ;;  %vm1429_vm2 = vweird.f32 %v2368_v29  ;;  %v1510_v38 = vld [vmem:[%s3301_s4] sm:$0xff] }
 0x233   :  { %v1399_v17 = vmul.f32 0.004166667, %v1391_v7  ;;  %v1278_v35 = vpop.xlane.xlu1 %1277  ;;  %v1374_v55 = vpop.xlane.xlu2 %1373  ;;  %vm1430_vm4 = vmor %vm1428_vm3, %vm1429_vm2 }
 0x234   :  { %v1424_v11 = vmul.f32 %v2368_v29, %v1423_v22  ;;  %v1326_v40 = vpop.xlane.xlu0 %1325  ;;  %v1296_v60 = vadd.f32 %v1278_v35, %v1238_v59 }
 0x235   :  { %v1415_v33 = vadd.f32 1e-05, %v1399_v17 }
 0x236   :  { %v1425_v56 = vmul.f32 0.5, %v1424_v11  ;;  %v1344_v54 = vadd.f32 %v1326_v40, %v1296_v60 }
 0x237   :  { %2369 = vrsqrt.f32 %v1415_v33  ;;  %vm1438_vm6 = vweird.f32 %v1415_v33 }
 0x238   :  { %v1426_v25 = vsub.f32 1.5, %v1425_v56  ;;  %v1392_v27 = vadd.f32 %v1374_v55, %v1344_v54 }
 0x23a   :  { %v1400_v31 = vmul.f32 0.004166667, %v1392_v27  ;;  %v1427_v61 = vmul.f32 %v2368_v29, %v1426_v25 }
 0x23b   :  { %v1329_v42 = vpop.xlane.xlu1 %1328  ;;  %v1281_v43 = vpop.xlane.xlu2 %1280 }
 0x23c   :  { %v1416_v53 = vadd.f32 1e-05, %v1400_v31  ;;  %v1241_v26 = vpop.xlane.xlu0 %1240  ;;  %v1431_v59 = vsel %vm1430_vm4, %v2368_v29, %v1427_v61  ;;  %v1407_v61 = vld [vmem:[%s3300_s3 + $0x8] sm:$0xff] }
 0x23d   :  { %v2370_v46 = vpop.eup %2369  ;;  %v1502_v7 = vmul.f32 %v1431_v59, %v1406_v14  ;;  %v1297_v17 = vadd.f32 %v1281_v43, %v1241_v26 }
 0x23e   :  { %v1433_v22 = vmul.f32 %v2370_v46, %v1415_v33  ;;  %2371 = vrsqrt.f32 %v1416_v53  ;;  %vm1439_vm5 = vweird.f32 %v2370_v46  ;;  %vm1448_vm9 = vweird.f32 %v1416_v53 }
 0x23f   :  { %1536 = vperm.xlu2 %2366, %v1502_v7   ;;  %v1518_v35 = vmul.f32 %v1502_v7, %v3049_v16  ;;  %v1345_v60 = vadd.f32 %v1329_v42, %v1297_v17  ;;  %vm1440_vm7 = vmor %vm1438_vm6, %vm1439_vm5 }
 0x240   :  { %v1434_v55 = vmul.f32 %v2370_v46, %v1433_v22 }
 0x241   :  { %v1526_v11 = vsub.f32 %v1510_v38, %v1518_v35 }
 0x242   :  { %v1435_v40 = vmul.f32 0.5, %v1434_v55 }
 0x243   :  { %1584 = vperm.xlu1 %2365, %v1526_v11   ;;  %v1244_v56 = vpop.xlane.xlu1 %1243  ;;  %v1332_v54 = vpop.xlane.xlu2 %1331 }
 0x244   :  { %v2372_v29 = vpop.eup %2371  ;;  %v1436_v25 = vsub.f32 1.5, %v1435_v40  ;;  %v1377_v27 = vpop.xlane.xlu0 %1376  ;;  %v1408_v40 = vld [vmem:[%s3300_s3 + $0x10] sm:$0xff] }
 0x245   :  { %v1443_v31 = vmul.f32 %v2372_v29, %v1416_v53  ;;  %v1393_v14 = vadd.f32 %v1377_v27, %v1345_v60  ;;  %vm1449_vm8 = vweird.f32 %v2372_v29 }
 0x246   :  { %v1437_v43 = vmul.f32 %v2370_v46, %v1436_v25  ;;  %vm1450_vm10 = vmor %vm1448_vm9, %vm1449_vm8 }
 0x247   :  { %v1444_v16 = vmul.f32 %v2372_v29, %v1443_v31  ;;  %v1401_v26 = vmul.f32 0.004166667, %v1393_v14 }
 0x248   :  { %v1441_v59 = vsel %vm1440_vm7, %v2370_v46, %v1437_v43  ;;  %v1511_v46 = vld [vmem:[%s3301_s4 + $0x8] sm:$0xff] }
 0x249   :  { %v1445_v7 = vmul.f32 0.5, %v1444_v16  ;;  %v1417_v42 = vadd.f32 1e-05, %v1401_v26  ;;  %v1503_v22 = vmul.f32 %v1441_v59, %v1407_v61 }
 0x24b   :  { %v1446_v38 = vsub.f32 1.5, %v1445_v7  ;;  %2373 = vrsqrt.f32 %v1417_v42  ;;  %1541 = vperm.xlu0 %2364, %v1503_v22   ;;  %v1380_v17 = vpop.xlane.xlu1 %1379  ;;  %v1247_v35 = vpop.xlane.xlu2 %1246  ;;  %v1519_v11 = vmul.f32 %v1503_v22, %v3060_v48  ;;  %v1512_v48 = vld [vmem:[%s3301_s4 + $0x10] sm:$0xff]  ;;  %vm1458_vm12 = vweird.f32 %v1417_v42 }
 0x24c   :  { %v1284_v55 = vpop.xlane.xlu0 %1283 }
 0x24d   :  { %v1298_v33 = vadd.f32 %v1284_v55, %v1244_v56  ;;  %v1447_v60 = vmul.f32 %v2372_v29, %v1446_v38  ;;  %v1527_v43 = vsub.f32 %v1511_v46, %v1519_v11 }
 0x24f   :  { %v1346_v25 = vadd.f32 %v1332_v54, %v1298_v33  ;;  %v1451_v27 = vsel %vm1450_vm10, %v2372_v29, %v1447_v60 }
 0x250   :  { %v1504_v31 = vmul.f32 %v1451_v27, %v1408_v40 }
 0x251   :  { %v2374_v14 = vpop.eup %2373  ;;  %v1394_v61 = vadd.f32 %v1380_v17, %v1346_v25 }
 0x252   :  { %v1453_v53 = vmul.f32 %v2374_v14, %v1417_v42  ;;  %1546 = vperm.xlu1 %2365, %v1504_v31   ;;  %v1520_v56 = vmul.f32 %v1504_v31, %v3072_v62  ;;  %vm1459_vm11 = vweird.f32 %v2374_v14  ;;  %v1409_v62 = vld [vmem:[%s3300_s3 + $0x18] sm:$0xff] }
 0x253   :  { %v1402_v16 = vmul.f32 0.004166667, %v1394_v61  ;;  %1589 = vperm.xlu0 %2364, %v1527_v43   ;;  %v1287_v26 = vpop.xlane.xlu1 %1286  ;;  %v1383_v59 = vpop.xlane.xlu2 %1382  ;;  %vm1460_vm13 = vmor %vm1458_vm12, %vm1459_vm11  ;;  %v1513_v42 = vld [vmem:[%s3301_s4 + $0x18] sm:$0xff] }
 0x254   :  { %v1454_v7 = vmul.f32 %v2374_v14, %v1453_v53  ;;  %v1335_v22 = vpop.xlane.xlu0 %1334  ;;  %v1299_v54 = vadd.f32 %v1287_v26, %v1247_v35  ;;  %v1528_v29 = vsub.f32 %v1512_v48, %v1520_v56 }
 0x255   :  { %v1418_v38 = vadd.f32 1e-05, %v1402_v16 }
 0x256   :  { %v1455_v55 = vmul.f32 0.5, %v1454_v7  ;;  %v1347_v17 = vadd.f32 %v1335_v22, %v1299_v54  ;;  %1594 = vperm.xlu2 %2366, %v1528_v29  }
 0x257   :  { %2375 = vrsqrt.f32 %v1418_v38  ;;  %vm1468_vm15 = vweird.f32 %v1418_v38 }
 0x258   :  { %v1456_v33 = vsub.f32 1.5, %v1455_v55  ;;  %v1395_v11 = vadd.f32 %v1383_v59, %v1347_v17 }
 0x25a   :  { %v1403_v40 = vmul.f32 0.004166667, %v1395_v11  ;;  %v1457_v60 = vmul.f32 %v2374_v14, %v1456_v33  ;;  %v1410_v33 = vld [vmem:[%s3300_s3 + $0x20] sm:$0xff] }
 0x25b   :  { %v1338_v46 = vpop.xlane.xlu1 %1337  ;;  %v1290_v27 = vpop.xlane.xlu2 %1289 }
 0x25c   :  { %v1419_v25 = vadd.f32 1e-05, %v1403_v40  ;;  %v1250_v35 = vpop.xlane.xlu0 %1249  ;;  %v1461_v31 = vsel %vm1460_vm13, %v2374_v14, %v1457_v60 }
 0x25d   :  { %v2376_v61 = vpop.eup %2375  ;;  %v1505_v43 = vmul.f32 %v1461_v31, %v1409_v62  ;;  %v1300_v53 = vadd.f32 %v1290_v27, %v1250_v35  ;;  %v1514_v27 = vld [vmem:[%s3301_s4 + $0x20] sm:$0xff] }
 0x25e   :  { %v1463_v48 = vmul.f32 %v2376_v61, %v1418_v38  ;;  %2377 = vrsqrt.f32 %v1419_v25  ;;  %vm1469_vm14 = vweird.f32 %v2376_v61  ;;  %vm1478_vm2 = vweird.f32 %v1419_v25 }
 0x25f   :  { %1551 = vperm.xlu0 %2364, %v1505_v43   ;;  %v1521_v56 = vmul.f32 %v1505_v43, %v3091_v30  ;;  %v1348_v7 = vadd.f32 %v1338_v46, %v1300_v53  ;;  %vm1470_vm0 = vmor %vm1468_vm15, %vm1469_vm14  ;;  %vm1806_vm14 = vcmask 486400  }
 0x260   :  { %v1464_v16 = vmul.f32 %v2376_v61, %v1463_v48 }
 0x261   :  { %v1529_v26 = vsub.f32 %v1513_v42, %v1521_v56 }
 0x262   :  { %v1465_v59 = vmul.f32 0.5, %v1464_v16 }
 0x263   :  { %1599 = vperm.xlu1 %2365, %v1529_v26   ;;  %v1253_v17 = vpop.xlane.xlu1 %1252  ;;  %v1341_v56 = vpop.xlane.xlu2 %1340 }
 0x264   :  { %v2378_v22 = vpop.eup %2377  ;;  %v1466_v54 = vsub.f32 1.5, %v1465_v59  ;;  %v1386_v14 = vpop.xlane.xlu0 %1385 }
 0x265   :  { %v1473_v29 = vmul.f32 %v2378_v22, %v1419_v25  ;;  %v1396_v55 = vadd.f32 %v1386_v14, %v1348_v7  ;;  %vm1479_vm1 = vweird.f32 %v2378_v22 }
 0x266   :  { %v1467_v11 = vmul.f32 %v2376_v61, %v1466_v54  ;;  %vm1480_vm3 = vmor %vm1478_vm2, %vm1479_vm1 }
 0x267   :  { %v1474_v30 = vmul.f32 %v2378_v22, %v1473_v29  ;;  %v1404_v40 = vmul.f32 0.004166667, %v1396_v55 }
 0x268   :  { %v1471_v62 = vsel %vm1470_vm0, %v2376_v61, %v1467_v11  ;;  %v1411_v61 = vld [vmem:[%s3300_s3 + $0x28] sm:$0xff]  ;;  %v1412_v11 = vld [vmem:[%s3300_s3 + $0x30] sm:$0xff] }
 0x269   :  { %v1475_v60 = vmul.f32 0.5, %v1474_v30  ;;  %v1420_v35 = vadd.f32 1e-05, %v1404_v40  ;;  %v1506_v46 = vmul.f32 %v1471_v62, %v1410_v33 }
 0x26b   :  { %v1476_v31 = vsub.f32 1.5, %v1475_v60  ;;  %2379 = vrsqrt.f32 %v1420_v35  ;;  %1556 = vperm.xlu2 %2366, %v1506_v46   ;;  %v1522_v38 = vmul.f32 %v1506_v46, %v3106_v9  ;;  %v1389_v59 = vpop.xlane.xlu1 %1388  ;;  %vm1488_vm5 = vweird.f32 %v1420_v35  ;;  %v1516_v46 = vld [vmem:[%s3301_s4 + $0x30] sm:$0xff] }
 0x26c   :  { %v1293_v43 = vpop.xlane.xlu0 %1292 }
 0x26d   :  { %v1301_v48 = vadd.f32 %v1293_v43, %v1253_v17  ;;  %v1530_v42 = vsub.f32 %v1514_v27, %v1522_v38  ;;  %v1477_v53 = vmul.f32 %v2378_v22, %v1476_v31 }
 0x26f   :  { %v1349_v16 = vadd.f32 %v1341_v56, %v1301_v48  ;;  %1604 = vperm.xlu0 %2364, %v1530_v42   ;;  %v1481_v26 = vsel %vm1480_vm3, %v2378_v22, %v1477_v53  ;;  %v1413_v48 = vld [vmem:[%s3300_s3 + $0x38] sm:$0xff] }
 0x270   :  { %v1507_v7 = vmul.f32 %v1481_v26, %v1411_v61  ;;  %v1517_v56 = vld [vmem:[%s3301_s4 + $0x38] sm:$0xff] }
 0x271   :  { %v2380_v54 = vpop.eup %2379  ;;  %v1397_v14 = vadd.f32 %v1389_v59, %v1349_v16  ;;  %v1515_v59 = vld [vmem:[%s3301_s4 + $0x28] sm:$0xff] }
 0x272   :  { %v1483_v29 = vmul.f32 %v2380_v54, %v1420_v35  ;;  %1561 = vperm.xlu1 %2365, %v1507_v7   ;;  %vm1489_vm4 = vweird.f32 %v2380_v54  ;;  %v1523_v26 = vmul.f32 %v1507_v7, %v3117_v13 }
 0x273   :  { %v1405_v9 = vmul.f32 0.004166667, %v1397_v14  ;;  %vm1490_vm6 = vmor %vm1488_vm5, %vm1489_vm4 }
 0x274   :  { %v1484_v25 = vmul.f32 %v2380_v54, %v1483_v29 }
 0x275   :  { %v1421_v55 = vadd.f32 1e-05, %v1405_v9 }
 0x276   :  { %v1485_v17 = vmul.f32 0.5, %v1484_v25 }
 0x277   :  { %2381 = vrsqrt.f32 %v1421_v55  ;;  %vm1498_vm8 = vweird.f32 %v1421_v55 }
 0x278   :  { %v1486_v33 = vsub.f32 1.5, %v1485_v17 }
 0x27a   :  { %v1487_v30 = vmul.f32 %v2380_v54, %v1486_v33 }
 0x27c   :  { %v1491_v22 = vsel %vm1490_vm6, %v2380_v54, %v1487_v30  ;;  %v1531_v54 = vsub.f32 %v1515_v59, %v1523_v26 }
 0x27d   :  { %v2382_v40 = vpop.eup %2381  ;;  %v1508_v62 = vmul.f32 %v1491_v22, %v1412_v11 }
 0x27e   :  { %v1493_v60 = vmul.f32 %v2382_v40, %v1421_v55  ;;  %vm1499_vm7 = vweird.f32 %v2382_v40 }
 0x27f   :  { %1566 = vperm.xlu0 %2364, %v1508_v62   ;;  %v1524_v27 = vmul.f32 %v1508_v62, %v3139_v10  ;;  %vm1500_vm9 = vmor %vm1498_vm8, %vm1499_vm7 }
 0x280   :  { %v1494_v31 = vmul.f32 %v2382_v40, %v1493_v60 }
 0x281   :  { %v1532_v38 = vsub.f32 %v1516_v46, %v1524_v27 }
 0x282   :  { %v1495_v35 = vmul.f32 0.5, %v1494_v31 }
 0x283   :  { %1614 = vperm.xlu1 %2365, %v1532_v38  }
 0x284   :  { %v1496_v43 = vsub.f32 1.5, %v1495_v35 }
 0x286   :  { %v1497_v42 = vmul.f32 %v2382_v40, %v1496_v43 }
 0x288   :  { %v1501_v61 = vsel %vm1500_vm9, %v2382_v40, %v1497_v42 }
 0x289   :  { %v1509_v53 = vmul.f32 %v1501_v61, %v1413_v48 }
 0x28b   :  { %1571 = vperm.xlu2 %2366, %v1509_v53   ;;  %v1525_v10 = vmul.f32 %v1509_v53, %v3151_v52 }
 0x28d   :  { %v1533_v16 = vsub.f32 %v1517_v56, %v1525_v10 }
 0x28f   :  { %1619 = vperm.xlu0 %2364, %v1533_v16  }
 0x293   :  { %1609 = vperm.xlu2 %2366, %v1531_v54  }
 0x299   :  { %v1537_v14 = vpop.permute.xlu2 %1536 }
 0x29a   :  { %v1574_v29 = vmul.f32 %v1537_v14, %v2801_v2  ;;  %v1654_v9 = vmul.f32 %v1537_v14, %v2888_v15  ;;  %v1702_v25 = vmul.f32 %v1537_v14, %v2931_v20  ;;  %v1750_v55 = vmul.f32 %v1537_v14, %v2967_v18 }
 0x2b0   :  { %v1595_v26 = vpop.permute.xlu2 %1594 }
 0x2b5   :  { %v1585_v52 = vpop.permute.xlu1 %1584 }
 0x2b6   :  { %v1622_v17 = vadd.f32 %v1585_v52, %v1574_v29  ;;  %v1662_v33 = vadd.f32 %v1654_v9, %v1585_v52  ;;  %v1710_v13 = vadd.f32 %v1702_v25, %v1585_v52  ;;  %v1758_v7 = vadd.f32 %v1750_v55, %v1585_v52 }
 0x2b8   :  { %vm1630_vm10 = vcmp.ge.f32.partialorder %v1622_v17, 0.0  ;;  %v1638_v11 = vmul.f32 0.01, %v1622_v17  ;;  %vm1670_vm11 = vcmp.ge.f32.partialorder %v1662_v33, 0.0  ;;  %v1678_v30 = vmul.f32 0.01, %v1662_v33 }
 0x2b9   :  { %vm1718_vm12 = vcmp.ge.f32.partialorder %v1710_v13, 0.0  ;;  %v1726_v22 = vmul.f32 0.01, %v1710_v13  ;;  %v1774_v2 = vmul.f32 0.01, %v1758_v7  ;;  %vm1766_vm13 = vcmp.ge.f32.partialorder %v1758_v7, 0.0 }
 0x2ba   :  { %v1646_v40 = vsel %vm1630_vm10, %v1622_v17, %v1638_v11  ;;  %v1686_v62 = vsel %vm1670_vm11, %v1662_v33, %v1678_v30 }
 0x2bb   :  { %v1694_v60 = vmax.f32 %v1646_v40, %v1686_v62  ;;  %v1734_v15 = vsel %vm1718_vm12, %v1710_v13, %v1726_v22  ;;  %v1782_v18 = vsel %vm1766_vm13, %v1758_v7, %v1774_v2 }
 0x2bd   :  { %v1742_v20 = vmax.f32 %v1694_v60, %v1734_v15  ;;  %v1542_v46 = vpop.permute.xlu0 %1541 }
 0x2be   :  { %v1575_v38 = vmul.f32 %v1542_v46, %v2814_v12  ;;  %v1655_v35 = vmul.f32 %v1542_v46, %v2894_v28  ;;  %v1703_v43 = vmul.f32 %v1542_v46, %v2946_v45  ;;  %v1751_v48 = vmul.f32 %v1542_v46, %v2978_v36 }
 0x2bf   :  { %v1790_v27 = vmax.f32 %v1742_v20, %v1782_v18 }
 0x2c1   :  { %v1798_v31 = vpack.c.bf16 %v1790_v27, %v1790_v27 }
 0x2c3   :  { %1807 = vst.msk [vmem:[%s3302_s5] sm:$0xf] %vm1806_vm14, %v1798_v31 }
 0x2c4   :  { %v1547_v42 = vpop.permute.xlu1 %1546 }
 0x2c5   :  { %v1590_v61 = vpop.permute.xlu0 %1589  ;;  %v1576_v53 = vmul.f32 %v1547_v42, %v2825_v21  ;;  %v1656_v56 = vmul.f32 %v1547_v42, %v2900_v37  ;;  %v1704_v10 = vmul.f32 %v1547_v42, %v2959_v57  ;;  %v1752_v16 = vmul.f32 %v1547_v42, %v2990_v1 }
 0x2c6   :  { %v1623_v59 = vadd.f32 %v1590_v61, %v1575_v38  ;;  %v1663_v54 = vadd.f32 %v1655_v35, %v1590_v61  ;;  %v1711_v12 = vadd.f32 %v1703_v43, %v1590_v61  ;;  %v1759_v14 = vadd.f32 %v1751_v48, %v1590_v61 }
 0x2c7   :  { %v1624_v28 = vadd.f32 %v1595_v26, %v1576_v53  ;;  %v1664_v29 = vadd.f32 %v1656_v56, %v1595_v26  ;;  %v1712_v45 = vadd.f32 %v1704_v10, %v1595_v26  ;;  %v1760_v37 = vadd.f32 %v1752_v16, %v1595_v26 }
 0x2c8   :  { %vm1631_vm15 = vcmp.ge.f32.partialorder %v1623_v59, 0.0  ;;  %v1639_v36 = vmul.f32 0.01, %v1623_v59  ;;  %vm1671_vm0 = vcmp.ge.f32.partialorder %v1663_v54, 0.0  ;;  %v1679_v9 = vmul.f32 0.01, %v1663_v54 }
 0x2c9   :  { %vm1719_vm1 = vcmp.ge.f32.partialorder %v1711_v12, 0.0  ;;  %v1727_v21 = vmul.f32 0.01, %v1711_v12  ;;  %v1775_v25 = vmul.f32 0.01, %v1759_v14  ;;  %vm1632_vm2 = vcmp.ge.f32.partialorder %v1624_v28, 0.0 }
 0x2ca   :  { %v1647_v55 = vsel %vm1631_vm15, %v1623_v59, %v1639_v36  ;;  %v1687_v57 = vsel %vm1671_vm0, %v1663_v54, %v1679_v9  ;;  %v1640_v1 = vmul.f32 0.01, %v1624_v28  ;;  %vm1767_vm3 = vcmp.ge.f32.partialorder %v1759_v14, 0.0 }
 0x2cb   :  { %v1695_v52 = vmax.f32 %v1647_v55, %v1687_v57  ;;  %vm1672_vm4 = vcmp.ge.f32.partialorder %v1664_v29, 0.0  ;;  %v1735_v17 = vsel %vm1719_vm1, %v1711_v12, %v1727_v21  ;;  %v1680_v13 = vmul.f32 0.01, %v1664_v29  ;;  %v1557_v12 = vpop.permute.xlu2 %1556 }
 0x2cc   :  { %v1648_v33 = vsel %vm1632_vm2, %v1624_v28, %v1640_v1  ;;  %v1728_v7 = vmul.f32 0.01, %v1712_v45  ;;  %vm1720_vm5 = vcmp.ge.f32.partialorder %v1712_v45, 0.0  ;;  %v1783_v30 = vsel %vm1767_vm3, %v1759_v14, %v1775_v25 }
 0x2cd   :  { %v1743_v11 = vmax.f32 %v1695_v52, %v1735_v17  ;;  %v1688_v22 = vsel %vm1672_vm4, %v1664_v29, %v1680_v13  ;;  %v1776_v40 = vmul.f32 0.01, %v1760_v37  ;;  %vm1768_vm6 = vcmp.ge.f32.partialorder %v1760_v37, 0.0 }
 0x2ce   :  { %v1696_v2 = vmax.f32 %v1648_v33, %v1688_v22  ;;  %v1736_v60 = vsel %vm1720_vm5, %v1712_v45, %v1728_v7  ;;  %v1578_v45 = vmul.f32 %v1557_v12, %v2849_v39  ;;  %v1658_v36 = vmul.f32 %v1557_v12, %v2912_v63 }
 0x2cf   :  { %v1791_v62 = vmax.f32 %v1743_v11, %v1783_v30  ;;  %v1784_v18 = vsel %vm1768_vm6, %v1760_v37, %v1776_v40  ;;  %v1706_v9 = vmul.f32 %v1557_v12, %v2976_v34  ;;  %v1754_v21 = vmul.f32 %v1557_v12, %v3014_v3 }
 0x2d0   :  { %v1744_v20 = vmax.f32 %v1696_v2, %v1736_v60 }
 0x2d1   :  { %v1799_v15 = vpack.c.bf16 %v1791_v62, %v1791_v62  ;;  %v1552_v46 = vpop.permute.xlu0 %1551 }
 0x2d2   :  { %v1792_v27 = vmax.f32 %v1744_v20, %v1784_v18  ;;  %v1577_v31 = vmul.f32 %v1552_v46, %v2838_v8  ;;  %v1657_v38 = vmul.f32 %v1552_v46, %v2906_v49  ;;  %v1705_v35 = vmul.f32 %v1552_v46, %v2965_v47 }
 0x2d3   :  { %1808 = vst.msk [vmem:[%s3302_s5 + $0x4] sm:$0xf] %vm1806_vm14, %v1799_v15  ;;  %v1753_v43 = vmul.f32 %v1552_v46, %v3002_v19 }
 0x2d4   :  { %v1800_v48 = vpack.c.bf16 %v1792_v27, %v1792_v27 }
 0x2d5   :  { %v1600_v42 = vpop.permute.xlu1 %1599 }
 0x2d6   :  { %v1625_v61 = vadd.f32 %v1600_v42, %v1577_v31  ;;  %v1665_v53 = vadd.f32 %v1657_v38, %v1600_v42  ;;  %v1713_v56 = vadd.f32 %v1705_v35, %v1600_v42  ;;  %v1761_v10 = vadd.f32 %v1753_v43, %v1600_v42  ;;  %1809 = vst.msk [vmem:[%s3302_s5 + $0x8] sm:$0xf] %vm1806_vm14, %v1800_v48 }
 0x2d8   :  { %vm1633_vm7 = vcmp.ge.f32.partialorder %v1625_v61, 0.0  ;;  %v1641_v16 = vmul.f32 0.01, %v1625_v61  ;;  %vm1673_vm8 = vcmp.ge.f32.partialorder %v1665_v53, 0.0  ;;  %v1681_v8 = vmul.f32 0.01, %v1665_v53 }
 0x2d9   :  { %vm1721_vm9 = vcmp.ge.f32.partialorder %v1713_v56, 0.0  ;;  %v1729_v49 = vmul.f32 0.01, %v1713_v56  ;;  %v1777_v19 = vmul.f32 0.01, %v1761_v10  ;;  %vm1769_vm10 = vcmp.ge.f32.partialorder %v1761_v10, 0.0 }
 0x2da   :  { %v1649_v47 = vsel %vm1633_vm7, %v1625_v61, %v1641_v16  ;;  %v1689_v26 = vsel %vm1673_vm8, %v1665_v53, %v1681_v8 }
 0x2db   :  { %v1697_v59 = vmax.f32 %v1649_v47, %v1689_v26  ;;  %v1737_v54 = vsel %vm1721_vm9, %v1713_v56, %v1729_v49  ;;  %v1785_v28 = vsel %vm1769_vm10, %v1761_v10, %v1777_v19 }
 0x2dd   :  { %v1745_v14 = vmax.f32 %v1697_v59, %v1737_v54 }
 0x2df   :  { %v1793_v29 = vmax.f32 %v1745_v14, %v1785_v28 }
 0x2e1   :  { %v1801_v25 = vpack.c.bf16 %v1793_v29, %v1793_v29  ;;  %v1605_v37 = vpop.permute.xlu0 %1604 }
 0x2e2   :  { %v1626_v55 = vadd.f32 %v1605_v37, %v1578_v45  ;;  %v1666_v57 = vadd.f32 %v1658_v36, %v1605_v37  ;;  %v1714_v1 = vadd.f32 %v1706_v9, %v1605_v37  ;;  %v1762_v52 = vadd.f32 %v1754_v21, %v1605_v37 }
 0x2e3   :  { %1810 = vst.msk [vmem:[%s3302_s5 + $0xc] sm:$0xf] %vm1806_vm14, %v1801_v25 }
 0x2e4   :  { %vm1634_vm11 = vcmp.ge.f32.partialorder %v1626_v55, 0.0  ;;  %v1642_v17 = vmul.f32 0.01, %v1626_v55  ;;  %vm1674_vm12 = vcmp.ge.f32.partialorder %v1666_v57, 0.0  ;;  %v1682_v39 = vmul.f32 0.01, %v1666_v57  ;;  %v1562_v22 = vpop.permute.xlu1 %1561 }
 0x2e5   :  { %vm1722_vm13 = vcmp.ge.f32.partialorder %v1714_v1, 0.0  ;;  %v1730_v63 = vmul.f32 0.01, %v1714_v1  ;;  %v3263_v34 = vpop.permute.xlu2 %1571  ;;  %v1778_v13 = vmul.f32 0.01, %v1762_v52  ;;  %vm1770_vm15 = vcmp.ge.f32.partialorder %v1762_v52, 0.0 }
 0x2e6   :  { %v1650_v3 = vsel %vm1634_vm11, %v1626_v55, %v1642_v17  ;;  %v1690_v33 = vsel %vm1674_vm12, %v1666_v57, %v1682_v39  ;;  %v1579_v2 = vmul.f32 %v1562_v22, %v2858_v51  ;;  %v1659_v60 = vmul.f32 %v1562_v22, %v2920_v44 }
 0x2e7   :  { %v1698_v7 = vmax.f32 %v1650_v3, %v1690_v33  ;;  %v1738_v11 = vsel %vm1722_vm13, %v1714_v1, %v1730_v63  ;;  %v1786_v40 = vsel %vm1770_vm15, %v1762_v52, %v1778_v13  ;;  %v1707_v15 = vmul.f32 %v1562_v22, %v2988_v0 }
 0x2e8   :  { %v1755_v20 = vmul.f32 %v1562_v22, %v3021_v32  ;;  %v1581_v55 = vmul.f32 %v3263_v34, %v2882_v41  ;;  %v1661_v57 = vmul.f32 %v3263_v34, %v2948_v24  ;;  %v1709_v1 = vmul.f32 %v3263_v34, %v3012_v23 }
 0x2e9   :  { %v1746_v30 = vmax.f32 %v1698_v7, %v1738_v11  ;;  %v1757_v52 = vmul.f32 %v3263_v34, %v3031_v50 }
 0x2eb   :  { %v1794_v62 = vmax.f32 %v1746_v30, %v1786_v40 }
 0x2ed   :  { %v1802_v46 = vpack.c.bf16 %v1794_v62, %v1794_v62  ;;  %v1610_v18 = vpop.permute.xlu2 %1609 }
 0x2ee   :  { %v1627_v27 = vadd.f32 %v1610_v18, %v1579_v2  ;;  %v1667_v31 = vadd.f32 %v1659_v60, %v1610_v18  ;;  %v1715_v38 = vadd.f32 %v1707_v15, %v1610_v18  ;;  %v1763_v35 = vadd.f32 %v1755_v20, %v1610_v18 }
 0x2ef   :  { %1811 = vst.msk [vmem:[%s3302_s5 + $0x10] sm:$0xf] %vm1806_vm14, %v1802_v46 }
 0x2f0   :  { %vm1635_vm0 = vcmp.ge.f32.partialorder %v1627_v27, 0.0  ;;  %v1643_v43 = vmul.f32 0.01, %v1627_v27  ;;  %vm1675_vm1 = vcmp.ge.f32.partialorder %v1667_v31, 0.0  ;;  %v1683_v51 = vmul.f32 0.01, %v1667_v31 }
 0x2f1   :  { %vm1723_vm2 = vcmp.ge.f32.partialorder %v1715_v38, 0.0  ;;  %v1731_v44 = vmul.f32 0.01, %v1715_v38  ;;  %v1779_v0 = vmul.f32 0.01, %v1763_v35  ;;  %v1567_v48 = vpop.permute.xlu0 %1566  ;;  %vm1771_vm3 = vcmp.ge.f32.partialorder %v1763_v35, 0.0 }
 0x2f2   :  { %v1651_v32 = vsel %vm1635_vm0, %v1627_v27, %v1643_v43  ;;  %v1691_v42 = vsel %vm1675_vm1, %v1667_v31, %v1683_v51  ;;  %v1580_v53 = vmul.f32 %v1567_v48, %v2871_v58  ;;  %v1660_v10 = vmul.f32 %v1567_v48, %v2933_v6 }
 0x2f3   :  { %v1699_v61 = vmax.f32 %v1651_v32, %v1691_v42  ;;  %v1739_v56 = vsel %vm1723_vm2, %v1715_v38, %v1731_v44  ;;  %v1708_v16 = vmul.f32 %v1567_v48, %v3000_v5  ;;  %v1756_v8 = vmul.f32 %v1567_v48, %v3026_v4 }
 0x2f4   :  { %v1787_v47 = vsel %vm1771_vm3, %v1763_v35, %v1779_v0 }
 0x2f5   :  { %v1747_v49 = vmax.f32 %v1699_v61, %v1739_v56  ;;  %v1615_v26 = vpop.permute.xlu1 %1614 }
 0x2f6   :  { %v1628_v19 = vadd.f32 %v1615_v26, %v1580_v53  ;;  %v1668_v59 = vadd.f32 %v1660_v10, %v1615_v26  ;;  %v1716_v54 = vadd.f32 %v1708_v16, %v1615_v26  ;;  %v1764_v12 = vadd.f32 %v1756_v8, %v1615_v26 }
 0x2f7   :  { %v1795_v14 = vmax.f32 %v1747_v49, %v1787_v47 }
 0x2f8   :  { %vm1636_vm4 = vcmp.ge.f32.partialorder %v1628_v19, 0.0  ;;  %v1644_v28 = vmul.f32 0.01, %v1628_v19  ;;  %vm1676_vm5 = vcmp.ge.f32.partialorder %v1668_v59, 0.0  ;;  %v1684_v29 = vmul.f32 0.01, %v1668_v59 }
 0x2f9   :  { %v1803_v58 = vpack.c.bf16 %v1795_v14, %v1795_v14  ;;  %vm1724_vm6 = vcmp.ge.f32.partialorder %v1716_v54, 0.0  ;;  %v1732_v45 = vmul.f32 0.01, %v1716_v54  ;;  %v1780_v5 = vmul.f32 0.01, %v1764_v12 }
 0x2fa   :  { %v1652_v6 = vsel %vm1636_vm4, %v1628_v19, %v1644_v28  ;;  %v1692_v36 = vsel %vm1676_vm5, %v1668_v59, %v1684_v29  ;;  %vm1772_vm7 = vcmp.ge.f32.partialorder %v1764_v12, 0.0 }
 0x2fb   :  { %1812 = vst.msk [vmem:[%s3302_s5 + $0x14] sm:$0xf] %vm1806_vm14, %v1803_v58  ;;  %v1700_v4 = vmax.f32 %v1652_v6, %v1692_v36  ;;  %v1740_v9 = vsel %vm1724_vm6, %v1716_v54, %v1732_v45  ;;  %v1788_v25 = vsel %vm1772_vm7, %v1764_v12, %v1780_v5 }
 0x2fd   :  { %v1748_v21 = vmax.f32 %v1700_v4, %v1740_v9 }
 0x2ff   :  { %v1796_v37 = vmax.f32 %v1748_v21, %v1788_v25 }
 0x301   :  { %v1804_v17 = vpack.c.bf16 %v1796_v37, %v1796_v37  ;;  %v1620_v39 = vpop.permute.xlu0 %1619 }
 0x302   :  { %v1629_v63 = vadd.f32 %v1620_v39, %v1581_v55  ;;  %v1669_v3 = vadd.f32 %v1661_v57, %v1620_v39  ;;  %v1717_v33 = vadd.f32 %v1709_v1, %v1620_v39  ;;  %v1765_v13 = vadd.f32 %v1757_v52, %v1620_v39 }
 0x303   :  { %1813 = vst.msk [vmem:[%s3302_s5 + $0x18] sm:$0xf] %vm1806_vm14, %v1804_v17 }
 0x304   :  { %vm1637_vm8 = vcmp.ge.f32.partialorder %v1629_v63, 0.0  ;;  %v1645_v41 = vmul.f32 0.01, %v1629_v63  ;;  %vm1677_vm9 = vcmp.ge.f32.partialorder %v1669_v3, 0.0  ;;  %v1685_v24 = vmul.f32 0.01, %v1669_v3 }
 0x305   :  { %vm1725_vm10 = vcmp.ge.f32.partialorder %v1717_v33, 0.0  ;;  %v1733_v23 = vmul.f32 0.01, %v1717_v33  ;;  %v1781_v50 = vmul.f32 0.01, %v1765_v13  ;;  %vm1773_vm11 = vcmp.ge.f32.partialorder %v1765_v13, 0.0 }
 0x306   :  { %v1653_v7 = vsel %vm1637_vm8, %v1629_v63, %v1645_v41  ;;  %v1693_v11 = vsel %vm1677_vm9, %v1669_v3, %v1685_v24 }
 0x307   :  { %v1701_v34 = vmax.f32 %v1653_v7, %v1693_v11  ;;  %v1741_v30 = vsel %vm1725_vm10, %v1717_v33, %v1733_v23  ;;  %v1789_v40 = vsel %vm1773_vm11, %v1765_v13, %v1781_v50 }
 0x309   :  { %v1749_v22 = vmax.f32 %v1701_v34, %v1741_v30 }
 0x30b   :  { %v1797_v62 = vmax.f32 %v1749_v22, %v1789_v40 }
 0x30d   :  { %v1805_v2 = vpack.c.bf16 %v1797_v62, %v1797_v62 }
 0x30f   :  { %1814 = vst.msk [vmem:[%s3302_s5 + $0x1c] sm:$0xf] %vm1806_vm14, %v1805_v2 }

// kernel: audio_magic_net_forward.7
= control target key start
LH: loop header
LB: loop body
LE: loop exit
PB: predicated region body
PF: predicated region fallthrough
CT: control target
= control target key end

     0   :  { %s2252_s0 = inlined_call_operand.vmem [shape: bf16[2,1920], index: 0, kind: input, shape index: {}]   ;;  %s2253_s1 = inlined_call_operand.vmem [shape: bf16[1920,50], index: 1, kind: input, shape index: {}]   ;;  %s2254_s2 = inlined_call_operand.vmem [shape: f32[1,50], index: 2, kind: input, shape index: {}]   ;;  %s2255_s3 = inlined_call_operand.hbm [shape: f32[2,50], index: 3, kind: output, shape index: {}]  }
   0x1   :  { %v1715_v0 = vld [vmem:[%s2253_s1 + $0x38] sm:$0xff]  ;;  %v1714_v4 = vld [vmem:[%s2253_s1 + $0x30] sm:$0xff]  ;;  %v1713_v8 = vld [vmem:[%s2253_s1 + $0x28] sm:$0xff] }
   0x2   :  { %v1723_v1 = vld [vmem:[%s2253_s1 + $0x78] sm:$0xff]  ;;  %1015 = vmatpush.bf16.msra.mxu0 %v1715_v0  ;;  %v1722_v5 = vld [vmem:[%s2253_s1 + $0x70] sm:$0xff]  ;;  %v1721_v9 = vld [vmem:[%s2253_s1 + $0x68] sm:$0xff] }
   0x3   :  { %v1731_v2 = vld [vmem:[%s2253_s1 + $0xb8] sm:$0xff]  ;;  %1028 = vmatpush.bf16.msra.mxu1 %v1723_v1  ;;  %v1730_v6 = vld [vmem:[%s2253_s1 + $0xb0] sm:$0xff]  ;;  %v1729_v10 = vld [vmem:[%s2253_s1 + $0xa8] sm:$0xff] }
   0x4   :  { %v1739_v3 = vld [vmem:[%s2253_s1 + $0xf8] sm:$0xff]  ;;  %1041 = vmatpush.bf16.msra.mxu2 %v1731_v2  ;;  %v1738_v7 = vld [vmem:[%s2253_s1 + $0xf0] sm:$0xff]  ;;  %v1737_v11 = vld [vmem:[%s2253_s1 + $0xe8] sm:$0xff] }
   0x5   :  { %1054 = vmatpush.bf16.msra.mxu3 %v1739_v3  ;;  %v1712_v12 = vld [vmem:[%s2253_s1 + $0x20] sm:$0xff]  ;;  %v1711_v16 = vld [vmem:[%s2253_s1 + $0x18] sm:$0xff]  ;;  %v1710_v21 = vld [vmem:[%s2253_s1 + $0x10] sm:$0xff] }
   0x6   :  { %1016 = vmatpush.bf16.msra.mxu0 %v1714_v4  ;;  %v1720_v13 = vld [vmem:[%s2253_s1 + $0x60] sm:$0xff]  ;;  %v1719_v17 = vld [vmem:[%s2253_s1 + $0x58] sm:$0xff]  ;;  %v1718_v22 = vld [vmem:[%s2253_s1 + $0x50] sm:$0xff] }
   0x7   :  { %1029 = vmatpush.bf16.msra.mxu1 %v1722_v5  ;;  %v1728_v14 = vld [vmem:[%s2253_s1 + $0xa0] sm:$0xff]  ;;  %v1727_v18 = vld [vmem:[%s2253_s1 + $0x98] sm:$0xff]  ;;  %v1726_v23 = vld [vmem:[%s2253_s1 + $0x90] sm:$0xff] }
   0x8   :  { %1042 = vmatpush.bf16.msra.mxu2 %v1730_v6  ;;  %v1736_v15 = vld [vmem:[%s2253_s1 + $0xe0] sm:$0xff]  ;;  %v1735_v19 = vld [vmem:[%s2253_s1 + $0xd8] sm:$0xff]  ;;  %v1734_v24 = vld [vmem:[%s2253_s1 + $0xd0] sm:$0xff] }
   0x9   :  { %1055 = vmatpush.bf16.msra.mxu3 %v1738_v7  ;;  %v15_v20 = vld [vmem:[%s2252_s0] sm:$0xff] }
   0xa   :  { %1017 = vmatpush.bf16.msra.mxu0 %v1713_v8  ;;  %262 = vst [vmem:[#allocation1] ss:$9 sm:$0xff] %v15_v20 }
   0xb   :  { %1030 = vmatpush.bf16.msra.mxu1 %v1721_v9 }
   0xc   :  { %1043 = vmatpush.bf16.msra.mxu2 %v1729_v10 }
   0xd   :  { %1056 = vmatpush.bf16.msra.mxu3 %v1737_v11 }
   0xe   :  { %1018 = vmatpush.bf16.msra.mxu0 %v1712_v12 }
   0xf   :  { %1031 = vmatpush.bf16.msra.mxu1 %v1720_v13 }
  0x10   :  { %1044 = vmatpush.bf16.msra.mxu2 %v1728_v14 }
  0x11   :  { %1057 = vmatpush.bf16.msra.mxu3 %v1736_v15 }
  0x12   :  { %1019 = vmatpush.bf16.msra.mxu0 %v1711_v16 }
  0x13   :  { %1032 = vmatpush.bf16.msra.mxu1 %v1719_v17 }
  0x14   :  { %1045 = vmatpush.bf16.msra.mxu2 %v1727_v18 }
  0x15   :  { %1058 = vmatpush.bf16.msra.mxu3 %v1735_v19 }
  0x16   :  { %8 = vsyncpa [#allocation3], 0  ;;  %1020 = vmatpush.bf16.msra.mxu0 %v1710_v21  ;;  %v1709_v25 = vld [vmem:[%s2253_s1 + $0x8] sm:$0xff]  ;;  %v1708_v29 = vld [vmem:[%s2253_s1] sm:$0xff]  ;;  %s1219_s11 = sshll.u32 %s2255_s3, 4  ;;  %vm1210_vm0 = vcmask 402432   ;;  %s1220_s11 = int_to_ptr.hbm [resolvable:$true] %s1219_s11 }
  0x17   :  { %1033 = vmatpush.bf16.msra.mxu1 %v1718_v22  ;;  %v1717_v26 = vld [vmem:[%s2253_s1 + $0x48] sm:$0xff]  ;;  %v1716_v30 = vld [vmem:[%s2253_s1 + $0x40] sm:$0xff]  ;;  %v1747_v32 = vld [vmem:[%s2253_s1 + $0x138] sm:$0xff] }
  0x18   :  { %1046 = vmatpush.bf16.msra.mxu2 %v1726_v23  ;;  %v1725_v27 = vld [vmem:[%s2253_s1 + $0x88] sm:$0xff]  ;;  %v1724_v31 = vld [vmem:[%s2253_s1 + $0x80] sm:$0xff]  ;;  %v1755_v33 = vld [vmem:[%s2253_s1 + $0x178] sm:$0xff] }
  0x19   :  { %1059 = vmatpush.bf16.msra.mxu3 %v1734_v24  ;;  %v1733_v28 = vld [vmem:[%s2253_s1 + $0xc8] sm:$0xff]  ;;  %v1763_v34 = vld [vmem:[%s2253_s1 + $0x1b8] sm:$0xff]  ;;  %v1732_v35 = vld [vmem:[%s2253_s1 + $0xc0] sm:$0xff] }
  0x1a   :  { %1021 = vmatpush.bf16.msra.mxu0 %v1709_v25  ;;  %v1771_v36 = vld [vmem:[%s2253_s1 + $0x1f8] sm:$0xff]  ;;  %v263_v37 = vld [vmem:[#allocation1] sm:$0xff]  ;;  %v1746_v38 = vld [vmem:[%s2253_s1 + $0x130] sm:$0xff] }
  0x1b   :  { %1034 = vmatpush.bf16.msra.mxu1 %v1717_v26  ;;  %v265_v39 = vld [vmem:[#allocation1 + $0x12] sm:$0xff]  ;;  %v264_v42 = vld [vmem:[#allocation1 + $0x9] sm:$0xff]  ;;  %v266_v44 = vld [vmem:[#allocation1 + $0x1b] sm:$0xff] }
  0x1c   :  { %1047 = vmatpush.bf16.msra.mxu2 %v1725_v27  ;;  %v1754_v40 = vld [vmem:[%s2253_s1 + $0x170] sm:$0xff]  ;;  %v1745_v45 = vld [vmem:[%s2253_s1 + $0x128] sm:$0xff]  ;;  %v1744_v49 = vld [vmem:[%s2253_s1 + $0x120] sm:$0xff] }
  0x1d   :  { %1060 = vmatpush.bf16.msra.mxu3 %v1733_v28  ;;  %v1762_v41 = vld [vmem:[%s2253_s1 + $0x1b0] sm:$0xff]  ;;  %v1753_v46 = vld [vmem:[%s2253_s1 + $0x168] sm:$0xff]  ;;  %v2015_v52 = vld [vmem:[#allocation1 + $0x3f] sm:$0xff] }
  0x1e   :  { %1022 = vmatpush.bf16.msra.mxu0 %v1708_v29  ;;  %v1770_v43 = vld [vmem:[%s2253_s1 + $0x1f0] sm:$0xff]  ;;  %v1761_v47 = vld [vmem:[%s2253_s1 + $0x1a8] sm:$0xff]  ;;  %v1752_v55 = vld [vmem:[%s2253_s1 + $0x160] sm:$0xff] }
  0x1f   :  { %1035 = vmatpush.bf16.msra.mxu1 %v1716_v30  ;;  %v1769_v48 = vld [vmem:[%s2253_s1 + $0x1e8] sm:$0xff]  ;;  %v269_v50 = vld [vmem:[#allocation1 + $0x36] sm:$0xff]  ;;  %v1760_v56 = vld [vmem:[%s2253_s1 + $0x1a0] sm:$0xff] }
  0x20   :  { %1048 = vmatpush.bf16.msra.mxu2 %v1724_v31  ;;  %v267_v51 = vld [vmem:[#allocation1 + $0x24] sm:$0xff]  ;;  %v268_v54 = vld [vmem:[#allocation1 + $0x2d] sm:$0xff]  ;;  %v1743_v58 = vld [vmem:[%s2253_s1 + $0x118] sm:$0xff] }
  0x21   :  { %1061 = vmatpush.bf16.msra.mxu3 %v1732_v35  ;;  %1023 = vmatmul.bf16.vlgmr.msra.gmra.mxu0 %v263_v37  ;;  %v16_v53 = vld [vmem:[%s2252_s0 + $0x8] sm:$0x7f]  ;;  %v1768_v57 = vld [vmem:[%s2253_s1 + $0x1e0] sm:$0xff]  ;;  %v1751_v59 = vld [vmem:[%s2253_s1 + $0x158] sm:$0xff] }
  0x22   :  { %1067 = vmatpush.bf16.msrb.mxu0 %v1747_v32  ;;  %1036 = vmatmul.bf16.vlgmr.msra.gmra.mxu1 %v264_v42  ;;  %272 = vst [vmem:[#allocation1] ss:$9 sm:$0xff] %v16_v53  ;;  %v1759_v60 = vld [vmem:[%s2253_s1 + $0x198] sm:$0xff]  ;;  %v1742_v62 = vld [vmem:[%s2253_s1 + $0x110] sm:$0xff]  ;;  %v1741_v2 = vld [vmem:[%s2253_s1 + $0x108] sm:$0xff] }
  0x23   :  { %1080 = vmatpush.bf16.msrb.mxu1 %v1755_v33  ;;  %1049 = vmatmul.bf16.vlgmr.msra.gmra.mxu2 %v265_v39  ;;  %v1767_v61 = vld [vmem:[%s2253_s1 + $0x1d8] sm:$0xff]  ;;  %v1750_v63 = vld [vmem:[%s2253_s1 + $0x150] sm:$0xff]  ;;  %v1749_v3 = vld [vmem:[%s2253_s1 + $0x148] sm:$0xff] }
  0x24   :  { %1093 = vmatpush.bf16.msrb.mxu2 %v1763_v34  ;;  %1062 = vmatmul.bf16.vlgmr.msra.gmra.mxu3 %v266_v44  ;;  %v1758_v0 = vld [vmem:[%s2253_s1 + $0x190] sm:$0xff]  ;;  %v1757_v4 = vld [vmem:[%s2253_s1 + $0x188] sm:$0xff]  ;;  %v1740_v6 = vld [vmem:[%s2253_s1 + $0x100] sm:$0xff] }
  0x25   :  { %1106 = vmatpush.bf16.msrb.mxu3 %v1771_v36  ;;  %v1766_v1 = vld [vmem:[%s2253_s1 + $0x1d0] sm:$0xff]  ;;  %v1765_v5 = vld [vmem:[%s2253_s1 + $0x1c8] sm:$0xff]  ;;  %v1748_v7 = vld [vmem:[%s2253_s1 + $0x140] sm:$0xff] }
  0x26   :  { %1068 = vmatpush.bf16.msrb.mxu0 %v1746_v38  ;;  %v1756_v8 = vld [vmem:[%s2253_s1 + $0x180] sm:$0xff]  ;;  %v1779_v9 = vld [vmem:[%s2253_s1 + $0x238] sm:$0xff]  ;;  %v1778_v14 = vld [vmem:[%s2253_s1 + $0x230] sm:$0xff] }
  0x27   :  { %1081 = vmatpush.bf16.msrb.mxu1 %v1754_v40  ;;  %v1787_v10 = vld [vmem:[%s2253_s1 + $0x278] sm:$0xff]  ;;  %v1764_v12 = vld [vmem:[%s2253_s1 + $0x1c0] sm:$0xff]  ;;  %v1786_v15 = vld [vmem:[%s2253_s1 + $0x270] sm:$0xff] }
  0x28   :  { %1094 = vmatpush.bf16.msrb.mxu2 %v1762_v41  ;;  %v1795_v11 = vld [vmem:[%s2253_s1 + $0x2b8] sm:$0xff]  ;;  %v1794_v16 = vld [vmem:[%s2253_s1 + $0x2b0] sm:$0xff]  ;;  %v1777_v18 = vld [vmem:[%s2253_s1 + $0x228] sm:$0xff] }
  0x29   :  { %1107 = vmatpush.bf16.msrb.mxu3 %v1770_v43  ;;  %v1803_v13 = vld [vmem:[%s2253_s1 + $0x2f8] sm:$0xff]  ;;  %v1802_v17 = vld [vmem:[%s2253_s1 + $0x2f0] sm:$0xff]  ;;  %v1785_v19 = vld [vmem:[%s2253_s1 + $0x268] sm:$0xff] }
  0x2a   :  { %1069 = vmatpush.bf16.msrb.mxu0 %v1745_v45  ;;  %v1793_v20 = vld [vmem:[%s2253_s1 + $0x2a8] sm:$0xff]  ;;  %v1776_v22 = vld [vmem:[%s2253_s1 + $0x220] sm:$0xff]  ;;  %v1775_v26 = vld [vmem:[%s2253_s1 + $0x218] sm:$0xff] }
  0x2b   :  { %1082 = vmatpush.bf16.msrb.mxu1 %v1753_v46  ;;  %v1801_v21 = vld [vmem:[%s2253_s1 + $0x2e8] sm:$0xff]  ;;  %v1784_v23 = vld [vmem:[%s2253_s1 + $0x260] sm:$0xff]  ;;  %v1783_v27 = vld [vmem:[%s2253_s1 + $0x258] sm:$0xff] }
  0x2c   :  { %1095 = vmatpush.bf16.msrb.mxu2 %v1761_v47  ;;  %v1792_v24 = vld [vmem:[%s2253_s1 + $0x2a0] sm:$0xff]  ;;  %v1791_v28 = vld [vmem:[%s2253_s1 + $0x298] sm:$0xff]  ;;  %v1774_v30 = vld [vmem:[%s2253_s1 + $0x210] sm:$0xff] }
  0x2d   :  { %1108 = vmatpush.bf16.msrb.mxu3 %v1769_v48  ;;  %v1800_v25 = vld [vmem:[%s2253_s1 + $0x2e0] sm:$0xff]  ;;  %v1799_v29 = vld [vmem:[%s2253_s1 + $0x2d8] sm:$0xff]  ;;  %v1782_v31 = vld [vmem:[%s2253_s1 + $0x250] sm:$0xff] }
  0x2e   :  { %1070 = vmatpush.bf16.msrb.mxu0 %v1744_v49  ;;  %v1790_v32 = vld [vmem:[%s2253_s1 + $0x290] sm:$0xff]  ;;  %v1773_v34 = vld [vmem:[%s2253_s1 + $0x208] sm:$0xff]  ;;  %v1772_v38 = vld [vmem:[%s2253_s1 + $0x200] sm:$0xff] }
  0x2f   :  { %1083 = vmatpush.bf16.msrb.mxu1 %v1752_v55  ;;  %v1798_v33 = vld [vmem:[%s2253_s1 + $0x2d0] sm:$0xff]  ;;  %v1781_v35 = vld [vmem:[%s2253_s1 + $0x248] sm:$0xff]  ;;  %v1780_v39 = vld [vmem:[%s2253_s1 + $0x240] sm:$0xff] }
  0x30   :  { %1096 = vmatpush.bf16.msrb.mxu2 %v1760_v56  ;;  %v1789_v36 = vld [vmem:[%s2253_s1 + $0x288] sm:$0xff]  ;;  %v1788_v40 = vld [vmem:[%s2253_s1 + $0x280] sm:$0xff]  ;;  %v1811_v41 = vld [vmem:[%s2253_s1 + $0x338] sm:$0xff] }
  0x31   :  { %1109 = vmatpush.bf16.msrb.mxu3 %v1768_v57  ;;  %v1797_v37 = vld [vmem:[%s2253_s1 + $0x2c8] sm:$0xff]  ;;  %v1819_v42 = vld [vmem:[%s2253_s1 + $0x378] sm:$0xff]  ;;  %v1796_v44 = vld [vmem:[%s2253_s1 + $0x2c0] sm:$0xff] }
  0x32   :  { %1071 = vmatpush.bf16.msrb.mxu0 %v1743_v58  ;;  %v1827_v43 = vld [vmem:[%s2253_s1 + $0x3b8] sm:$0xff]  ;;  %v273_v45 = vld [vmem:[#allocation1] sm:$0xff]  ;;  %v274_v47 = vld [vmem:[#allocation1 + $0x9] sm:$0xff] }
  0x33   :  { %1084 = vmatpush.bf16.msrb.mxu1 %v1751_v59  ;;  %v275_v46 = vld [vmem:[#allocation1 + $0x12] sm:$0xff]  ;;  %v1817_v53 = vld [vmem:[%s2253_s1 + $0x368] sm:$0xff]  ;;  %v1808_v55 = vld [vmem:[%s2253_s1 + $0x320] sm:$0xff] }
  0x34   :  { %1097 = vmatpush.bf16.msrb.mxu2 %v1759_v60  ;;  %v1810_v48 = vld [vmem:[%s2253_s1 + $0x330] sm:$0xff]  ;;  %v1816_v56 = vld [vmem:[%s2253_s1 + $0x360] sm:$0xff]  ;;  %v1807_v58 = vld [vmem:[%s2253_s1 + $0x318] sm:$0xff] }
  0x35   :  { %1110 = vmatpush.bf16.msrb.mxu3 %v1767_v61  ;;  %v1818_v49 = vld [vmem:[%s2253_s1 + $0x370] sm:$0xff]  ;;  %v1824_v57 = vld [vmem:[%s2253_s1 + $0x3a0] sm:$0xff]  ;;  %v1815_v59 = vld [vmem:[%s2253_s1 + $0x358] sm:$0xff] }
  0x36   :  { %1072 = vmatpush.bf16.msrb.mxu0 %v1742_v62  ;;  %v1823_v60 = vld [vmem:[%s2253_s1 + $0x398] sm:$0xff]  ;;  %v1806_v61 = vld [vmem:[%s2253_s1 + $0x310] sm:$0xff] }
  0x37   :  { %1085 = vmatpush.bf16.msrb.mxu1 %v1750_v63  ;;  %v1814_v62 = vld [vmem:[%s2253_s1 + $0x350] sm:$0xff] }
  0x38   :  { %1098 = vmatpush.bf16.msrb.mxu2 %v1758_v0  ;;  %v1822_v63 = vld [vmem:[%s2253_s1 + $0x390] sm:$0xff]  ;;  %v1805_v0 = vld [vmem:[%s2253_s1 + $0x308] sm:$0xff] }
  0x39   :  { %1111 = vmatpush.bf16.msrb.mxu3 %v1766_v1  ;;  %v1813_v1 = vld [vmem:[%s2253_s1 + $0x348] sm:$0xff] }
  0x3a   :  { %1073 = vmatpush.bf16.msrb.mxu0 %v1741_v2  ;;  %v1821_v2 = vld [vmem:[%s2253_s1 + $0x388] sm:$0xff] }
  0x3b   :  { %1086 = vmatpush.bf16.msrb.mxu1 %v1749_v3  ;;  %v1804_v3 = vld [vmem:[%s2253_s1 + $0x300] sm:$0xff] }
  0x3c   :  { %1099 = vmatpush.bf16.msrb.mxu2 %v1757_v4  ;;  %v1812_v4 = vld [vmem:[%s2253_s1 + $0x340] sm:$0xff] }
  0x3d   :  { %1112 = vmatpush.bf16.msrb.mxu3 %v1765_v5  ;;  %v1820_v5 = vld [vmem:[%s2253_s1 + $0x380] sm:$0xff] }
  0x3e   :  { %1074 = vmatpush.bf16.msrb.mxu0 %v1740_v6  ;;  %v277_v6 = vld [vmem:[#allocation1 + $0x24] sm:$0xff] }
  0x3f   :  { %1087 = vmatpush.bf16.msrb.mxu1 %v1748_v7  ;;  %v278_v7 = vld [vmem:[#allocation1 + $0x2d] sm:$0xff] }
  0x40   :  { %1100 = vmatpush.bf16.msrb.mxu2 %v1756_v8  ;;  %v279_v8 = vld [vmem:[#allocation1 + $0x36] sm:$0xff] }
  0x41   :  { %1113 = vmatpush.bf16.msrb.mxu3 %v1764_v12  ;;  %1075 = vmatmul.bf16.vlgmr.msrb.gmra.mxu0 %v267_v51  ;;  %v1826_v51 = vld [vmem:[%s2253_s1 + $0x3b0] sm:$0xff] }
  0x42   :  { %1119 = vmatpush.bf16.msra.mxu0 %v1779_v9  ;;  %1088 = vmatmul.bf16.vlgmr.msrb.gmra.mxu1 %v268_v54  ;;  %v1825_v54 = vld [vmem:[%s2253_s1 + $0x3a8] sm:$0xff]  ;;  %v1829_v9 = vld [vmem:[%s2254_s2] ss:$0 sm:$0xff] }
  0x43   :  { %1132 = vmatpush.bf16.msra.mxu1 %v1787_v10  ;;  %1101 = vmatmul.bf16.vlgmr.msrb.gmra.mxu2 %v269_v50  ;;  %v276_v50 = vld [vmem:[#allocation1 + $0x1b] sm:$0xff] }
  0x44   :  { %1145 = vmatpush.bf16.msra.mxu2 %v1795_v11  ;;  %1114 = vmatmul.bf16.vlgmr.msrb.gmra.mxu3 %v2015_v52  ;;  %v1809_v52 = vld [vmem:[%s2253_s1 + $0x328] sm:$0xff]  ;;  %s1856_s1 = smov [#allocation2]  }
  0x45   :  { %1158 = vmatpush.bf16.msra.mxu3 %v1803_v13  ;;  %s1217_s2 = sshll.u32 %s1856_s1, 4  ;;  %s1218_s2 = int_to_ptr.vmem [resolvable:$true] %s1217_s2 }
  0x46   :  { %1120 = vmatpush.bf16.msra.mxu0 %v1778_v14 }
  0x47   :  { %1133 = vmatpush.bf16.msra.mxu1 %v1786_v15 }
  0x48   :  { %1146 = vmatpush.bf16.msra.mxu2 %v1794_v16 }
  0x49   :  { %1159 = vmatpush.bf16.msra.mxu3 %v1802_v17 }
  0x4a   :  { %1121 = vmatpush.bf16.msra.mxu0 %v1777_v18 }
  0x4b   :  { %1134 = vmatpush.bf16.msra.mxu1 %v1785_v19 }
  0x4c   :  { %1147 = vmatpush.bf16.msra.mxu2 %v1793_v20 }
  0x4d   :  { %1160 = vmatpush.bf16.msra.mxu3 %v1801_v21 }
  0x4e   :  { %1122 = vmatpush.bf16.msra.mxu0 %v1776_v22 }
  0x4f   :  { %1135 = vmatpush.bf16.msra.mxu1 %v1784_v23 }
  0x50   :  { %1148 = vmatpush.bf16.msra.mxu2 %v1792_v24 }
  0x51   :  { %1161 = vmatpush.bf16.msra.mxu3 %v1800_v25 }
  0x52   :  { %1123 = vmatpush.bf16.msra.mxu0 %v1775_v26 }
  0x53   :  { %1136 = vmatpush.bf16.msra.mxu1 %v1783_v27 }
  0x54   :  { %1149 = vmatpush.bf16.msra.mxu2 %v1791_v28 }
  0x55   :  { %1162 = vmatpush.bf16.msra.mxu3 %v1799_v29 }
  0x56   :  { %1124 = vmatpush.bf16.msra.mxu0 %v1774_v30 }
  0x57   :  { %1137 = vmatpush.bf16.msra.mxu1 %v1782_v31 }
  0x58   :  { %1150 = vmatpush.bf16.msra.mxu2 %v1790_v32 }
  0x59   :  { %1163 = vmatpush.bf16.msra.mxu3 %v1798_v33 }
  0x5a   :  { %1125 = vmatpush.bf16.msra.mxu0 %v1773_v34 }
  0x5b   :  { %1138 = vmatpush.bf16.msra.mxu1 %v1781_v35 }
  0x5c   :  { %1151 = vmatpush.bf16.msra.mxu2 %v1789_v36 }
  0x5d   :  { %1164 = vmatpush.bf16.msra.mxu3 %v1797_v37 }
  0x5e   :  { %1126 = vmatpush.bf16.msra.mxu0 %v1772_v38 }
  0x5f   :  { %1139 = vmatpush.bf16.msra.mxu1 %v1780_v39 }
  0x60   :  { %1152 = vmatpush.bf16.msra.mxu2 %v1788_v40 }
  0x61   :  { %1165 = vmatpush.bf16.msra.mxu3 %v1796_v44  ;;  %1127 = vmatmul.bf16.vlgmr.msra.gmra.mxu0 %v273_v45 }
  0x62   :  { %1171 = vmatpush.bf16.msrb.mxu0 %v1811_v41  ;;  %1140 = vmatmul.bf16.vlgmr.msra.gmra.mxu1 %v274_v47 }
  0x63   :  { %1184 = vmatpush.bf16.msrb.mxu1 %v1819_v42  ;;  %1153 = vmatmul.bf16.vlgmr.msra.gmra.mxu2 %v275_v46 }
  0x64   :  { %1197 = vmatpush.bf16.msrb.mxu2 %v1827_v43  ;;  %1166 = vmatmul.bf16.vlgmr.msra.gmra.mxu3 %v276_v50 }
  0x66   :  { %1172 = vmatpush.bf16.msrb.mxu0 %v1810_v48 }
  0x67   :  { %1185 = vmatpush.bf16.msrb.mxu1 %v1818_v49 }
  0x68   :  { %1198 = vmatpush.bf16.msrb.mxu2 %v1826_v51 }
  0x6a   :  { %1173 = vmatpush.bf16.msrb.mxu0 %v1809_v52 }
  0x6b   :  { %1186 = vmatpush.bf16.msrb.mxu1 %v1817_v53 }
  0x6c   :  { %1199 = vmatpush.bf16.msrb.mxu2 %v1825_v54 }
  0x6e   :  { %1174 = vmatpush.bf16.msrb.mxu0 %v1808_v55 }
  0x6f   :  { %1187 = vmatpush.bf16.msrb.mxu1 %v1816_v56 }
  0x70   :  { %1200 = vmatpush.bf16.msrb.mxu2 %v1824_v57 }
  0x72   :  { %1175 = vmatpush.bf16.msrb.mxu0 %v1807_v58 }
  0x73   :  { %1188 = vmatpush.bf16.msrb.mxu1 %v1815_v59 }
  0x74   :  { %1201 = vmatpush.bf16.msrb.mxu2 %v1823_v60 }
  0x76   :  { %1176 = vmatpush.bf16.msrb.mxu0 %v1806_v61 }
  0x77   :  { %1189 = vmatpush.bf16.msrb.mxu1 %v1814_v62 }
  0x78   :  { %1202 = vmatpush.bf16.msrb.mxu2 %v1822_v63 }
  0x7a   :  { %1177 = vmatpush.bf16.msrb.mxu0 %v1805_v0 }
  0x7b   :  { %1190 = vmatpush.bf16.msrb.mxu1 %v1813_v1 }
  0x7c   :  { %1203 = vmatpush.bf16.msrb.mxu2 %v1821_v2 }
  0x7e   :  { %1178 = vmatpush.bf16.msrb.mxu0 %v1804_v3 }
  0x7f   :  { %1191 = vmatpush.bf16.msrb.mxu1 %v1812_v4 }
  0x80   :  { %1204 = vmatpush.bf16.msrb.mxu2 %v1820_v5 }
  0x81   :  { %1179 = vmatmul.bf16.vlgmr.msrb.gmra.mxu0 %v277_v6 }
  0x82   :  { %1192 = vmatmul.bf16.vlgmr.msrb.gmra.mxu1 %v278_v7 }
  0x83   :  { %1205 = vmatmul.bf16.vlgmr.msrb.gmra.mxu2 %v279_v8 }
  0x9e   :  { %v1024_v10 = vpop.f32.mrf.mxu0 }
  0x9f   :  { %v1025_v11 = vadd.f32 %v1829_v9, %v1024_v10  ;;  %v1037_v12 = vpop.f32.mrf.mxu1 }
  0xa1   :  { %v1038_v13 = vadd.f32 %v1037_v12, %v1025_v11 }
  0xa6   :  { %v1050_v14 = vpop.f32.mrf.mxu2  ;;  %v1026_v16 = vpop.f32.mrf.mxu0 }
  0xa7   :  { %v1051_v15 = vadd.f32 %v1050_v14, %v1038_v13  ;;  %v1063_v17 = vpop.f32.mrf.mxu3  ;;  %v1039_v18 = vpop.f32.mrf.mxu1 }
  0xa9   :  { %v1064_v19 = vadd.f32 %v1063_v17, %v1051_v15 }
  0xae   :  { %v1052_v20 = vpop.f32.mrf.mxu2 }
  0xaf   :  { %v1065_v21 = vpop.f32.mrf.mxu3 }
  0xbe   :  { %v1076_v22 = vpop.f32.mrf.mxu0 }
  0xbf   :  { %v1089_v23 = vpop.f32.mrf.mxu1  ;;  %v1077_v32 = vadd.f32 %v1076_v22, %v1064_v19 }
  0xc1   :  { %v1090_v37 = vadd.f32 %v1089_v23, %v1077_v32 }
  0xc6   :  { %v1102_v24 = vpop.f32.mrf.mxu2  ;;  %v1078_v26 = vpop.f32.mrf.mxu0 }
  0xc7   :  { %v1115_v25 = vpop.f32.mrf.mxu3  ;;  %v1091_v27 = vpop.f32.mrf.mxu1  ;;  %v1103_v38 = vadd.f32 %v1102_v24, %v1090_v37 }
  0xc9   :  { %v1116_v41 = vadd.f32 %v1115_v25, %v1103_v38 }
  0xce   :  { %v1104_v28 = vpop.f32.mrf.mxu2 }
  0xcf   :  { %v1117_v29 = vpop.f32.mrf.mxu3 }
  0xde   :  { %v1128_v30 = vpop.f32.mrf.mxu0 }
  0xdf   :  { %v1141_v31 = vpop.f32.mrf.mxu1  ;;  %v1129_v42 = vadd.f32 %v1128_v30, %v1116_v41 }
  0xe1   :  { %v1142_v43 = vadd.f32 %v1141_v31, %v1129_v42 }
  0xe6   :  { %v1154_v33 = vpop.f32.mrf.mxu2  ;;  %v1130_v34 = vpop.f32.mrf.mxu0 }
  0xe7   :  { %v1167_v35 = vpop.f32.mrf.mxu3  ;;  %v1143_v36 = vpop.f32.mrf.mxu1  ;;  %v1155_v44 = vadd.f32 %v1154_v33, %v1142_v43 }
  0xe9   :  { %v1168_v46 = vadd.f32 %v1167_v35, %v1155_v44 }
  0xee   :  { %v1156_v39 = vpop.f32.mrf.mxu2 }
  0xef   :  { %v1169_v40 = vpop.f32.mrf.mxu3 }
  0xfe   :  { %v1180_v45 = vpop.f32.mrf.mxu0 }
  0xff   :  { %v1193_v47 = vpop.f32.mrf.mxu1  ;;  %v1181_v48 = vadd.f32 %v1180_v45, %v1168_v46 }
 0x101   :  { %v1194_v49 = vadd.f32 %v1193_v47, %v1181_v48 }
 0x106   :  { %v1206_v50 = vpop.f32.mrf.mxu2  ;;  %v1182_v51 = vpop.f32.mrf.mxu0 }
 0x107   :  { %v1207_v52 = vadd.f32 %v1206_v50, %v1194_v49  ;;  %v1195_v53 = vpop.f32.mrf.mxu1 }
 0x109   :  { %1211 = vst.msk [vmem:[#allocation2] sm:$0x3] %vm1210_vm0, %v1207_v52 }
 0x10a   :  { %1222 = dma.vmem_to_hbm [thread:$0]  %s1218_s2, 32, %s1220_s11, [#allocation3]  }
 0x10e   :  { %v1208_v54 = vpop.f32.mrf.mxu2 }
 0x10f   :  { %1854 = dma.done.wait [#allocation3], 32  }
 0x110   :  { %1855 = vsyncadd [#allocation3], 4294967264 }
 0x111   :  { %1227 = vsyncpa [#allocation3], 1 }

</bundles_post_ra>
